<compile_context>
chip_gen: v7x
topology: tpu7x:2x2x1
jax: 0.10.0
libtpu: 0.0.40
codegen_flags: <defaults>
</compile_context>

<pallas_src>
import functools
import numpy as np
import jax
import jax.numpy as jnp
from jax import lax
from jax.experimental import pallas as pl
from jax.experimental.pallas import tpu as pltpu

# ----------------------------------------------------------------------------
# Fused forward kernel
# ----------------------------------------------------------------------------

def _fused_forward_kernel(*refs, treedef, n_fixed):
    (node_ref, pos_ref, row_e1_ref, col_e1_ref, row_1e_ref, et_e1_ref) = refs[:n_fixed]
    out_ref = refs[-1]
    params = jax.tree_util.tree_unflatten(treedef, list(refs[n_fixed:-1]))

    f32 = jnp.float32
    N = pos_ref.shape[0]
    E = row_e1_ref.shape[0]

    node_emb = node_ref[...]          # [N, Fin]
    pos0 = pos_ref[...]               # [N, 3]
    row_e1 = row_e1_ref[...]          # [E, 1] int32
    col_e1 = col_e1_ref[...]          # [E, 1] int32
    row_1e = row_1e_ref[...]          # [1, E] int32
    et_e1 = et_e1_ref[...]            # [E, 1] int32

    # --- one-hot gather / scatter operators: built ONCE, reused everywhere --------------
    iota_en = lax.broadcasted_iota(jnp.int32, (E, N), 1)          # [E, N]
    row_oh = (row_e1 == iota_en).astype(f32)                      # gather x[row]
    col_oh = (col_e1 == iota_en).astype(f32)                      # gather x[col]
    iota_ne = lax.broadcasted_iota(jnp.int32, (N, E), 0)          # [N, E]
    row_oh_t = (row_1e == iota_ne).astype(f32)                    # scatter_add over row

    def gather_row(x):
        return jnp.dot(row_oh, x, preferred_element_type=f32)

    def gather_col(x):
        return jnp.dot(col_oh, x, preferred_element_type=f32)

    def scatter_add_row(x):
        return jnp.dot(row_oh_t, x, preferred_element_type=f32)

    def mm(x, w_ref, b_ref=None, relu=False):
        y = jnp.dot(x, w_ref[...], preferred_element_type=f32)
        if b_ref is not None:
            y = y + b_ref[...]
        if relu:
            y = jnp.maximum(y, 0.0)
        return y

    # --- edge geometry from the ORIGINAL positions (matches reference: computed once) ---
    diff0 = gather_row(pos0) - gather_col(pos0)                   # [E, 3]
    d2 = jnp.sum(diff0 * diff0, axis=-1, keepdims=True)           # [E, 1]
    inv_len = lax.rsqrt(d2)        # EUP; no eps, matches the torch reference (no self-loops assumed)
    edge_length = jnp.sqrt(d2)                                    # [E, 1]

    # edge-type one-hot (shared by both blocks)
    T = params["blocks"][0]["bond_emb"].shape[0]
    iota_et = lax.broadcasted_iota(jnp.int32, (E, T), 1)
    et_oh = (et_e1 == iota_et).astype(f32)                        # [E, T]

    pos_cur = pos0
    for bp in params["blocks"]:
        # --- edge_encoder_local: MLP(edge_length) * Embedding(edge_type) ----------------
        # TODO(synk): get_edge_encoder source not provided; standard GeoDiff MLPEdgeEncoder used.
        d_emb = jnp.maximum(edge_length * bp["ee_w1"][...] + bp["ee_b1"][...], 0.0)   # [E, H]
        d_emb = mm(d_emb, bp["ee_w2"], bp["ee_b2"])
        bond = jnp.dot(et_oh, bp["bond_emb"][...], preferred_element_type=f32)        # [E, H]
        edge_attr = d_emb * bond

        # --- encoder_local (GCL message passing), concat-free split-weight matmuls ------
        # TODO(synk): GCLEncoder source not provided; EGNN-style GCL message passing used.
        h = mm(node_emb, bp["node_w"], bp["node_b"])                                   # [N, H]
        for cv in bp["convs"]:
            h_row = gather_row(h)                                                      # [E, H]
            h_col = gather_col(h)
            m = (jnp.dot(h_row, cv["e_w1_r"][...], preferred_element_type=f32)
                 + jnp.dot(h_col, cv["e_w1_c"][...], preferred_element_type=f32)
                 + jnp.dot(edge_attr, cv["e_w1_e"][...], preferred_element_type=f32)
                 + cv["e_b1"][...])
            m = jnp.maximum(m, 0.0)
            m = mm(m, cv["e_w2"], cv["e_b2"])
            agg = scatter_add_row(m)                                                   # [N, H]
            dh = (jnp.dot(h, cv["n_w1_h"][...], preferred_element_type=f32)
                  + jnp.dot(agg, cv["n_w1_a"][...], preferred_element_type=f32)
                  + cv["n_b1"][...])
            dh = jnp.maximum(dh, 0.0)
            dh = mm(dh, cv["n_w2"], cv["n_b2"])
            h = h + dh

        # --- pair features + grad_local_dist_mlp (concat-free) --------------------------
        # TODO(synk): assemble_node_pair_feature_1 source not provided; cat([h_i,h_j,e_ij]) used.
        h_row = gather_row(h)
        h_col = gather_col(h)
        x = (jnp.dot(h_row, bp["g_w1_r"][...], preferred_element_type=f32)
             + jnp.dot(h_col, bp["g_w1_c"][...], preferred_element_type=f32)
             + jnp.dot(edge_attr, bp["g_w1_e"][...], preferred_element_type=f32)
             + bp["g_b1"][...])
        x = jnp.maximum(x, 0.0)
        x = mm(x, bp["g_w2"], bp["g_b2"], relu=True)                                   # [E, H/2]
        # last (1-unit) layer as a lane reduction; the 1/100 segment-sum scale is folded in.
        edge_inv = jnp.sum(x * bp["g_w3"][...], axis=-1, keepdims=True) + bp["g_b3"][...]  # [E, 1]

        # --- geometric update: dd_dr * edge_inv, scatter_add over row, pos += agg -------
        dd_dr = (gather_row(pos_cur) - gather_col(pos_cur)) * inv_len                  # [E, 3]
        trans = dd_dr * edge_inv
        pos_cur = pos_cur + scatter_add_row(trans)                                     # [N, 3]

    out_ref[...] = pos_cur - pos0


def _full_block_spec(arr):
    nd = arr.ndim
    return pl.BlockSpec(arr.shape, lambda i, _nd=nd: (0,) * _nd)


def fused_forward(packed_params, node_emb, pos, row_e1, col_e1, row_1e, et_e1):
    flat_params, treedef = jax.tree_util.tree_flatten(packed_params)
    fixed = [node_emb, pos, row_e1, col_e1, row_1e, et_e1]
    all_inputs = fixed + flat_params
    n_fixed = len(fixed)
    N = pos.shape[0]

    kern = functools.partial(_fused_forward_kernel, treedef=treedef, n_fixed=n_fixed)
    return pl.pallas_call(
        kern,
        out_shape=jax.ShapeDtypeStruct((N, 3), jnp.float32),
        grid=(1,),
        in_specs=[_full_block_spec(a) for a in all_inputs],
        out_specs=pl.BlockSpec((N, 3), lambda i: (0, 0)),
        compiler_params=pltpu.CompilerParams(dimension_semantics=("arbitrary",)),
    )(*all_inputs)


# ----------------------------------------------------------------------------
# Noise schedule buffers (gamma / alpha / sigma) — registered in __init__,
# not used by forward(); reproduced for fidelity.
# ----------------------------------------------------------------------------

def clip_noise_schedule(alphas2, clip_value=0.001):
    alphas2 = np.concatenate([np.ones(1), alphas2], axis=0)
    alphas_step = alphas2[1:] / alphas2[:-1]
    alphas_step = np.clip(alphas_step, a_min=clip_value, a_max=1.0)
    return np.cumprod(alphas_step, axis=0)


def polynomial_schedule(timesteps, s=0.0001, power=3.0):
    steps = timesteps + 1
    x = np.linspace(0, steps, steps)
    alphas2 = (1 - np.power(x / steps, power)) ** 2
    alphas2 = clip_noise_schedule(alphas2, clip_value=0.001)
    precision = 1 - 2 * s
    return precision * alphas2 + s


def make_noise_schedule(timesteps, precision=1e-05, power=2.0):
    alphas2 = polynomial_schedule(timesteps, s=precision, power=power)
    sigmas2 = 1 - alphas2
    gamma = -(np.log(alphas2) - np.log(sigmas2))
    alpha = np.sqrt(1.0 / (1.0 + np.exp(gamma)))      # sqrt(sigmoid(-gamma))
    sigma = np.sqrt(1.0 / (1.0 + np.exp(-gamma)))     # sqrt(sigmoid(gamma))
    return (jnp.asarray(gamma, jnp.float32),
            jnp.asarray(alpha, jnp.float32),
            jnp.asarray(sigma, jnp.float32))


# ----------------------------------------------------------------------------
# Parameters: init (matches previous version) + host-side packing (split concat
# weights, transpose the final 1-unit weight, fold the /100 normalisation).
# ----------------------------------------------------------------------------

def init_params(key, cfg):
    H = cfg["hidden_dim"]
    Fin = cfg["node_feat_dim"]
    keys = iter(jax.random.split(key, 512))

    def lin(din, dout, scale=0.1):
        w = scale * jax.random.normal(next(keys), (din, dout), jnp.float32)
        b = jnp.zeros((1, dout), jnp.float32)
        return w, b

    blocks = []
    for _ in range(cfg["num_edm_block"]):
        p = {}
        p["ee_w1"], p["ee_b1"] = lin(1, H)
        p["ee_w2"], p["ee_b2"] = lin(H, H)
        p["bond_emb"] = 0.1 * jax.random.normal(next(keys), (cfg["num_edge_types"], H), jnp.float32)
        p["node_w"], p["node_b"] = lin(Fin, H)
        convs = []
        for _ in range(cfg["num_convs_local"]):
            c = {}
            c["e_w1"], c["e_b1"] = lin(3 * H, H)
            c["e_w2"], c["e_b2"] = lin(H, H)
            c["n_w1"], c["n_b1"] = lin(2 * H, H)
            c["n_w2"], c["n_b2"] = lin(H, H)
            convs.append(c)
        p["convs"] = convs
        p["g_w1"], p["g_b1"] = lin(3 * H, H)
        p["g_w2"], p["g_b2"] = lin(H, H // 2)
        p["g_w3"], p["g_b3"] = lin(H // 2, 1)
        blocks.append(p)
    # encoder_global = nn.Linear(10, 20) exists in __init__ but is unused in forward()
    gw, gb = lin(10, 20)
    return {"blocks": blocks, "global_w": gw, "global_b": gb}


def pack_params(params, hidden_dim):
    """Host-side re-layout for the fused kernel: pre-split the concat-fed weight matrices,
    transpose the final 1-unit weight to [1, H/2] (lane-dense reduce), and fold the
    unsorted_segment_sum normalisation factor 1/100 into the last layer."""
    H = hidden_dim
    scale = jnp.float32(0.01)
    blocks = []
    for p in params["blocks"]:
        convs = []
        for c in p["convs"]:
            convs.append(dict(
                e_w1_r=c["e_w1"][0:H], e_w1_c=c["e_w1"][H:2 * H], e_w1_e=c["e_w1"][2 * H:3 * H],
                e_b1=c["e_b1"], e_w2=c["e_w2"], e_b2=c["e_b2"],
                n_w1_h=c["n_w1"][0:H], n_w1_a=c["n_w1"][H:2 * H],
                n_b1=c["n_b1"], n_w2=c["n_w2"], n_b2=c["n_b2"]))
        blocks.append(dict(
            ee_w1=p["ee_w1"], ee_b1=p["ee_b1"], ee_w2=p["ee_w2"], ee_b2=p["ee_b2"],
            bond_emb=p["bond_emb"],
            node_w=p["node_w"], node_b=p["node_b"],
            convs=convs,
            g_w1_r=p["g_w1"][0:H], g_w1_c=p["g_w1"][H:2 * H], g_w1_e=p["g_w1"][2 * H:3 * H],
            g_b1=p["g_b1"], g_w2=p["g_w2"], g_b2=p["g_b2"],
            g_w3=p["g_w3"].T * scale,      # [1, H//2], includes 1/100 from unsorted_segment_sum
            g_b3=p["g_b3"] * scale,        # [1, 1]
        ))
    return {"blocks": blocks}


# ----------------------------------------------------------------------------
# Forward wrapper (glue kept in plain JAX: index reshapes only)
# ----------------------------------------------------------------------------

@jax.jit
def graph_diffusion_forward(packed_params, node_emb, node_type, node_degree, pos,
                            edge_index, edge_type, batch, time_step):
    # node_type / node_degree / batch / time_step accepted for interface fidelity;
    # they only feed extend_graph_order_radius / time conditioning in unavailable deps.
    del node_type, node_degree, batch, time_step
    # TODO(synk): extend_graph_order_radius source not provided; given edges used unchanged.
    row = edge_index[0].astype(jnp.int32)
    col = edge_index[1].astype(jnp.int32)
    row_e1 = row.reshape(-1, 1)
    col_e1 = col.reshape(-1, 1)
    row_1e = row.reshape(1, -1)
    et_e1 = edge_type.astype(jnp.int32).reshape(-1, 1)

    return fused_forward(packed_params,
                         node_emb.astype(jnp.float32),
                         pos.astype(jnp.float32),
                         row_e1, col_e1, row_1e, et_e1)


# ----------------------------------------------------------------------------
# Main
# ----------------------------------------------------------------------------

if __name__ == "__main__":
    cfg = dict(
        hidden_dim=32,
        node_feat_dim=8,
        num_convs_local=2,
        num_edm_block=2,
        num_edge_types=8,
        num_diffusion_timesteps=100,
    )
    N = 16

    key = jax.random.PRNGKey(0)
    k1, k2, k3, k4 = jax.random.split(key, 4)

    node_emb = jax.random.normal(k1, (N, cfg["node_feat_dim"]), jnp.float32)
    pos = jax.random.normal(k2, (N, 3), jnp.float32)

    # ring graph in both directions -> E = 2N = 32, no self loops (avoids 0/0 in dd_dr)
    src = jnp.arange(N, dtype=jnp.int32)
    dst = (src + 1) % N
    edge_index = jnp.stack([jnp.concatenate([src, dst]),
                            jnp.concatenate([dst, src])], axis=0)        # [2, 32]
    E = edge_index.shape[1]
    edge_type = jax.random.randint(k3, (E,), 0, cfg["num_edge_types"], dtype=jnp.int32)
    node_type = jax.random.randint(k4, (N,), 0, 5, dtype=jnp.int32)
    node_degree = jnp.full((N,), 2, dtype=jnp.int32)
    batch = jnp.zeros((N,), dtype=jnp.int32)
    time_step = jnp.zeros((1,), dtype=jnp.int32)

    params = init_params(jax.random.PRNGKey(1), cfg)
    packed = pack_params(params, cfg["hidden_dim"])
    gamma, alpha, sigma = make_noise_schedule(cfg["num_diffusion_timesteps"])  # buffers (unused in forward)

    out = graph_diffusion_forward(packed, node_emb, node_type, node_degree, pos,
                                  edge_index, edge_type, batch, time_step)
    out = jax.block_until_ready(out)
    assert out.shape == (N, 3) and out.dtype == jnp.float32
    assert bool(jnp.all(jnp.isfinite(out)))
    print("KERNEL_OK")
</pallas_src>

<mosaic_0001>
module attributes {stable_mosaic.version = 11 : i64} {
  func.func @_fused_forward_kernel(%arg0: i32, %arg1: memref<16x8xf32, #tpu.memory_space<vmem>>, %arg2: memref<16x3xf32, #tpu.memory_space<vmem>>, %arg3: memref<32x1xi32, #tpu.memory_space<vmem>>, %arg4: memref<32x1xi32, #tpu.memory_space<vmem>>, %arg5: memref<1x32xi32, #tpu.memory_space<vmem>>, %arg6: memref<32x1xi32, #tpu.memory_space<vmem>>, %arg7: memref<8x32xf32, #tpu.memory_space<vmem>>, %arg8: memref<1x32xf32, #tpu.memory_space<vmem>>, %arg9: memref<1x32xf32, #tpu.memory_space<vmem>>, %arg10: memref<32x32xf32, #tpu.memory_space<vmem>>, %arg11: memref<32x32xf32, #tpu.memory_space<vmem>>, %arg12: memref<32x32xf32, #tpu.memory_space<vmem>>, %arg13: memref<32x32xf32, #tpu.memory_space<vmem>>, %arg14: memref<1x32xf32, #tpu.memory_space<vmem>>, %arg15: memref<1x32xf32, #tpu.memory_space<vmem>>, %arg16: memref<32x32xf32, #tpu.memory_space<vmem>>, %arg17: memref<32x32xf32, #tpu.memory_space<vmem>>, %arg18: memref<32x32xf32, #tpu.memory_space<vmem>>, %arg19: memref<1x32xf32, #tpu.memory_space<vmem>>, %arg20: memref<1x32xf32, #tpu.memory_space<vmem>>, %arg21: memref<32x32xf32, #tpu.memory_space<vmem>>, %arg22: memref<32x32xf32, #tpu.memory_space<vmem>>, %arg23: memref<32x32xf32, #tpu.memory_space<vmem>>, %arg24: memref<32x32xf32, #tpu.memory_space<vmem>>, %arg25: memref<1x32xf32, #tpu.memory_space<vmem>>, %arg26: memref<1x32xf32, #tpu.memory_space<vmem>>, %arg27: memref<32x32xf32, #tpu.memory_space<vmem>>, %arg28: memref<32x32xf32, #tpu.memory_space<vmem>>, %arg29: memref<32x32xf32, #tpu.memory_space<vmem>>, %arg30: memref<1x32xf32, #tpu.memory_space<vmem>>, %arg31: memref<1x32xf32, #tpu.memory_space<vmem>>, %arg32: memref<1x32xf32, #tpu.memory_space<vmem>>, %arg33: memref<32x32xf32, #tpu.memory_space<vmem>>, %arg34: memref<1x32xf32, #tpu.memory_space<vmem>>, %arg35: memref<1x16xf32, #tpu.memory_space<vmem>>, %arg36: memref<1x1xf32, #tpu.memory_space<vmem>>, %arg37: memref<32x32xf32, #tpu.memory_space<vmem>>, %arg38: memref<32x32xf32, #tpu.memory_space<vmem>>, %arg39: memref<32x32xf32, #tpu.memory_space<vmem>>, %arg40: memref<32x16xf32, #tpu.memory_space<vmem>>, %arg41: memref<1x16xf32, #tpu.memory_space<vmem>>, %arg42: memref<1x32xf32, #tpu.memory_space<vmem>>, %arg43: memref<8x32xf32, #tpu.memory_space<vmem>>, %arg44: memref<8x32xf32, #tpu.memory_space<vmem>>, %arg45: memref<1x32xf32, #tpu.memory_space<vmem>>, %arg46: memref<1x32xf32, #tpu.memory_space<vmem>>, %arg47: memref<32x32xf32, #tpu.memory_space<vmem>>, %arg48: memref<32x32xf32, #tpu.memory_space<vmem>>, %arg49: memref<32x32xf32, #tpu.memory_space<vmem>>, %arg50: memref<32x32xf32, #tpu.memory_space<vmem>>, %arg51: memref<1x32xf32, #tpu.memory_space<vmem>>, %arg52: memref<1x32xf32, #tpu.memory_space<vmem>>, %arg53: memref<32x32xf32, #tpu.memory_space<vmem>>, %arg54: memref<32x32xf32, #tpu.memory_space<vmem>>, %arg55: memref<32x32xf32, #tpu.memory_space<vmem>>, %arg56: memref<1x32xf32, #tpu.memory_space<vmem>>, %arg57: memref<1x32xf32, #tpu.memory_space<vmem>>, %arg58: memref<32x32xf32, #tpu.memory_space<vmem>>, %arg59: memref<32x32xf32, #tpu.memory_space<vmem>>, %arg60: memref<32x32xf32, #tpu.memory_space<vmem>>, %arg61: memref<32x32xf32, #tpu.memory_space<vmem>>, %arg62: memref<1x32xf32, #tpu.memory_space<vmem>>, %arg63: memref<1x32xf32, #tpu.memory_space<vmem>>, %arg64: memref<32x32xf32, #tpu.memory_space<vmem>>, %arg65: memref<32x32xf32, #tpu.memory_space<vmem>>, %arg66: memref<32x32xf32, #tpu.memory_space<vmem>>, %arg67: memref<1x32xf32, #tpu.memory_space<vmem>>, %arg68: memref<1x32xf32, #tpu.memory_space<vmem>>, %arg69: memref<1x32xf32, #tpu.memory_space<vmem>>, %arg70: memref<32x32xf32, #tpu.memory_space<vmem>>, %arg71: memref<1x32xf32, #tpu.memory_space<vmem>>, %arg72: memref<1x16xf32, #tpu.memory_space<vmem>>, %arg73: memref<1x1xf32, #tpu.memory_space<vmem>>, %arg74: memref<32x32xf32, #tpu.memory_space<vmem>>, %arg75: memref<32x32xf32, #tpu.memory_space<vmem>>, %arg76: memref<32x32xf32, #tpu.memory_space<vmem>>, %arg77: memref<32x16xf32, #tpu.memory_space<vmem>>, %arg78: memref<1x16xf32, #tpu.memory_space<vmem>>, %arg79: memref<1x32xf32, #tpu.memory_space<vmem>>, %arg80: memref<8x32xf32, #tpu.memory_space<vmem>>, %arg81: memref<16x3xf32, #tpu.memory_space<vmem>>) attributes {dimension_semantics = [#tpu.dimension_semantics<arbitrary>], iteration_bounds = array<i64: 1>, scalar_prefetch = 0 : i64, scratch_operands = 0 : i64, tpu.core_type = #tpu.core_type<tc>, window_params = [{pipeline_mode = #tpu.pipeline_mode<synchronous>, transform_indices = @transform_0, window_bounds = array<i64: 16, 8>}, {pipeline_mode = #tpu.pipeline_mode<synchronous>, transform_indices = @transform_1, window_bounds = array<i64: 16, 3>}, {pipeline_mode = #tpu.pipeline_mode<synchronous>, transform_indices = @transform_2, window_bounds = array<i64: 32, 1>}, {pipeline_mode = #tpu.pipeline_mode<synchronous>, transform_indices = @transform_3, window_bounds = array<i64: 32, 1>}, {pipeline_mode = #tpu.pipeline_mode<synchronous>, transform_indices = @transform_4, window_bounds = array<i64: 1, 32>}, {pipeline_mode = #tpu.pipeline_mode<synchronous>, transform_indices = @transform_5, window_bounds = array<i64: 32, 1>}, {pipeline_mode = #tpu.pipeline_mode<synchronous>, transform_indices = @transform_6, window_bounds = array<i64: 8, 32>}, {pipeline_mode = #tpu.pipeline_mode<synchronous>, transform_indices = @transform_7, window_bounds = array<i64: 1, 32>}, {pipeline_mode = #tpu.pipeline_mode<synchronous>, transform_indices = @transform_8, window_bounds = array<i64: 1, 32>}, {pipeline_mode = #tpu.pipeline_mode<synchronous>, transform_indices = @transform_9, window_bounds = array<i64: 32, 32>}, {pipeline_mode = #tpu.pipeline_mode<synchronous>, transform_indices = @transform_10, window_bounds = array<i64: 32, 32>}, {pipeline_mode = #tpu.pipeline_mode<synchronous>, transform_indices = @transform_11, window_bounds = array<i64: 32, 32>}, {pipeline_mode = #tpu.pipeline_mode<synchronous>, transform_indices = @transform_12, window_bounds = array<i64: 32, 32>}, {pipeline_mode = #tpu.pipeline_mode<synchronous>, transform_indices = @transform_13, window_bounds = array<i64: 1, 32>}, {pipeline_mode = #tpu.pipeline_mode<synchronous>, transform_indices = @transform_14, window_bounds = array<i64: 1, 32>}, {pipeline_mode = #tpu.pipeline_mode<synchronous>, transform_indices = @transform_15, window_bounds = array<i64: 32, 32>}, {pipeline_mode = #tpu.pipeline_mode<synchronous>, transform_indices = @transform_16, window_bounds = array<i64: 32, 32>}, {pipeline_mode = #tpu.pipeline_mode<synchronous>, transform_indices = @transform_17, window_bounds = array<i64: 32, 32>}, {pipeline_mode = #tpu.pipeline_mode<synchronous>, transform_indices = @transform_18, window_bounds = array<i64: 1, 32>}, {pipeline_mode = #tpu.pipeline_mode<synchronous>, transform_indices = @transform_19, window_bounds = array<i64: 1, 32>}, {pipeline_mode = #tpu.pipeline_mode<synchronous>, transform_indices = @transform_20, window_bounds = array<i64: 32, 32>}, {pipeline_mode = #tpu.pipeline_mode<synchronous>, transform_indices = @transform_21, window_bounds = array<i64: 32, 32>}, {pipeline_mode = #tpu.pipeline_mode<synchronous>, transform_indices = @transform_22, window_bounds = array<i64: 32, 32>}, {pipeline_mode = #tpu.pipeline_mode<synchronous>, transform_indices = @transform_23, window_bounds = array<i64: 32, 32>}, {pipeline_mode = #tpu.pipeline_mode<synchronous>, transform_indices = @transform_24, window_bounds = array<i64: 1, 32>}, {pipeline_mode = #tpu.pipeline_mode<synchronous>, transform_indices = @transform_25, window_bounds = array<i64: 1, 32>}, {pipeline_mode = #tpu.pipeline_mode<synchronous>, transform_indices = @transform_26, window_bounds = array<i64: 32, 32>}, {pipeline_mode = #tpu.pipeline_mode<synchronous>, transform_indices = @transform_27, window_bounds = array<i64: 32, 32>}, {pipeline_mode = #tpu.pipeline_mode<synchronous>, transform_indices = @transform_28, window_bounds = array<i64: 32, 32>}, {pipeline_mode = #tpu.pipeline_mode<synchronous>, transform_indices = @transform_29, window_bounds = array<i64: 1, 32>}, {pipeline_mode = #tpu.pipeline_mode<synchronous>, transform_indices = @transform_30, window_bounds = array<i64: 1, 32>}, {pipeline_mode = #tpu.pipeline_mode<synchronous>, transform_indices = @transform_31, window_bounds = array<i64: 1, 32>}, {pipeline_mode = #tpu.pipeline_mode<synchronous>, transform_indices = @transform_32, window_bounds = array<i64: 32, 32>}, {pipeline_mode = #tpu.pipeline_mode<synchronous>, transform_indices = @transform_33, window_bounds = array<i64: 1, 32>}, {pipeline_mode = #tpu.pipeline_mode<synchronous>, transform_indices = @transform_34, window_bounds = array<i64: 1, 16>}, {pipeline_mode = #tpu.pipeline_mode<synchronous>, transform_indices = @transform_35, window_bounds = array<i64: 1, 1>}, {pipeline_mode = #tpu.pipeline_mode<synchronous>, transform_indices = @transform_36, window_bounds = array<i64: 32, 32>}, {pipeline_mode = #tpu.pipeline_mode<synchronous>, transform_indices = @transform_37, window_bounds = array<i64: 32, 32>}, {pipeline_mode = #tpu.pipeline_mode<synchronous>, transform_indices = @transform_38, window_bounds = array<i64: 32, 32>}, {pipeline_mode = #tpu.pipeline_mode<synchronous>, transform_indices = @transform_39, window_bounds = array<i64: 32, 16>}, {pipeline_mode = #tpu.pipeline_mode<synchronous>, transform_indices = @transform_40, window_bounds = array<i64: 1, 16>}, {pipeline_mode = #tpu.pipeline_mode<synchronous>, transform_indices = @transform_41, window_bounds = array<i64: 1, 32>}, {pipeline_mode = #tpu.pipeline_mode<synchronous>, transform_indices = @transform_42, window_bounds = array<i64: 8, 32>}, {pipeline_mode = #tpu.pipeline_mode<synchronous>, transform_indices = @transform_43, window_bounds = array<i64: 8, 32>}, {pipeline_mode = #tpu.pipeline_mode<synchronous>, transform_indices = @transform_44, window_bounds = array<i64: 1, 32>}, {pipeline_mode = #tpu.pipeline_mode<synchronous>, transform_indices = @transform_45, window_bounds = array<i64: 1, 32>}, {pipeline_mode = #tpu.pipeline_mode<synchronous>, transform_indices = @transform_46, window_bounds = array<i64: 32, 32>}, {pipeline_mode = #tpu.pipeline_mode<synchronous>, transform_indices = @transform_47, window_bounds = array<i64: 32, 32>}, {pipeline_mode = #tpu.pipeline_mode<synchronous>, transform_indices = @transform_48, window_bounds = array<i64: 32, 32>}, {pipeline_mode = #tpu.pipeline_mode<synchronous>, transform_indices = @transform_49, window_bounds = array<i64: 32, 32>}, {pipeline_mode = #tpu.pipeline_mode<synchronous>, transform_indices = @transform_50, window_bounds = array<i64: 1, 32>}, {pipeline_mode = #tpu.pipeline_mode<synchronous>, transform_indices = @transform_51, window_bounds = array<i64: 1, 32>}, {pipeline_mode = #tpu.pipeline_mode<synchronous>, transform_indices = @transform_52, window_bounds = array<i64: 32, 32>}, {pipeline_mode = #tpu.pipeline_mode<synchronous>, transform_indices = @transform_53, window_bounds = array<i64: 32, 32>}, {pipeline_mode = #tpu.pipeline_mode<synchronous>, transform_indices = @transform_54, window_bounds = array<i64: 32, 32>}, {pipeline_mode = #tpu.pipeline_mode<synchronous>, transform_indices = @transform_55, window_bounds = array<i64: 1, 32>}, {pipeline_mode = #tpu.pipeline_mode<synchronous>, transform_indices = @transform_56, window_bounds = array<i64: 1, 32>}, {pipeline_mode = #tpu.pipeline_mode<synchronous>, transform_indices = @transform_57, window_bounds = array<i64: 32, 32>}, {pipeline_mode = #tpu.pipeline_mode<synchronous>, transform_indices = @transform_58, window_bounds = array<i64: 32, 32>}, {pipeline_mode = #tpu.pipeline_mode<synchronous>, transform_indices = @transform_59, window_bounds = array<i64: 32, 32>}, {pipeline_mode = #tpu.pipeline_mode<synchronous>, transform_indices = @transform_60, window_bounds = array<i64: 32, 32>}, {pipeline_mode = #tpu.pipeline_mode<synchronous>, transform_indices = @transform_61, window_bounds = array<i64: 1, 32>}, {pipeline_mode = #tpu.pipeline_mode<synchronous>, transform_indices = @transform_62, window_bounds = array<i64: 1, 32>}, {pipeline_mode = #tpu.pipeline_mode<synchronous>, transform_indices = @transform_63, window_bounds = array<i64: 32, 32>}, {pipeline_mode = #tpu.pipeline_mode<synchronous>, transform_indices = @transform_64, window_bounds = array<i64: 32, 32>}, {pipeline_mode = #tpu.pipeline_mode<synchronous>, transform_indices = @transform_65, window_bounds = array<i64: 32, 32>}, {pipeline_mode = #tpu.pipeline_mode<synchronous>, transform_indices = @transform_66, window_bounds = array<i64: 1, 32>}, {pipeline_mode = #tpu.pipeline_mode<synchronous>, transform_indices = @transform_67, window_bounds = array<i64: 1, 32>}, {pipeline_mode = #tpu.pipeline_mode<synchronous>, transform_indices = @transform_68, window_bounds = array<i64: 1, 32>}, {pipeline_mode = #tpu.pipeline_mode<synchronous>, transform_indices = @transform_69, window_bounds = array<i64: 32, 32>}, {pipeline_mode = #tpu.pipeline_mode<synchronous>, transform_indices = @transform_70, window_bounds = array<i64: 1, 32>}, {pipeline_mode = #tpu.pipeline_mode<synchronous>, transform_indices = @transform_71, window_bounds = array<i64: 1, 16>}, {pipeline_mode = #tpu.pipeline_mode<synchronous>, transform_indices = @transform_72, window_bounds = array<i64: 1, 1>}, {pipeline_mode = #tpu.pipeline_mode<synchronous>, transform_indices = @transform_73, window_bounds = array<i64: 32, 32>}, {pipeline_mode = #tpu.pipeline_mode<synchronous>, transform_indices = @transform_74, window_bounds = array<i64: 32, 32>}, {pipeline_mode = #tpu.pipeline_mode<synchronous>, transform_indices = @transform_75, window_bounds = array<i64: 32, 32>}, {pipeline_mode = #tpu.pipeline_mode<synchronous>, transform_indices = @transform_76, window_bounds = array<i64: 32, 16>}, {pipeline_mode = #tpu.pipeline_mode<synchronous>, transform_indices = @transform_77, window_bounds = array<i64: 1, 16>}, {pipeline_mode = #tpu.pipeline_mode<synchronous>, transform_indices = @transform_78, window_bounds = array<i64: 1, 32>}, {pipeline_mode = #tpu.pipeline_mode<synchronous>, transform_indices = @transform_79, window_bounds = array<i64: 8, 32>}, {pipeline_mode = #tpu.pipeline_mode<synchronous>, transform_indices = @transform_80, window_bounds = array<i64: 16, 3>}]} {
    %c0 = arith.constant 0 : index
    %c0_0 = arith.constant 0 : index
    %0 = vector.load %arg1[%c0, %c0_0] : memref<16x8xf32, #tpu.memory_space<vmem>>, vector<16x8xf32>
    %c0_1 = arith.constant 0 : index
    %c0_2 = arith.constant 0 : index
    %1 = vector.load %arg2[%c0_1, %c0_2] : memref<16x3xf32, #tpu.memory_space<vmem>>, vector<16x3xf32>
    %c0_3 = arith.constant 0 : index
    %c0_4 = arith.constant 0 : index
    %2 = vector.load %arg3[%c0_3, %c0_4] : memref<32x1xi32, #tpu.memory_space<vmem>>, vector<32x1xi32>
    %c0_5 = arith.constant 0 : index
    %c0_6 = arith.constant 0 : index
    %3 = vector.load %arg4[%c0_5, %c0_6] : memref<32x1xi32, #tpu.memory_space<vmem>>, vector<32x1xi32>
    %c0_7 = arith.constant 0 : index
    %c0_8 = arith.constant 0 : index
    %4 = vector.load %arg5[%c0_7, %c0_8] : memref<1x32xi32, #tpu.memory_space<vmem>>, vector<1x32xi32>
    %c0_9 = arith.constant 0 : index
    %c0_10 = arith.constant 0 : index
    %5 = vector.load %arg6[%c0_9, %c0_10] : memref<32x1xi32, #tpu.memory_space<vmem>>, vector<32x1xi32>
    %6 = tpu.iota {dimensions = array<i32: 1>} : vector<32x16xi32>
    %7 = vector.broadcast %2 : vector<32x1xi32> to vector<32x16xi32>
    %8 = arith.cmpi eq, %7, %6 : vector<32x16xi32>
    %9 = arith.extui %8 : vector<32x16xi1> to vector<32x16xi32>
    %10 = arith.sitofp %9 : vector<32x16xi32> to vector<32x16xf32>
    %11 = vector.broadcast %3 : vector<32x1xi32> to vector<32x16xi32>
    %12 = arith.cmpi eq, %11, %6 : vector<32x16xi32>
    %13 = arith.extui %12 : vector<32x16xi1> to vector<32x16xi32>
    %14 = arith.sitofp %13 : vector<32x16xi32> to vector<32x16xf32>
    %15 = tpu.iota {dimensions = array<i32: 0>} : vector<16x32xi32>
    %16 = vector.broadcast %4 : vector<1x32xi32> to vector<16x32xi32>
    %17 = arith.cmpi eq, %16, %15 : vector<16x32xi32>
    %18 = arith.extui %17 : vector<16x32xi1> to vector<16x32xi32>
    %19 = arith.sitofp %18 : vector<16x32xi32> to vector<16x32xf32>
    %cst = arith.constant dense<0.000000e+00> : vector<32x3xf32>
    %20 = tpu.matmul %10, %1, %cst {dimension_numbers = #tpu.dot_dimension_numbers<[1], [0], [0], [1], [0, 0, 1, 1], [], []>} : vector<32x16xf32>, vector<16x3xf32>, vector<32x3xf32> -> vector<32x3xf32>
    %cst_11 = arith.constant dense<0.000000e+00> : vector<32x3xf32>
    %21 = tpu.matmul %14, %1, %cst_11 {dimension_numbers = #tpu.dot_dimension_numbers<[1], [0], [0], [1], [0, 0, 1, 1], [], []>} : vector<32x16xf32>, vector<16x3xf32>, vector<32x3xf32> -> vector<32x3xf32>
    %22 = arith.subf %20, %21 : vector<32x3xf32>
    %23 = arith.mulf %22, %22 : vector<32x3xf32>
    %cst_12 = arith.constant dense<0.000000e+00> : vector<32xf32>
    %24 = vector.multi_reduction <add>, %23, %cst_12 [1] : vector<32x3xf32> to vector<32xf32>
    %25 = vector.shape_cast %24 : vector<32xf32> to vector<32x1xf32>
    %26 = math.rsqrt %25 : vector<32x1xf32>
    %27 = math.sqrt %25 : vector<32x1xf32>
    %28 = tpu.iota {dimensions = array<i32: 1>} : vector<32x8xi32>
    %29 = vector.broadcast %5 : vector<32x1xi32> to vector<32x8xi32>
    %30 = arith.cmpi eq, %29, %28 : vector<32x8xi32>
    %31 = arith.extui %30 : vector<32x8xi1> to vector<32x8xi32>
    %32 = arith.sitofp %31 : vector<32x8xi32> to vector<32x8xf32>
    %c0_13 = arith.constant 0 : index
    %c0_14 = arith.constant 0 : index
    %33 = vector.load %arg32[%c0_13, %c0_14] : memref<1x32xf32, #tpu.memory_space<vmem>>, vector<1x32xf32>
    %34 = vector.broadcast %27 : vector<32x1xf32> to vector<32x32xf32>
    %35 = vector.broadcast %33 : vector<1x32xf32> to vector<32x32xf32>
    %36 = arith.mulf %34, %35 : vector<32x32xf32>
    %c0_15 = arith.constant 0 : index
    %c0_16 = arith.constant 0 : index
    %37 = vector.load %arg30[%c0_15, %c0_16] : memref<1x32xf32, #tpu.memory_space<vmem>>, vector<1x32xf32>
    %38 = vector.broadcast %37 : vector<1x32xf32> to vector<32x32xf32>
    %39 = arith.addf %36, %38 : vector<32x32xf32>
    %cst_17 = arith.constant 0.000000e+00 : f32
    %40 = vector.broadcast %cst_17 : f32 to vector<32x32xf32>
    %41 = arith.maximumf %39, %40 : vector<32x32xf32>
    %c0_18 = arith.constant 0 : index
    %c0_19 = arith.constant 0 : index
    %42 = vector.load %arg33[%c0_18, %c0_19] : memref<32x32xf32, #tpu.memory_space<vmem>>, vector<32x32xf32>
    %cst_20 = arith.constant dense<0.000000e+00> : vector<32x32xf32>
    %43 = tpu.matmul %41, %42, %cst_20 {dimension_numbers = #tpu.dot_dimension_numbers<[1], [0], [0], [1], [0, 0, 1, 1], [], []>} : vector<32x32xf32>, vector<32x32xf32>, vector<32x32xf32> -> vector<32x32xf32>
    %c0_21 = arith.constant 0 : index
    %c0_22 = arith.constant 0 : index
    %44 = vector.load %arg31[%c0_21, %c0_22] : memref<1x32xf32, #tpu.memory_space<vmem>>, vector<1x32xf32>
    %45 = vector.broadcast %44 : vector<1x32xf32> to vector<32x32xf32>
    %46 = arith.addf %43, %45 : vector<32x32xf32>
    %c0_23 = arith.constant 0 : index
    %c0_24 = arith.constant 0 : index
    %47 = vector.load %arg7[%c0_23, %c0_24] : memref<8x32xf32, #tpu.memory_space<vmem>>, vector<8x32xf32>
    %cst_25 = arith.constant dense<0.000000e+00> : vector<32x32xf32>
    %48 = tpu.matmul %32, %47, %cst_25 {dimension_numbers = #tpu.dot_dimension_numbers<[1], [0], [0], [1], [0, 0, 1, 1], [], []>} : vector<32x8xf32>, vector<8x32xf32>, vector<32x32xf32> -> vector<32x32xf32>
    %49 = arith.mulf %46, %48 : vector<32x32xf32>
    %c0_26 = arith.constant 0 : index
    %c0_27 = arith.constant 0 : index
    %50 = vector.load %arg43[%c0_26, %c0_27] : memref<8x32xf32, #tpu.memory_space<vmem>>, vector<8x32xf32>
    %cst_28 = arith.constant dense<0.000000e+00> : vector<16x32xf32>
    %51 = tpu.matmul %0, %50, %cst_28 {dimension_numbers = #tpu.dot_dimension_numbers<[1], [0], [0], [1], [0, 0, 1, 1], [], []>} : vector<16x8xf32>, vector<8x32xf32>, vector<16x32xf32> -> vector<16x32xf32>
    %c0_29 = arith.constant 0 : index
    %c0_30 = arith.constant 0 : index
    %52 = vector.load %arg42[%c0_29, %c0_30] : memref<1x32xf32, #tpu.memory_space<vmem>>, vector<1x32xf32>
    %53 = vector.broadcast %52 : vector<1x32xf32> to vector<16x32xf32>
    %54 = arith.addf %51, %53 : vector<16x32xf32>
    %cst_31 = arith.constant dense<0.000000e+00> : vector<32x32xf32>
    %55 = tpu.matmul %10, %54, %cst_31 {dimension_numbers = #tpu.dot_dimension_numbers<[1], [0], [0], [1], [0, 0, 1, 1], [], []>} : vector<32x16xf32>, vector<16x32xf32>, vector<32x32xf32> -> vector<32x32xf32>
    %cst_32 = arith.constant dense<0.000000e+00> : vector<32x32xf32>
    %56 = tpu.matmul %14, %54, %cst_32 {dimension_numbers = #tpu.dot_dimension_numbers<[1], [0], [0], [1], [0, 0, 1, 1], [], []>} : vector<32x16xf32>, vector<16x32xf32>, vector<32x32xf32> -> vector<32x32xf32>
    %c0_33 = arith.constant 0 : index
    %c0_34 = arith.constant 0 : index
    %57 = vector.load %arg12[%c0_33, %c0_34] : memref<32x32xf32, #tpu.memory_space<vmem>>, vector<32x32xf32>
    %cst_35 = arith.constant dense<0.000000e+00> : vector<32x32xf32>
    %58 = tpu.matmul %55, %57, %cst_35 {dimension_numbers = #tpu.dot_dimension_numbers<[1], [0], [0], [1], [0, 0, 1, 1], [], []>} : vector<32x32xf32>, vector<32x32xf32>, vector<32x32xf32> -> vector<32x32xf32>
    %c0_36 = arith.constant 0 : index
    %c0_37 = arith.constant 0 : index
    %59 = vector.load %arg10[%c0_36, %c0_37] : memref<32x32xf32, #tpu.memory_space<vmem>>, vector<32x32xf32>
    %cst_38 = arith.constant dense<0.000000e+00> : vector<32x32xf32>
    %60 = tpu.matmul %56, %59, %cst_38 {dimension_numbers = #tpu.dot_dimension_numbers<[1], [0], [0], [1], [0, 0, 1, 1], [], []>} : vector<32x32xf32>, vector<32x32xf32>, vector<32x32xf32> -> vector<32x32xf32>
    %61 = arith.addf %58, %60 : vector<32x32xf32>
    %c0_39 = arith.constant 0 : index
    %c0_40 = arith.constant 0 : index
    %62 = vector.load %arg11[%c0_39, %c0_40] : memref<32x32xf32, #tpu.memory_space<vmem>>, vector<32x32xf32>
    %cst_41 = arith.constant dense<0.000000e+00> : vector<32x32xf32>
    %63 = tpu.matmul %49, %62, %cst_41 {dimension_numbers = #tpu.dot_dimension_numbers<[1], [0], [0], [1], [0, 0, 1, 1], [], []>} : vector<32x32xf32>, vector<32x32xf32>, vector<32x32xf32> -> vector<32x32xf32>
    %64 = arith.addf %61, %63 : vector<32x32xf32>
    %c0_42 = arith.constant 0 : index
    %c0_43 = arith.constant 0 : index
    %65 = vector.load %arg8[%c0_42, %c0_43] : memref<1x32xf32, #tpu.memory_space<vmem>>, vector<1x32xf32>
    %66 = vector.broadcast %65 : vector<1x32xf32> to vector<32x32xf32>
    %67 = arith.addf %64, %66 : vector<32x32xf32>
    %cst_44 = arith.constant 0.000000e+00 : f32
    %68 = vector.broadcast %cst_44 : f32 to vector<32x32xf32>
    %69 = arith.maximumf %67, %68 : vector<32x32xf32>
    %c0_45 = arith.constant 0 : index
    %c0_46 = arith.constant 0 : index
    %70 = vector.load %arg13[%c0_45, %c0_46] : memref<32x32xf32, #tpu.memory_space<vmem>>, vector<32x32xf32>
    %cst_47 = arith.constant dense<0.000000e+00> : vector<32x32xf32>
    %71 = tpu.matmul %69, %70, %cst_47 {dimension_numbers = #tpu.dot_dimension_numbers<[1], [0], [0], [1], [0, 0, 1, 1], [], []>} : vector<32x32xf32>, vector<32x32xf32>, vector<32x32xf32> -> vector<32x32xf32>
    %c0_48 = arith.constant 0 : index
    %c0_49 = arith.constant 0 : index
    %72 = vector.load %arg9[%c0_48, %c0_49] : memref<1x32xf32, #tpu.memory_space<vmem>>, vector<1x32xf32>
    %73 = vector.broadcast %72 : vector<1x32xf32> to vector<32x32xf32>
    %74 = arith.addf %71, %73 : vector<32x32xf32>
    %cst_50 = arith.constant dense<0.000000e+00> : vector<16x32xf32>
    %75 = tpu.matmul %19, %74, %cst_50 {dimension_numbers = #tpu.dot_dimension_numbers<[1], [0], [0], [1], [0, 0, 1, 1], [], []>} : vector<16x32xf32>, vector<32x32xf32>, vector<16x32xf32> -> vector<16x32xf32>
    %c0_51 = arith.constant 0 : index
    %c0_52 = arith.constant 0 : index
    %76 = vector.load %arg17[%c0_51, %c0_52] : memref<32x32xf32, #tpu.memory_space<vmem>>, vector<32x32xf32>
    %cst_53 = arith.constant dense<0.000000e+00> : vector<16x32xf32>
    %77 = tpu.matmul %54, %76, %cst_53 {dimension_numbers = #tpu.dot_dimension_numbers<[1], [0], [0], [1], [0, 0, 1, 1], [], []>} : vector<16x32xf32>, vector<32x32xf32>, vector<16x32xf32> -> vector<16x32xf32>
    %c0_54 = arith.constant 0 : index
    %c0_55 = arith.constant 0 : index
    %78 = vector.load %arg16[%c0_54, %c0_55] : memref<32x32xf32, #tpu.memory_space<vmem>>, vector<32x32xf32>
    %cst_56 = arith.constant dense<0.000000e+00> : vector<16x32xf32>
    %79 = tpu.matmul %75, %78, %cst_56 {dimension_numbers = #tpu.dot_dimension_numbers<[1], [0], [0], [1], [0, 0, 1, 1], [], []>} : vector<16x32xf32>, vector<32x32xf32>, vector<16x32xf32> -> vector<16x32xf32>
    %80 = arith.addf %77, %79 : vector<16x32xf32>
    %c0_57 = arith.constant 0 : index
    %c0_58 = arith.constant 0 : index
    %81 = vector.load %arg14[%c0_57, %c0_58] : memref<1x32xf32, #tpu.memory_space<vmem>>, vector<1x32xf32>
    %82 = vector.broadcast %81 : vector<1x32xf32> to vector<16x32xf32>
    %83 = arith.addf %80, %82 : vector<16x32xf32>
    %cst_59 = arith.constant 0.000000e+00 : f32
    %84 = vector.broadcast %cst_59 : f32 to vector<16x32xf32>
    %85 = arith.maximumf %83, %84 : vector<16x32xf32>
    %c0_60 = arith.constant 0 : index
    %c0_61 = arith.constant 0 : index
    %86 = vector.load %arg18[%c0_60, %c0_61] : memref<32x32xf32, #tpu.memory_space<vmem>>, vector<32x32xf32>
    %cst_62 = arith.constant dense<0.000000e+00> : vector<16x32xf32>
    %87 = tpu.matmul %85, %86, %cst_62 {dimension_numbers = #tpu.dot_dimension_numbers<[1], [0], [0], [1], [0, 0, 1, 1], [], []>} : vector<16x32xf32>, vector<32x32xf32>, vector<16x32xf32> -> vector<16x32xf32>
    %c0_63 = arith.constant 0 : index
    %c0_64 = arith.constant 0 : index
    %88 = vector.load %arg15[%c0_63, %c0_64] : memref<1x32xf32, #tpu.memory_space<vmem>>, vector<1x32xf32>
    %89 = vector.broadcast %88 : vector<1x32xf32> to vector<16x32xf32>
    %90 = arith.addf %87, %89 : vector<16x32xf32>
    %91 = arith.addf %54, %90 : vector<16x32xf32>
    %cst_65 = arith.constant dense<0.000000e+00> : vector<32x32xf32>
    %92 = tpu.matmul %10, %91, %cst_65 {dimension_numbers = #tpu.dot_dimension_numbers<[1], [0], [0], [1], [0, 0, 1, 1], [], []>} : vector<32x16xf32>, vector<16x32xf32>, vector<32x32xf32> -> vector<32x32xf32>
    %cst_66 = arith.constant dense<0.000000e+00> : vector<32x32xf32>
    %93 = tpu.matmul %14, %91, %cst_66 {dimension_numbers = #tpu.dot_dimension_numbers<[1], [0], [0], [1], [0, 0, 1, 1], [], []>} : vector<32x16xf32>, vector<16x32xf32>, vector<32x32xf32> -> vector<32x32xf32>
    %c0_67 = arith.constant 0 : index
    %c0_68 = arith.constant 0 : index
    %94 = vector.load %arg23[%c0_67, %c0_68] : memref<32x32xf32, #tpu.memory_space<vmem>>, vector<32x32xf32>
    %cst_69 = arith.constant dense<0.000000e+00> : vector<32x32xf32>
    %95 = tpu.matmul %92, %94, %cst_69 {dimension_numbers = #tpu.dot_dimension_numbers<[1], [0], [0], [1], [0, 0, 1, 1], [], []>} : vector<32x32xf32>, vector<32x32xf32>, vector<32x32xf32> -> vector<32x32xf32>
    %c0_70 = arith.constant 0 : index
    %c0_71 = arith.constant 0 : index
    %96 = vector.load %arg21[%c0_70, %c0_71] : memref<32x32xf32, #tpu.memory_space<vmem>>, vector<32x32xf32>
    %cst_72 = arith.constant dense<0.000000e+00> : vector<32x32xf32>
    %97 = tpu.matmul %93, %96, %cst_72 {dimension_numbers = #tpu.dot_dimension_numbers<[1], [0], [0], [1], [0, 0, 1, 1], [], []>} : vector<32x32xf32>, vector<32x32xf32>, vector<32x32xf32> -> vector<32x32xf32>
    %98 = arith.addf %95, %97 : vector<32x32xf32>
    %c0_73 = arith.constant 0 : index
    %c0_74 = arith.constant 0 : index
    %99 = vector.load %arg22[%c0_73, %c0_74] : memref<32x32xf32, #tpu.memory_space<vmem>>, vector<32x32xf32>
    %cst_75 = arith.constant dense<0.000000e+00> : vector<32x32xf32>
    %100 = tpu.matmul %49, %99, %cst_75 {dimension_numbers = #tpu.dot_dimension_numbers<[1], [0], [0], [1], [0, 0, 1, 1], [], []>} : vector<32x32xf32>, vector<32x32xf32>, vector<32x32xf32> -> vector<32x32xf32>
    %101 = arith.addf %98, %100 : vector<32x32xf32>
    %c0_76 = arith.constant 0 : index
    %c0_77 = arith.constant 0 : index
    %102 = vector.load %arg19[%c0_76, %c0_77] : memref<1x32xf32, #tpu.memory_space<vmem>>, vector<1x32xf32>
    %103 = vector.broadcast %102 : vector<1x32xf32> to vector<32x32xf32>
    %104 = arith.addf %101, %103 : vector<32x32xf32>
    %cst_78 = arith.constant 0.000000e+00 : f32
    %105 = vector.broadcast %cst_78 : f32 to vector<32x32xf32>
    %106 = arith.maximumf %104, %105 : vector<32x32xf32>
    %c0_79 = arith.constant 0 : index
    %c0_80 = arith.constant 0 : index
    %107 = vector.load %arg24[%c0_79, %c0_80] : memref<32x32xf32, #tpu.memory_space<vmem>>, vector<32x32xf32>
    %cst_81 = arith.constant dense<0.000000e+00> : vector<32x32xf32>
    %108 = tpu.matmul %106, %107, %cst_81 {dimension_numbers = #tpu.dot_dimension_numbers<[1], [0], [0], [1], [0, 0, 1, 1], [], []>} : vector<32x32xf32>, vector<32x32xf32>, vector<32x32xf32> -> vector<32x32xf32>
    %c0_82 = arith.constant 0 : index
    %c0_83 = arith.constant 0 : index
    %109 = vector.load %arg20[%c0_82, %c0_83] : memref<1x32xf32, #tpu.memory_space<vmem>>, vector<1x32xf32>
    %110 = vector.broadcast %109 : vector<1x32xf32> to vector<32x32xf32>
    %111 = arith.addf %108, %110 : vector<32x32xf32>
    %cst_84 = arith.constant dense<0.000000e+00> : vector<16x32xf32>
    %112 = tpu.matmul %19, %111, %cst_84 {dimension_numbers = #tpu.dot_dimension_numbers<[1], [0], [0], [1], [0, 0, 1, 1], [], []>} : vector<16x32xf32>, vector<32x32xf32>, vector<16x32xf32> -> vector<16x32xf32>
    %c0_85 = arith.constant 0 : index
    %c0_86 = arith.constant 0 : index
    %113 = vector.load %arg28[%c0_85, %c0_86] : memref<32x32xf32, #tpu.memory_space<vmem>>, vector<32x32xf32>
    %cst_87 = arith.constant dense<0.000000e+00> : vector<16x32xf32>
    %114 = tpu.matmul %91, %113, %cst_87 {dimension_numbers = #tpu.dot_dimension_numbers<[1], [0], [0], [1], [0, 0, 1, 1], [], []>} : vector<16x32xf32>, vector<32x32xf32>, vector<16x32xf32> -> vector<16x32xf32>
    %c0_88 = arith.constant 0 : index
    %c0_89 = arith.constant 0 : index
    %115 = vector.load %arg27[%c0_88, %c0_89] : memref<32x32xf32, #tpu.memory_space<vmem>>, vector<32x32xf32>
    %cst_90 = arith.constant dense<0.000000e+00> : vector<16x32xf32>
    %116 = tpu.matmul %112, %115, %cst_90 {dimension_numbers = #tpu.dot_dimension_numbers<[1], [0], [0], [1], [0, 0, 1, 1], [], []>} : vector<16x32xf32>, vector<32x32xf32>, vector<16x32xf32> -> vector<16x32xf32>
    %117 = arith.addf %114, %116 : vector<16x32xf32>
    %c0_91 = arith.constant 0 : index
    %c0_92 = arith.constant 0 : index
    %118 = vector.load %arg25[%c0_91, %c0_92] : memref<1x32xf32, #tpu.memory_space<vmem>>, vector<1x32xf32>
    %119 = vector.broadcast %118 : vector<1x32xf32> to vector<16x32xf32>
    %120 = arith.addf %117, %119 : vector<16x32xf32>
    %cst_93 = arith.constant 0.000000e+00 : f32
    %121 = vector.broadcast %cst_93 : f32 to vector<16x32xf32>
    %122 = arith.maximumf %120, %121 : vector<16x32xf32>
    %c0_94 = arith.constant 0 : index
    %c0_95 = arith.constant 0 : index
    %123 = vector.load %arg29[%c0_94, %c0_95] : memref<32x32xf32, #tpu.memory_space<vmem>>, vector<32x32xf32>
    %cst_96 = arith.constant dense<0.000000e+00> : vector<16x32xf32>
    %124 = tpu.matmul %122, %123, %cst_96 {dimension_numbers = #tpu.dot_dimension_numbers<[1], [0], [0], [1], [0, 0, 1, 1], [], []>} : vector<16x32xf32>, vector<32x32xf32>, vector<16x32xf32> -> vector<16x32xf32>
    %c0_97 = arith.constant 0 : index
    %c0_98 = arith.constant 0 : index
    %125 = vector.load %arg26[%c0_97, %c0_98] : memref<1x32xf32, #tpu.memory_space<vmem>>, vector<1x32xf32>
    %126 = vector.broadcast %125 : vector<1x32xf32> to vector<16x32xf32>
    %127 = arith.addf %124, %126 : vector<16x32xf32>
    %128 = arith.addf %91, %127 : vector<16x32xf32>
    %cst_99 = arith.constant dense<0.000000e+00> : vector<32x32xf32>
    %129 = tpu.matmul %10, %128, %cst_99 {dimension_numbers = #tpu.dot_dimension_numbers<[1], [0], [0], [1], [0, 0, 1, 1], [], []>} : vector<32x16xf32>, vector<16x32xf32>, vector<32x32xf32> -> vector<32x32xf32>
    %cst_100 = arith.constant dense<0.000000e+00> : vector<32x32xf32>
    %130 = tpu.matmul %14, %128, %cst_100 {dimension_numbers = #tpu.dot_dimension_numbers<[1], [0], [0], [1], [0, 0, 1, 1], [], []>} : vector<32x16xf32>, vector<16x32xf32>, vector<32x32xf32> -> vector<32x32xf32>
    %c0_101 = arith.constant 0 : index
    %c0_102 = arith.constant 0 : index
    %131 = vector.load %arg39[%c0_101, %c0_102] : memref<32x32xf32, #tpu.memory_space<vmem>>, vector<32x32xf32>
    %cst_103 = arith.constant dense<0.000000e+00> : vector<32x32xf32>
    %132 = tpu.matmul %129, %131, %cst_103 {dimension_numbers = #tpu.dot_dimension_numbers<[1], [0], [0], [1], [0, 0, 1, 1], [], []>} : vector<32x32xf32>, vector<32x32xf32>, vector<32x32xf32> -> vector<32x32xf32>
    %c0_104 = arith.constant 0 : index
    %c0_105 = arith.constant 0 : index
    %133 = vector.load %arg37[%c0_104, %c0_105] : memref<32x32xf32, #tpu.memory_space<vmem>>, vector<32x32xf32>
    %cst_106 = arith.constant dense<0.000000e+00> : vector<32x32xf32>
    %134 = tpu.matmul %130, %133, %cst_106 {dimension_numbers = #tpu.dot_dimension_numbers<[1], [0], [0], [1], [0, 0, 1, 1], [], []>} : vector<32x32xf32>, vector<32x32xf32>, vector<32x32xf32> -> vector<32x32xf32>
    %135 = arith.addf %132, %134 : vector<32x32xf32>
    %c0_107 = arith.constant 0 : index
    %c0_108 = arith.constant 0 : index
    %136 = vector.load %arg38[%c0_107, %c0_108] : memref<32x32xf32, #tpu.memory_space<vmem>>, vector<32x32xf32>
    %cst_109 = arith.constant dense<0.000000e+00> : vector<32x32xf32>
    %137 = tpu.matmul %49, %136, %cst_109 {dimension_numbers = #tpu.dot_dimension_numbers<[1], [0], [0], [1], [0, 0, 1, 1], [], []>} : vector<32x32xf32>, vector<32x32xf32>, vector<32x32xf32> -> vector<32x32xf32>
    %138 = arith.addf %135, %137 : vector<32x32xf32>
    %c0_110 = arith.constant 0 : index
    %c0_111 = arith.constant 0 : index
    %139 = vector.load %arg34[%c0_110, %c0_111] : memref<1x32xf32, #tpu.memory_space<vmem>>, vector<1x32xf32>
    %140 = vector.broadcast %139 : vector<1x32xf32> to vector<32x32xf32>
    %141 = arith.addf %138, %140 : vector<32x32xf32>
    %cst_112 = arith.constant 0.000000e+00 : f32
    %142 = vector.broadcast %cst_112 : f32 to vector<32x32xf32>
    %143 = arith.maximumf %141, %142 : vector<32x32xf32>
    %c0_113 = arith.constant 0 : index
    %c0_114 = arith.constant 0 : index
    %144 = vector.load %arg40[%c0_113, %c0_114] : memref<32x16xf32, #tpu.memory_space<vmem>>, vector<32x16xf32>
    %cst_115 = arith.constant dense<0.000000e+00> : vector<32x16xf32>
    %145 = tpu.matmul %143, %144, %cst_115 {dimension_numbers = #tpu.dot_dimension_numbers<[1], [0], [0], [1], [0, 0, 1, 1], [], []>} : vector<32x32xf32>, vector<32x16xf32>, vector<32x16xf32> -> vector<32x16xf32>
    %c0_116 = arith.constant 0 : index
    %c0_117 = arith.constant 0 : index
    %146 = vector.load %arg35[%c0_116, %c0_117] : memref<1x16xf32, #tpu.memory_space<vmem>>, vector<1x16xf32>
    %147 = vector.broadcast %146 : vector<1x16xf32> to vector<32x16xf32>
    %148 = arith.addf %145, %147 : vector<32x16xf32>
    %cst_118 = arith.constant 0.000000e+00 : f32
    %149 = vector.broadcast %cst_118 : f32 to vector<32x16xf32>
    %150 = arith.maximumf %148, %149 : vector<32x16xf32>
    %c0_119 = arith.constant 0 : index
    %c0_120 = arith.constant 0 : index
    %151 = vector.load %arg41[%c0_119, %c0_120] : memref<1x16xf32, #tpu.memory_space<vmem>>, vector<1x16xf32>
    %152 = vector.broadcast %151 : vector<1x16xf32> to vector<32x16xf32>
    %153 = arith.mulf %150, %152 : vector<32x16xf32>
    %cst_121 = arith.constant dense<0.000000e+00> : vector<32xf32>
    %154 = vector.multi_reduction <add>, %153, %cst_121 [1] : vector<32x16xf32> to vector<32xf32>
    %155 = vector.shape_cast %154 : vector<32xf32> to vector<32x1xf32>
    %c0_122 = arith.constant 0 : index
    %c0_123 = arith.constant 0 : index
    %156 = vector.load %arg36[%c0_122, %c0_123] : memref<1x1xf32, #tpu.memory_space<vmem>>, vector<1x1xf32>
    %157 = vector.broadcast %156 : vector<1x1xf32> to vector<32x1xf32>
    %158 = arith.addf %155, %157 : vector<32x1xf32>
    %cst_124 = arith.constant dense<0.000000e+00> : vector<32x3xf32>
    %159 = tpu.matmul %10, %1, %cst_124 {dimension_numbers = #tpu.dot_dimension_numbers<[1], [0], [0], [1], [0, 0, 1, 1], [], []>} : vector<32x16xf32>, vector<16x3xf32>, vector<32x3xf32> -> vector<32x3xf32>
    %cst_125 = arith.constant dense<0.000000e+00> : vector<32x3xf32>
    %160 = tpu.matmul %14, %1, %cst_125 {dimension_numbers = #tpu.dot_dimension_numbers<[1], [0], [0], [1], [0, 0, 1, 1], [], []>} : vector<32x16xf32>, vector<16x3xf32>, vector<32x3xf32> -> vector<32x3xf32>
    %161 = arith.subf %159, %160 : vector<32x3xf32>
    %162 = vector.broadcast %26 : vector<32x1xf32> to vector<32x3xf32>
    %163 = arith.mulf %161, %162 : vector<32x3xf32>
    %164 = vector.broadcast %158 : vector<32x1xf32> to vector<32x3xf32>
    %165 = arith.mulf %163, %164 : vector<32x3xf32>
    %cst_126 = arith.constant dense<0.000000e+00> : vector<16x3xf32>
    %166 = tpu.matmul %19, %165, %cst_126 {dimension_numbers = #tpu.dot_dimension_numbers<[1], [0], [0], [1], [0, 0, 1, 1], [], []>} : vector<16x32xf32>, vector<32x3xf32>, vector<16x3xf32> -> vector<16x3xf32>
    %167 = arith.addf %1, %166 : vector<16x3xf32>
    %c0_127 = arith.constant 0 : index
    %c0_128 = arith.constant 0 : index
    %168 = vector.load %arg69[%c0_127, %c0_128] : memref<1x32xf32, #tpu.memory_space<vmem>>, vector<1x32xf32>
    %169 = vector.broadcast %27 : vector<32x1xf32> to vector<32x32xf32>
    %170 = vector.broadcast %168 : vector<1x32xf32> to vector<32x32xf32>
    %171 = arith.mulf %169, %170 : vector<32x32xf32>
    %c0_129 = arith.constant 0 : index
    %c0_130 = arith.constant 0 : index
    %172 = vector.load %arg67[%c0_129, %c0_130] : memref<1x32xf32, #tpu.memory_space<vmem>>, vector<1x32xf32>
    %173 = vector.broadcast %172 : vector<1x32xf32> to vector<32x32xf32>
    %174 = arith.addf %171, %173 : vector<32x32xf32>
    %cst_131 = arith.constant 0.000000e+00 : f32
    %175 = vector.broadcast %cst_131 : f32 to vector<32x32xf32>
    %176 = arith.maximumf %174, %175 : vector<32x32xf32>
    %c0_132 = arith.constant 0 : index
    %c0_133 = arith.constant 0 : index
    %177 = vector.load %arg70[%c0_132, %c0_133] : memref<32x32xf32, #tpu.memory_space<vmem>>, vector<32x32xf32>
    %cst_134 = arith.constant dense<0.000000e+00> : vector<32x32xf32>
    %178 = tpu.matmul %176, %177, %cst_134 {dimension_numbers = #tpu.dot_dimension_numbers<[1], [0], [0], [1], [0, 0, 1, 1], [], []>} : vector<32x32xf32>, vector<32x32xf32>, vector<32x32xf32> -> vector<32x32xf32>
    %c0_135 = arith.constant 0 : index
    %c0_136 = arith.constant 0 : index
    %179 = vector.load %arg68[%c0_135, %c0_136] : memref<1x32xf32, #tpu.memory_space<vmem>>, vector<1x32xf32>
    %180 = vector.broadcast %179 : vector<1x32xf32> to vector<32x32xf32>
    %181 = arith.addf %178, %180 : vector<32x32xf32>
    %c0_137 = arith.constant 0 : index
    %c0_138 = arith.constant 0 : index
    %182 = vector.load %arg44[%c0_137, %c0_138] : memref<8x32xf32, #tpu.memory_space<vmem>>, vector<8x32xf32>
    %cst_139 = arith.constant dense<0.000000e+00> : vector<32x32xf32>
    %183 = tpu.matmul %32, %182, %cst_139 {dimension_numbers = #tpu.dot_dimension_numbers<[1], [0], [0], [1], [0, 0, 1, 1], [], []>} : vector<32x8xf32>, vector<8x32xf32>, vector<32x32xf32> -> vector<32x32xf32>
    %184 = arith.mulf %181, %183 : vector<32x32xf32>
    %c0_140 = arith.constant 0 : index
    %c0_141 = arith.constant 0 : index
    %185 = vector.load %arg80[%c0_140, %c0_141] : memref<8x32xf32, #tpu.memory_space<vmem>>, vector<8x32xf32>
    %cst_142 = arith.constant dense<0.000000e+00> : vector<16x32xf32>
    %186 = tpu.matmul %0, %185, %cst_142 {dimension_numbers = #tpu.dot_dimension_numbers<[1], [0], [0], [1], [0, 0, 1, 1], [], []>} : vector<16x8xf32>, vector<8x32xf32>, vector<16x32xf32> -> vector<16x32xf32>
    %c0_143 = arith.constant 0 : index
    %c0_144 = arith.constant 0 : index
    %187 = vector.load %arg79[%c0_143, %c0_144] : memref<1x32xf32, #tpu.memory_space<vmem>>, vector<1x32xf32>
    %188 = vector.broadcast %187 : vector<1x32xf32> to vector<16x32xf32>
    %189 = arith.addf %186, %188 : vector<16x32xf32>
    %cst_145 = arith.constant dense<0.000000e+00> : vector<32x32xf32>
    %190 = tpu.matmul %10, %189, %cst_145 {dimension_numbers = #tpu.dot_dimension_numbers<[1], [0], [0], [1], [0, 0, 1, 1], [], []>} : vector<32x16xf32>, vector<16x32xf32>, vector<32x32xf32> -> vector<32x32xf32>
    %cst_146 = arith.constant dense<0.000000e+00> : vector<32x32xf32>
    %191 = tpu.matmul %14, %189, %cst_146 {dimension_numbers = #tpu.dot_dimension_numbers<[1], [0], [0], [1], [0, 0, 1, 1], [], []>} : vector<32x16xf32>, vector<16x32xf32>, vector<32x32xf32> -> vector<32x32xf32>
    %c0_147 = arith.constant 0 : index
    %c0_148 = arith.constant 0 : index
    %192 = vector.load %arg49[%c0_147, %c0_148] : memref<32x32xf32, #tpu.memory_space<vmem>>, vector<32x32xf32>
    %cst_149 = arith.constant dense<0.000000e+00> : vector<32x32xf32>
    %193 = tpu.matmul %190, %192, %cst_149 {dimension_numbers = #tpu.dot_dimension_numbers<[1], [0], [0], [1], [0, 0, 1, 1], [], []>} : vector<32x32xf32>, vector<32x32xf32>, vector<32x32xf32> -> vector<32x32xf32>
    %c0_150 = arith.constant 0 : index
    %c0_151 = arith.constant 0 : index
    %194 = vector.load %arg47[%c0_150, %c0_151] : memref<32x32xf32, #tpu.memory_space<vmem>>, vector<32x32xf32>
    %cst_152 = arith.constant dense<0.000000e+00> : vector<32x32xf32>
    %195 = tpu.matmul %191, %194, %cst_152 {dimension_numbers = #tpu.dot_dimension_numbers<[1], [0], [0], [1], [0, 0, 1, 1], [], []>} : vector<32x32xf32>, vector<32x32xf32>, vector<32x32xf32> -> vector<32x32xf32>
    %196 = arith.addf %193, %195 : vector<32x32xf32>
    %c0_153 = arith.constant 0 : index
    %c0_154 = arith.constant 0 : index
    %197 = vector.load %arg48[%c0_153, %c0_154] : memref<32x32xf32, #tpu.memory_space<vmem>>, vector<32x32xf32>
    %cst_155 = arith.constant dense<0.000000e+00> : vector<32x32xf32>
    %198 = tpu.matmul %184, %197, %cst_155 {dimension_numbers = #tpu.dot_dimension_numbers<[1], [0], [0], [1], [0, 0, 1, 1], [], []>} : vector<32x32xf32>, vector<32x32xf32>, vector<32x32xf32> -> vector<32x32xf32>
    %199 = arith.addf %196, %198 : vector<32x32xf32>
    %c0_156 = arith.constant 0 : index
    %c0_157 = arith.constant 0 : index
    %200 = vector.load %arg45[%c0_156, %c0_157] : memref<1x32xf32, #tpu.memory_space<vmem>>, vector<1x32xf32>
    %201 = vector.broadcast %200 : vector<1x32xf32> to vector<32x32xf32>
    %202 = arith.addf %199, %201 : vector<32x32xf32>
    %cst_158 = arith.constant 0.000000e+00 : f32
    %203 = vector.broadcast %cst_158 : f32 to vector<32x32xf32>
    %204 = arith.maximumf %202, %203 : vector<32x32xf32>
    %c0_159 = arith.constant 0 : index
    %c0_160 = arith.constant 0 : index
    %205 = vector.load %arg50[%c0_159, %c0_160] : memref<32x32xf32, #tpu.memory_space<vmem>>, vector<32x32xf32>
    %cst_161 = arith.constant dense<0.000000e+00> : vector<32x32xf32>
    %206 = tpu.matmul %204, %205, %cst_161 {dimension_numbers = #tpu.dot_dimension_numbers<[1], [0], [0], [1], [0, 0, 1, 1], [], []>} : vector<32x32xf32>, vector<32x32xf32>, vector<32x32xf32> -> vector<32x32xf32>
    %c0_162 = arith.constant 0 : index
    %c0_163 = arith.constant 0 : index
    %207 = vector.load %arg46[%c0_162, %c0_163] : memref<1x32xf32, #tpu.memory_space<vmem>>, vector<1x32xf32>
    %208 = vector.broadcast %207 : vector<1x32xf32> to vector<32x32xf32>
    %209 = arith.addf %206, %208 : vector<32x32xf32>
    %cst_164 = arith.constant dense<0.000000e+00> : vector<16x32xf32>
    %210 = tpu.matmul %19, %209, %cst_164 {dimension_numbers = #tpu.dot_dimension_numbers<[1], [0], [0], [1], [0, 0, 1, 1], [], []>} : vector<16x32xf32>, vector<32x32xf32>, vector<16x32xf32> -> vector<16x32xf32>
    %c0_165 = arith.constant 0 : index
    %c0_166 = arith.constant 0 : index
    %211 = vector.load %arg54[%c0_165, %c0_166] : memref<32x32xf32, #tpu.memory_space<vmem>>, vector<32x32xf32>
    %cst_167 = arith.constant dense<0.000000e+00> : vector<16x32xf32>
    %212 = tpu.matmul %189, %211, %cst_167 {dimension_numbers = #tpu.dot_dimension_numbers<[1], [0], [0], [1], [0, 0, 1, 1], [], []>} : vector<16x32xf32>, vector<32x32xf32>, vector<16x32xf32> -> vector<16x32xf32>
    %c0_168 = arith.constant 0 : index
    %c0_169 = arith.constant 0 : index
    %213 = vector.load %arg53[%c0_168, %c0_169] : memref<32x32xf32, #tpu.memory_space<vmem>>, vector<32x32xf32>
    %cst_170 = arith.constant dense<0.000000e+00> : vector<16x32xf32>
    %214 = tpu.matmul %210, %213, %cst_170 {dimension_numbers = #tpu.dot_dimension_numbers<[1], [0], [0], [1], [0, 0, 1, 1], [], []>} : vector<16x32xf32>, vector<32x32xf32>, vector<16x32xf32> -> vector<16x32xf32>
    %215 = arith.addf %212, %214 : vector<16x32xf32>
    %c0_171 = arith.constant 0 : index
    %c0_172 = arith.constant 0 : index
    %216 = vector.load %arg51[%c0_171, %c0_172] : memref<1x32xf32, #tpu.memory_space<vmem>>, vector<1x32xf32>
    %217 = vector.broadcast %216 : vector<1x32xf32> to vector<16x32xf32>
    %218 = arith.addf %215, %217 : vector<16x32xf32>
    %cst_173 = arith.constant 0.000000e+00 : f32
    %219 = vector.broadcast %cst_173 : f32 to vector<16x32xf32>
    %220 = arith.maximumf %218, %219 : vector<16x32xf32>
    %c0_174 = arith.constant 0 : index
    %c0_175 = arith.constant 0 : index
    %221 = vector.load %arg55[%c0_174, %c0_175] : memref<32x32xf32, #tpu.memory_space<vmem>>, vector<32x32xf32>
    %cst_176 = arith.constant dense<0.000000e+00> : vector<16x32xf32>
    %222 = tpu.matmul %220, %221, %cst_176 {dimension_numbers = #tpu.dot_dimension_numbers<[1], [0], [0], [1], [0, 0, 1, 1], [], []>} : vector<16x32xf32>, vector<32x32xf32>, vector<16x32xf32> -> vector<16x32xf32>
    %c0_177 = arith.constant 0 : index
    %c0_178 = arith.constant 0 : index
    %223 = vector.load %arg52[%c0_177, %c0_178] : memref<1x32xf32, #tpu.memory_space<vmem>>, vector<1x32xf32>
    %224 = vector.broadcast %223 : vector<1x32xf32> to vector<16x32xf32>
    %225 = arith.addf %222, %224 : vector<16x32xf32>
    %226 = arith.addf %189, %225 : vector<16x32xf32>
    %cst_179 = arith.constant dense<0.000000e+00> : vector<32x32xf32>
    %227 = tpu.matmul %10, %226, %cst_179 {dimension_numbers = #tpu.dot_dimension_numbers<[1], [0], [0], [1], [0, 0, 1, 1], [], []>} : vector<32x16xf32>, vector<16x32xf32>, vector<32x32xf32> -> vector<32x32xf32>
    %cst_180 = arith.constant dense<0.000000e+00> : vector<32x32xf32>
    %228 = tpu.matmul %14, %226, %cst_180 {dimension_numbers = #tpu.dot_dimension_numbers<[1], [0], [0], [1], [0, 0, 1, 1], [], []>} : vector<32x16xf32>, vector<16x32xf32>, vector<32x32xf32> -> vector<32x32xf32>
    %c0_181 = arith.constant 0 : index
    %c0_182 = arith.constant 0 : index
    %229 = vector.load %arg60[%c0_181, %c0_182] : memref<32x32xf32, #tpu.memory_space<vmem>>, vector<32x32xf32>
    %cst_183 = arith.constant dense<0.000000e+00> : vector<32x32xf32>
    %230 = tpu.matmul %227, %229, %cst_183 {dimension_numbers = #tpu.dot_dimension_numbers<[1], [0], [0], [1], [0, 0, 1, 1], [], []>} : vector<32x32xf32>, vector<32x32xf32>, vector<32x32xf32> -> vector<32x32xf32>
    %c0_184 = arith.constant 0 : index
    %c0_185 = arith.constant 0 : index
    %231 = vector.load %arg58[%c0_184, %c0_185] : memref<32x32xf32, #tpu.memory_space<vmem>>, vector<32x32xf32>
    %cst_186 = arith.constant dense<0.000000e+00> : vector<32x32xf32>
    %232 = tpu.matmul %228, %231, %cst_186 {dimension_numbers = #tpu.dot_dimension_numbers<[1], [0], [0], [1], [0, 0, 1, 1], [], []>} : vector<32x32xf32>, vector<32x32xf32>, vector<32x32xf32> -> vector<32x32xf32>
    %233 = arith.addf %230, %232 : vector<32x32xf32>
    %c0_187 = arith.constant 0 : index
    %c0_188 = arith.constant 0 : index
    %234 = vector.load %arg59[%c0_187, %c0_188] : memref<32x32xf32, #tpu.memory_space<vmem>>, vector<32x32xf32>
    %cst_189 = arith.constant dense<0.000000e+00> : vector<32x32xf32>
    %235 = tpu.matmul %184, %234, %cst_189 {dimension_numbers = #tpu.dot_dimension_numbers<[1], [0], [0], [1], [0, 0, 1, 1], [], []>} : vector<32x32xf32>, vector<32x32xf32>, vector<32x32xf32> -> vector<32x32xf32>
    %236 = arith.addf %233, %235 : vector<32x32xf32>
    %c0_190 = arith.constant 0 : index
    %c0_191 = arith.constant 0 : index
    %237 = vector.load %arg56[%c0_190, %c0_191] : memref<1x32xf32, #tpu.memory_space<vmem>>, vector<1x32xf32>
    %238 = vector.broadcast %237 : vector<1x32xf32> to vector<32x32xf32>
    %239 = arith.addf %236, %238 : vector<32x32xf32>
    %cst_192 = arith.constant 0.000000e+00 : f32
    %240 = vector.broadcast %cst_192 : f32 to vector<32x32xf32>
    %241 = arith.maximumf %239, %240 : vector<32x32xf32>
    %c0_193 = arith.constant 0 : index
    %c0_194 = arith.constant 0 : index
    %242 = vector.load %arg61[%c0_193, %c0_194] : memref<32x32xf32, #tpu.memory_space<vmem>>, vector<32x32xf32>
    %cst_195 = arith.constant dense<0.000000e+00> : vector<32x32xf32>
    %243 = tpu.matmul %241, %242, %cst_195 {dimension_numbers = #tpu.dot_dimension_numbers<[1], [0], [0], [1], [0, 0, 1, 1], [], []>} : vector<32x32xf32>, vector<32x32xf32>, vector<32x32xf32> -> vector<32x32xf32>
    %c0_196 = arith.constant 0 : index
    %c0_197 = arith.constant 0 : index
    %244 = vector.load %arg57[%c0_196, %c0_197] : memref<1x32xf32, #tpu.memory_space<vmem>>, vector<1x32xf32>
    %245 = vector.broadcast %244 : vector<1x32xf32> to vector<32x32xf32>
    %246 = arith.addf %243, %245 : vector<32x32xf32>
    %cst_198 = arith.constant dense<0.000000e+00> : vector<16x32xf32>
    %247 = tpu.matmul %19, %246, %cst_198 {dimension_numbers = #tpu.dot_dimension_numbers<[1], [0], [0], [1], [0, 0, 1, 1], [], []>} : vector<16x32xf32>, vector<32x32xf32>, vector<16x32xf32> -> vector<16x32xf32>
    %c0_199 = arith.constant 0 : index
    %c0_200 = arith.constant 0 : index
    %248 = vector.load %arg65[%c0_199, %c0_200] : memref<32x32xf32, #tpu.memory_space<vmem>>, vector<32x32xf32>
    %cst_201 = arith.constant dense<0.000000e+00> : vector<16x32xf32>
    %249 = tpu.matmul %226, %248, %cst_201 {dimension_numbers = #tpu.dot_dimension_numbers<[1], [0], [0], [1], [0, 0, 1, 1], [], []>} : vector<16x32xf32>, vector<32x32xf32>, vector<16x32xf32> -> vector<16x32xf32>
    %c0_202 = arith.constant 0 : index
    %c0_203 = arith.constant 0 : index
    %250 = vector.load %arg64[%c0_202, %c0_203] : memref<32x32xf32, #tpu.memory_space<vmem>>, vector<32x32xf32>
    %cst_204 = arith.constant dense<0.000000e+00> : vector<16x32xf32>
    %251 = tpu.matmul %247, %250, %cst_204 {dimension_numbers = #tpu.dot_dimension_numbers<[1], [0], [0], [1], [0, 0, 1, 1], [], []>} : vector<16x32xf32>, vector<32x32xf32>, vector<16x32xf32> -> vector<16x32xf32>
    %252 = arith.addf %249, %251 : vector<16x32xf32>
    %c0_205 = arith.constant 0 : index
    %c0_206 = arith.constant 0 : index
    %253 = vector.load %arg62[%c0_205, %c0_206] : memref<1x32xf32, #tpu.memory_space<vmem>>, vector<1x32xf32>
    %254 = vector.broadcast %253 : vector<1x32xf32> to vector<16x32xf32>
    %255 = arith.addf %252, %254 : vector<16x32xf32>
    %cst_207 = arith.constant 0.000000e+00 : f32
    %256 = vector.broadcast %cst_207 : f32 to vector<16x32xf32>
    %257 = arith.maximumf %255, %256 : vector<16x32xf32>
    %c0_208 = arith.constant 0 : index
    %c0_209 = arith.constant 0 : index
    %258 = vector.load %arg66[%c0_208, %c0_209] : memref<32x32xf32, #tpu.memory_space<vmem>>, vector<32x32xf32>
    %cst_210 = arith.constant dense<0.000000e+00> : vector<16x32xf32>
    %259 = tpu.matmul %257, %258, %cst_210 {dimension_numbers = #tpu.dot_dimension_numbers<[1], [0], [0], [1], [0, 0, 1, 1], [], []>} : vector<16x32xf32>, vector<32x32xf32>, vector<16x32xf32> -> vector<16x32xf32>
    %c0_211 = arith.constant 0 : index
    %c0_212 = arith.constant 0 : index
    %260 = vector.load %arg63[%c0_211, %c0_212] : memref<1x32xf32, #tpu.memory_space<vmem>>, vector<1x32xf32>
    %261 = vector.broadcast %260 : vector<1x32xf32> to vector<16x32xf32>
    %262 = arith.addf %259, %261 : vector<16x32xf32>
    %263 = arith.addf %226, %262 : vector<16x32xf32>
    %cst_213 = arith.constant dense<0.000000e+00> : vector<32x32xf32>
    %264 = tpu.matmul %10, %263, %cst_213 {dimension_numbers = #tpu.dot_dimension_numbers<[1], [0], [0], [1], [0, 0, 1, 1], [], []>} : vector<32x16xf32>, vector<16x32xf32>, vector<32x32xf32> -> vector<32x32xf32>
    %cst_214 = arith.constant dense<0.000000e+00> : vector<32x32xf32>
    %265 = tpu.matmul %14, %263, %cst_214 {dimension_numbers = #tpu.dot_dimension_numbers<[1], [0], [0], [1], [0, 0, 1, 1], [], []>} : vector<32x16xf32>, vector<16x32xf32>, vector<32x32xf32> -> vector<32x32xf32>
    %c0_215 = arith.constant 0 : index
    %c0_216 = arith.constant 0 : index
    %266 = vector.load %arg76[%c0_215, %c0_216] : memref<32x32xf32, #tpu.memory_space<vmem>>, vector<32x32xf32>
    %cst_217 = arith.constant dense<0.000000e+00> : vector<32x32xf32>
    %267 = tpu.matmul %264, %266, %cst_217 {dimension_numbers = #tpu.dot_dimension_numbers<[1], [0], [0], [1], [0, 0, 1, 1], [], []>} : vector<32x32xf32>, vector<32x32xf32>, vector<32x32xf32> -> vector<32x32xf32>
    %c0_218 = arith.constant 0 : index
    %c0_219 = arith.constant 0 : index
    %268 = vector.load %arg74[%c0_218, %c0_219] : memref<32x32xf32, #tpu.memory_space<vmem>>, vector<32x32xf32>
    %cst_220 = arith.constant dense<0.000000e+00> : vector<32x32xf32>
    %269 = tpu.matmul %265, %268, %cst_220 {dimension_numbers = #tpu.dot_dimension_numbers<[1], [0], [0], [1], [0, 0, 1, 1], [], []>} : vector<32x32xf32>, vector<32x32xf32>, vector<32x32xf32> -> vector<32x32xf32>
    %270 = arith.addf %267, %269 : vector<32x32xf32>
    %c0_221 = arith.constant 0 : index
    %c0_222 = arith.constant 0 : index
    %271 = vector.load %arg75[%c0_221, %c0_222] : memref<32x32xf32, #tpu.memory_space<vmem>>, vector<32x32xf32>
    %cst_223 = arith.constant dense<0.000000e+00> : vector<32x32xf32>
    %272 = tpu.matmul %184, %271, %cst_223 {dimension_numbers = #tpu.dot_dimension_numbers<[1], [0], [0], [1], [0, 0, 1, 1], [], []>} : vector<32x32xf32>, vector<32x32xf32>, vector<32x32xf32> -> vector<32x32xf32>
    %273 = arith.addf %270, %272 : vector<32x32xf32>
    %c0_224 = arith.constant 0 : index
    %c0_225 = arith.constant 0 : index
    %274 = vector.load %arg71[%c0_224, %c0_225] : memref<1x32xf32, #tpu.memory_space<vmem>>, vector<1x32xf32>
    %275 = vector.broadcast %274 : vector<1x32xf32> to vector<32x32xf32>
    %276 = arith.addf %273, %275 : vector<32x32xf32>
    %cst_226 = arith.constant 0.000000e+00 : f32
    %277 = vector.broadcast %cst_226 : f32 to vector<32x32xf32>
    %278 = arith.maximumf %276, %277 : vector<32x32xf32>
    %c0_227 = arith.constant 0 : index
    %c0_228 = arith.constant 0 : index
    %279 = vector.load %arg77[%c0_227, %c0_228] : memref<32x16xf32, #tpu.memory_space<vmem>>, vector<32x16xf32>
    %cst_229 = arith.constant dense<0.000000e+00> : vector<32x16xf32>
    %280 = tpu.matmul %278, %279, %cst_229 {dimension_numbers = #tpu.dot_dimension_numbers<[1], [0], [0], [1], [0, 0, 1, 1], [], []>} : vector<32x32xf32>, vector<32x16xf32>, vector<32x16xf32> -> vector<32x16xf32>
    %c0_230 = arith.constant 0 : index
    %c0_231 = arith.constant 0 : index
    %281 = vector.load %arg72[%c0_230, %c0_231] : memref<1x16xf32, #tpu.memory_space<vmem>>, vector<1x16xf32>
    %282 = vector.broadcast %281 : vector<1x16xf32> to vector<32x16xf32>
    %283 = arith.addf %280, %282 : vector<32x16xf32>
    %cst_232 = arith.constant 0.000000e+00 : f32
    %284 = vector.broadcast %cst_232 : f32 to vector<32x16xf32>
    %285 = arith.maximumf %283, %284 : vector<32x16xf32>
    %c0_233 = arith.constant 0 : index
    %c0_234 = arith.constant 0 : index
    %286 = vector.load %arg78[%c0_233, %c0_234] : memref<1x16xf32, #tpu.memory_space<vmem>>, vector<1x16xf32>
    %287 = vector.broadcast %286 : vector<1x16xf32> to vector<32x16xf32>
    %288 = arith.mulf %285, %287 : vector<32x16xf32>
    %cst_235 = arith.constant dense<0.000000e+00> : vector<32xf32>
    %289 = vector.multi_reduction <add>, %288, %cst_235 [1] : vector<32x16xf32> to vector<32xf32>
    %290 = vector.shape_cast %289 : vector<32xf32> to vector<32x1xf32>
    %c0_236 = arith.constant 0 : index
    %c0_237 = arith.constant 0 : index
    %291 = vector.load %arg73[%c0_236, %c0_237] : memref<1x1xf32, #tpu.memory_space<vmem>>, vector<1x1xf32>
    %292 = vector.broadcast %291 : vector<1x1xf32> to vector<32x1xf32>
    %293 = arith.addf %290, %292 : vector<32x1xf32>
    %cst_238 = arith.constant dense<0.000000e+00> : vector<32x3xf32>
    %294 = tpu.matmul %10, %167, %cst_238 {dimension_numbers = #tpu.dot_dimension_numbers<[1], [0], [0], [1], [0, 0, 1, 1], [], []>} : vector<32x16xf32>, vector<16x3xf32>, vector<32x3xf32> -> vector<32x3xf32>
    %cst_239 = arith.constant dense<0.000000e+00> : vector<32x3xf32>
    %295 = tpu.matmul %14, %167, %cst_239 {dimension_numbers = #tpu.dot_dimension_numbers<[1], [0], [0], [1], [0, 0, 1, 1], [], []>} : vector<32x16xf32>, vector<16x3xf32>, vector<32x3xf32> -> vector<32x3xf32>
    %296 = arith.subf %294, %295 : vector<32x3xf32>
    %297 = vector.broadcast %26 : vector<32x1xf32> to vector<32x3xf32>
    %298 = arith.mulf %296, %297 : vector<32x3xf32>
    %299 = vector.broadcast %293 : vector<32x1xf32> to vector<32x3xf32>
    %300 = arith.mulf %298, %299 : vector<32x3xf32>
    %cst_240 = arith.constant dense<0.000000e+00> : vector<16x3xf32>
    %301 = tpu.matmul %19, %300, %cst_240 {dimension_numbers = #tpu.dot_dimension_numbers<[1], [0], [0], [1], [0, 0, 1, 1], [], []>} : vector<16x32xf32>, vector<32x3xf32>, vector<16x3xf32> -> vector<16x3xf32>
    %302 = arith.addf %167, %301 : vector<16x3xf32>
    %303 = arith.subf %302, %1 : vector<16x3xf32>
    %c0_241 = arith.constant 0 : index
    %c0_242 = arith.constant 0 : index
    %304 = vector.load %arg81[%c0_241, %c0_242] : memref<16x3xf32, #tpu.memory_space<vmem>>, vector<16x3xf32>
    tpu.vector_store %arg81[%c0_241, %c0_242], %303 {strides = array<i32>} : memref<16x3xf32, #tpu.memory_space<vmem>>, vector<16x3xf32>,
    return
  }
  func.func @transform_0(%arg0: i32) -> (i32, i32) {
    %c0_i32 = arith.constant 0 : i32
    %c0_i32_0 = arith.constant 0 : i32
    %c0_i32_1 = arith.constant 0 : i32
    return %c0_i32, %c0_i32_0 : i32, i32
  }
  func.func @transform_1(%arg0: i32) -> (i32, i32) {
    %c0_i32 = arith.constant 0 : i32
    %c0_i32_0 = arith.constant 0 : i32
    %c0_i32_1 = arith.constant 0 : i32
    return %c0_i32, %c0_i32_0 : i32, i32
  }
  func.func @transform_2(%arg0: i32) -> (i32, i32) {
    %c0_i32 = arith.constant 0 : i32
    %c0_i32_0 = arith.constant 0 : i32
    %c0_i32_1 = arith.constant 0 : i32
    return %c0_i32, %c0_i32_0 : i32, i32
  }
  func.func @transform_3(%arg0: i32) -> (i32, i32) {
    %c0_i32 = arith.constant 0 : i32
    %c0_i32_0 = arith.constant 0 : i32
    %c0_i32_1 = arith.constant 0 : i32
    return %c0_i32, %c0_i32_0 : i32, i32
  }
  func.func @transform_4(%arg0: i32) -> (i32, i32) {
    %c0_i32 = arith.constant 0 : i32
    %c0_i32_0 = arith.constant 0 : i32
    %c0_i32_1 = arith.constant 0 : i32
    return %c0_i32, %c0_i32_0 : i32, i32
  }
  func.func @transform_5(%arg0: i32) -> (i32, i32) {
    %c0_i32 = arith.constant 0 : i32
    %c0_i32_0 = arith.constant 0 : i32
    %c0_i32_1 = arith.constant 0 : i32
    return %c0_i32, %c0_i32_0 : i32, i32
  }
  func.func @transform_6(%arg0: i32) -> (i32, i32) {
    %c0_i32 = arith.constant 0 : i32
    %c0_i32_0 = arith.constant 0 : i32
    %c0_i32_1 = arith.constant 0 : i32
    return %c0_i32, %c0_i32_0 : i32, i32
  }
  func.func @transform_7(%arg0: i32) -> (i32, i32) {
    %c0_i32 = arith.constant 0 : i32
    %c0_i32_0 = arith.constant 0 : i32
    %c0_i32_1 = arith.constant 0 : i32
    return %c0_i32, %c0_i32_0 : i32, i32
  }
  func.func @transform_8(%arg0: i32) -> (i32, i32) {
    %c0_i32 = arith.constant 0 : i32
    %c0_i32_0 = arith.constant 0 : i32
    %c0_i32_1 = arith.constant 0 : i32
    return %c0_i32, %c0_i32_0 : i32, i32
  }
  func.func @transform_9(%arg0: i32) -> (i32, i32) {
    %c0_i32 = arith.constant 0 : i32
    %c0_i32_0 = arith.constant 0 : i32
    %c0_i32_1 = arith.constant 0 : i32
    return %c0_i32, %c0_i32_0 : i32, i32
  }
  func.func @transform_10(%arg0: i32) -> (i32, i32) {
    %c0_i32 = arith.constant 0 : i32
    %c0_i32_0 = arith.constant 0 : i32
    %c0_i32_1 = arith.constant 0 : i32
    return %c0_i32, %c0_i32_0 : i32, i32
  }
  func.func @transform_11(%arg0: i32) -> (i32, i32) {
    %c0_i32 = arith.constant 0 : i32
    %c0_i32_0 = arith.constant 0 : i32
    %c0_i32_1 = arith.constant 0 : i32
    return %c0_i32, %c0_i32_0 : i32, i32
  }
  func.func @transform_12(%arg0: i32) -> (i32, i32) {
    %c0_i32 = arith.constant 0 : i32
    %c0_i32_0 = arith.constant 0 : i32
    %c0_i32_1 = arith.constant 0 : i32
    return %c0_i32, %c0_i32_0 : i32, i32
  }
  func.func @transform_13(%arg0: i32) -> (i32, i32) {
    %c0_i32 = arith.constant 0 : i32
    %c0_i32_0 = arith.constant 0 : i32
    %c0_i32_1 = arith.constant 0 : i32
    return %c0_i32, %c0_i32_0 : i32, i32
  }
  func.func @transform_14(%arg0: i32) -> (i32, i32) {
    %c0_i32 = arith.constant 0 : i32
    %c0_i32_0 = arith.constant 0 : i32
    %c0_i32_1 = arith.constant 0 : i32
    return %c0_i32, %c0_i32_0 : i32, i32
  }
  func.func @transform_15(%arg0: i32) -> (i32, i32) {
    %c0_i32 = arith.constant 0 : i32
    %c0_i32_0 = arith.constant 0 : i32
    %c0_i32_1 = arith.constant 0 : i32
    return %c0_i32, %c0_i32_0 : i32, i32
  }
  func.func @transform_16(%arg0: i32) -> (i32, i32) {
    %c0_i32 = arith.constant 0 : i32
    %c0_i32_0 = arith.constant 0 : i32
    %c0_i32_1 = arith.constant 0 : i32
    return %c0_i32, %c0_i32_0 : i32, i32
  }
  func.func @transform_17(%arg0: i32) -> (i32, i32) {
    %c0_i32 = arith.constant 0 : i32
    %c0_i32_0 = arith.constant 0 : i32
    %c0_i32_1 = arith.constant 0 : i32
    return %c0_i32, %c0_i32_0 : i32, i32
  }
  func.func @transform_18(%arg0: i32) -> (i32, i32) {
    %c0_i32 = arith.constant 0 : i32
    %c0_i32_0 = arith.constant 0 : i32
    %c0_i32_1 = arith.constant 0 : i32
    return %c0_i32, %c0_i32_0 : i32, i32
  }
  func.func @transform_19(%arg0: i32) -> (i32, i32) {
    %c0_i32 = arith.constant 0 : i32
    %c0_i32_0 = arith.constant 0 : i32
    %c0_i32_1 = arith.constant 0 : i32
    return %c0_i32, %c0_i32_0 : i32, i32
  }
  func.func @transform_20(%arg0: i32) -> (i32, i32) {
    %c0_i32 = arith.constant 0 : i32
    %c0_i32_0 = arith.constant 0 : i32
    %c0_i32_1 = arith.constant 0 : i32
    return %c0_i32, %c0_i32_0 : i32, i32
  }
  func.func @transform_21(%arg0: i32) -> (i32, i32) {
    %c0_i32 = arith.constant 0 : i32
    %c0_i32_0 = arith.constant 0 : i32
    %c0_i32_1 = arith.constant 0 : i32
    return %c0_i32, %c0_i32_0 : i32, i32
  }
  func.func @transform_22(%arg0: i32) -> (i32, i32) {
    %c0_i32 = arith.constant 0 : i32
    %c0_i32_0 = arith.constant 0 : i32
    %c0_i32_1 = arith.constant 0 : i32
    return %c0_i32, %c0_i32_0 : i32, i32
  }
  func.func @transform_23(%arg0: i32) -> (i32, i32) {
    %c0_i32 = arith.constant 0 : i32
    %c0_i32_0 = arith.constant 0 : i32
    %c0_i32_1 = arith.constant 0 : i32
    return %c0_i32, %c0_i32_0 : i32, i32
  }
  func.func @transform_24(%arg0: i32) -> (i32, i32) {
    %c0_i32 = arith.constant 0 : i32
    %c0_i32_0 = arith.constant 0 : i32
    %c0_i32_1 = arith.constant 0 : i32
    return %c0_i32, %c0_i32_0 : i32, i32
  }
  func.func @transform_25(%arg0: i32) -> (i32, i32) {
    %c0_i32 = arith.constant 0 : i32
    %c0_i32_0 = arith.constant 0 : i32
    %c0_i32_1 = arith.constant 0 : i32
    return %c0_i32, %c0_i32_0 : i32, i32
  }
  func.func @transform_26(%arg0: i32) -> (i32, i32) {
    %c0_i32 = arith.constant 0 : i32
    %c0_i32_0 = arith.constant 0 : i32
    %c0_i32_1 = arith.constant 0 : i32
    return %c0_i32, %c0_i32_0 : i32, i32
  }
  func.func @transform_27(%arg0: i32) -> (i32, i32) {
    %c0_i32 = arith.constant 0 : i32
    %c0_i32_0 = arith.constant 0 : i32
    %c0_i32_1 = arith.constant 0 : i32
    return %c0_i32, %c0_i32_0 : i32, i32
  }
  func.func @transform_28(%arg0: i32) -> (i32, i32) {
    %c0_i32 = arith.constant 0 : i32
    %c0_i32_0 = arith.constant 0 : i32
    %c0_i32_1 = arith.constant 0 : i32
    return %c0_i32, %c0_i32_0 : i32, i32
  }
  func.func @transform_29(%arg0: i32) -> (i32, i32) {
    %c0_i32 = arith.constant 0 : i32
    %c0_i32_0 = arith.constant 0 : i32
    %c0_i32_1 = arith.constant 0 : i32
    return %c0_i32, %c0_i32_0 : i32, i32
  }
  func.func @transform_30(%arg0: i32) -> (i32, i32) {
    %c0_i32 = arith.constant 0 : i32
    %c0_i32_0 = arith.constant 0 : i32
    %c0_i32_1 = arith.constant 0 : i32
    return %c0_i32, %c0_i32_0 : i32, i32
  }
  func.func @transform_31(%arg0: i32) -> (i32, i32) {
    %c0_i32 = arith.constant 0 : i32
    %c0_i32_0 = arith.constant 0 : i32
    %c0_i32_1 = arith.constant 0 : i32
    return %c0_i32, %c0_i32_0 : i32, i32
  }
  func.func @transform_32(%arg0: i32) -> (i32, i32) {
    %c0_i32 = arith.constant 0 : i32
    %c0_i32_0 = arith.constant 0 : i32
    %c0_i32_1 = arith.constant 0 : i32
    return %c0_i32, %c0_i32_0 : i32, i32
  }
  func.func @transform_33(%arg0: i32) -> (i32, i32) {
    %c0_i32 = arith.constant 0 : i32
    %c0_i32_0 = arith.constant 0 : i32
    %c0_i32_1 = arith.constant 0 : i32
    return %c0_i32, %c0_i32_0 : i32, i32
  }
  func.func @transform_34(%arg0: i32) -> (i32, i32) {
    %c0_i32 = arith.constant 0 : i32
    %c0_i32_0 = arith.constant 0 : i32
    %c0_i32_1 = arith.constant 0 : i32
    return %c0_i32, %c0_i32_0 : i32, i32
  }
  func.func @transform_35(%arg0: i32) -> (i32, i32) {
    %c0_i32 = arith.constant 0 : i32
    %c0_i32_0 = arith.constant 0 : i32
    %c0_i32_1 = arith.constant 0 : i32
    return %c0_i32, %c0_i32_0 : i32, i32
  }
  func.func @transform_36(%arg0: i32) -> (i32, i32) {
    %c0_i32 = arith.constant 0 : i32
    %c0_i32_0 = arith.constant 0 : i32
    %c0_i32_1 = arith.constant 0 : i32
    return %c0_i32, %c0_i32_0 : i32, i32
  }
  func.func @transform_37(%arg0: i32) -> (i32, i32) {
    %c0_i32 = arith.constant 0 : i32
    %c0_i32_0 = arith.constant 0 : i32
    %c0_i32_1 = arith.constant 0 : i32
    return %c0_i32, %c0_i32_0 : i32, i32
  }
  func.func @transform_38(%arg0: i32) -> (i32, i32) {
    %c0_i32 = arith.constant 0 : i32
    %c0_i32_0 = arith.constant 0 : i32
    %c0_i32_1 = arith.constant 0 : i32
    return %c0_i32, %c0_i32_0 : i32, i32
  }
  func.func @transform_39(%arg0: i32) -> (i32, i32) {
    %c0_i32 = arith.constant 0 : i32
    %c0_i32_0 = arith.constant 0 : i32
    %c0_i32_1 = arith.constant 0 : i32
    return %c0_i32, %c0_i32_0 : i32, i32
  }
  func.func @transform_40(%arg0: i32) -> (i32, i32) {
    %c0_i32 = arith.constant 0 : i32
    %c0_i32_0 = arith.constant 0 : i32
    %c0_i32_1 = arith.constant 0 : i32
    return %c0_i32, %c0_i32_0 : i32, i32
  }
  func.func @transform_41(%arg0: i32) -> (i32, i32) {
    %c0_i32 = arith.constant 0 : i32
    %c0_i32_0 = arith.constant 0 : i32
    %c0_i32_1 = arith.constant 0 : i32
    return %c0_i32, %c0_i32_0 : i32, i32
  }
  func.func @transform_42(%arg0: i32) -> (i32, i32) {
    %c0_i32 = arith.constant 0 : i32
    %c0_i32_0 = arith.constant 0 : i32
    %c0_i32_1 = arith.constant 0 : i32
    return %c0_i32, %c0_i32_0 : i32, i32
  }
  func.func @transform_43(%arg0: i32) -> (i32, i32) {
    %c0_i32 = arith.constant 0 : i32
    %c0_i32_0 = arith.constant 0 : i32
    %c0_i32_1 = arith.constant 0 : i32
    return %c0_i32, %c0_i32_0 : i32, i32
  }
  func.func @transform_44(%arg0: i32) -> (i32, i32) {
    %c0_i32 = arith.constant 0 : i32
    %c0_i32_0 = arith.constant 0 : i32
    %c0_i32_1 = arith.constant 0 : i32
    return %c0_i32, %c0_i32_0 : i32, i32
  }
  func.func @transform_45(%arg0: i32) -> (i32, i32) {
    %c0_i32 = arith.constant 0 : i32
    %c0_i32_0 = arith.constant 0 : i32
    %c0_i32_1 = arith.constant 0 : i32
    return %c0_i32, %c0_i32_0 : i32, i32
  }
  func.func @transform_46(%arg0: i32) -> (i32, i32) {
    %c0_i32 = arith.constant 0 : i32
    %c0_i32_0 = arith.constant 0 : i32
    %c0_i32_1 = arith.constant 0 : i32
    return %c0_i32, %c0_i32_0 : i32, i32
  }
  func.func @transform_47(%arg0: i32) -> (i32, i32) {
    %c0_i32 = arith.constant 0 : i32
    %c0_i32_0 = arith.constant 0 : i32
    %c0_i32_1 = arith.constant 0 : i32
    return %c0_i32, %c0_i32_0 : i32, i32
  }
  func.func @transform_48(%arg0: i32) -> (i32, i32) {
    %c0_i32 = arith.constant 0 : i32
    %c0_i32_0 = arith.constant 0 : i32
    %c0_i32_1 = arith.constant 0 : i32
    return %c0_i32, %c0_i32_0 : i32, i32
  }
  func.func @transform_49(%arg0: i32) -> (i32, i32) {
    %c0_i32 = arith.constant 0 : i32
    %c0_i32_0 = arith.constant 0 : i32
    %c0_i32_1 = arith.constant 0 : i32
    return %c0_i32, %c0_i32_0 : i32, i32
  }
  func.func @transform_50(%arg0: i32) -> (i32, i32) {
    %c0_i32 = arith.constant 0 : i32
    %c0_i32_0 = arith.constant 0 : i32
    %c0_i32_1 = arith.constant 0 : i32
    return %c0_i32, %c0_i32_0 : i32, i32
  }
  func.func @transform_51(%arg0: i32) -> (i32, i32) {
    %c0_i32 = arith.constant 0 : i32
    %c0_i32_0 = arith.constant 0 : i32
    %c0_i32_1 = arith.constant 0 : i32
    return %c0_i32, %c0_i32_0 : i32, i32
  }
  func.func @transform_52(%arg0: i32) -> (i32, i32) {
    %c0_i32 = arith.constant 0 : i32
    %c0_i32_0 = arith.constant 0 : i32
    %c0_i32_1 = arith.constant 0 : i32
    return %c0_i32, %c0_i32_0 : i32, i32
  }
  func.func @transform_53(%arg0: i32) -> (i32, i32) {
    %c0_i32 = arith.constant 0 : i32
    %c0_i32_0 = arith.constant 0 : i32
    %c0_i32_1 = arith.constant 0 : i32
    return %c0_i32, %c0_i32_0 : i32, i32
  }
  func.func @transform_54(%arg0: i32) -> (i32, i32) {
    %c0_i32 = arith.constant 0 : i32
    %c0_i32_0 = arith.constant 0 : i32
    %c0_i32_1 = arith.constant 0 : i32
    return %c0_i32, %c0_i32_0 : i32, i32
  }
  func.func @transform_55(%arg0: i32) -> (i32, i32) {
    %c0_i32 = arith.constant 0 : i32
    %c0_i32_0 = arith.constant 0 : i32
    %c0_i32_1 = arith.constant 0 : i32
    return %c0_i32, %c0_i32_0 : i32, i32
  }
  func.func @transform_56(%arg0: i32) -> (i32, i32) {
    %c0_i32 = arith.constant 0 : i32
    %c0_i32_0 = arith.constant 0 : i32
    %c0_i32_1 = arith.constant 0 : i32
    return %c0_i32, %c0_i32_0 : i32, i32
  }
  func.func @transform_57(%arg0: i32) -> (i32, i32) {
    %c0_i32 = arith.constant 0 : i32
    %c0_i32_0 = arith.constant 0 : i32
    %c0_i32_1 = arith.constant 0 : i32
    return %c0_i32, %c0_i32_0 : i32, i32
  }
  func.func @transform_58(%arg0: i32) -> (i32, i32) {
    %c0_i32 = arith.constant 0 : i32
    %c0_i32_0 = arith.constant 0 : i32
    %c0_i32_1 = arith.constant 0 : i32
    return %c0_i32, %c0_i32_0 : i32, i32
  }
  func.func @transform_59(%arg0: i32) -> (i32, i32) {
    %c0_i32 = arith.constant 0 : i32
    %c0_i32_0 = arith.constant 0 : i32
    %c0_i32_1 = arith.constant 0 : i32
    return %c0_i32, %c0_i32_0 : i32, i32
  }
  func.func @transform_60(%arg0: i32) -> (i32, i32) {
    %c0_i32 = arith.constant 0 : i32
    %c0_i32_0 = arith.constant 0 : i32
    %c0_i32_1 = arith.constant 0 : i32
    return %c0_i32, %c0_i32_0 : i32, i32
  }
  func.func @transform_61(%arg0: i32) -> (i32, i32) {
    %c0_i32 = arith.constant 0 : i32
    %c0_i32_0 = arith.constant 0 : i32
    %c0_i32_1 = arith.constant 0 : i32
    return %c0_i32, %c0_i32_0 : i32, i32
  }
  func.func @transform_62(%arg0: i32) -> (i32, i32) {
    %c0_i32 = arith.constant 0 : i32
    %c0_i32_0 = arith.constant 0 : i32
    %c0_i32_1 = arith.constant 0 : i32
    return %c0_i32, %c0_i32_0 : i32, i32
  }
  func.func @transform_63(%arg0: i32) -> (i32, i32) {
    %c0_i32 = arith.constant 0 : i32
    %c0_i32_0 = arith.constant 0 : i32
    %c0_i32_1 = arith.constant 0 : i32
    return %c0_i32, %c0_i32_0 : i32, i32
  }
  func.func @transform_64(%arg0: i32) -> (i32, i32) {
    %c0_i32 = arith.constant 0 : i32
    %c0_i32_0 = arith.constant 0 : i32
    %c0_i32_1 = arith.constant 0 : i32
    return %c0_i32, %c0_i32_0 : i32, i32
  }
  func.func @transform_65(%arg0: i32) -> (i32, i32) {
    %c0_i32 = arith.constant 0 : i32
    %c0_i32_0 = arith.constant 0 : i32
    %c0_i32_1 = arith.constant 0 : i32
    return %c0_i32, %c0_i32_0 : i32, i32
  }
  func.func @transform_66(%arg0: i32) -> (i32, i32) {
    %c0_i32 = arith.constant 0 : i32
    %c0_i32_0 = arith.constant 0 : i32
    %c0_i32_1 = arith.constant 0 : i32
    return %c0_i32, %c0_i32_0 : i32, i32
  }
  func.func @transform_67(%arg0: i32) -> (i32, i32) {
    %c0_i32 = arith.constant 0 : i32
    %c0_i32_0 = arith.constant 0 : i32
    %c0_i32_1 = arith.constant 0 : i32
    return %c0_i32, %c0_i32_0 : i32, i32
  }
  func.func @transform_68(%arg0: i32) -> (i32, i32) {
    %c0_i32 = arith.constant 0 : i32
    %c0_i32_0 = arith.constant 0 : i32
    %c0_i32_1 = arith.constant 0 : i32
    return %c0_i32, %c0_i32_0 : i32, i32
  }
  func.func @transform_69(%arg0: i32) -> (i32, i32) {
    %c0_i32 = arith.constant 0 : i32
    %c0_i32_0 = arith.constant 0 : i32
    %c0_i32_1 = arith.constant 0 : i32
    return %c0_i32, %c0_i32_0 : i32, i32
  }
  func.func @transform_70(%arg0: i32) -> (i32, i32) {
    %c0_i32 = arith.constant 0 : i32
    %c0_i32_0 = arith.constant 0 : i32
    %c0_i32_1 = arith.constant 0 : i32
    return %c0_i32, %c0_i32_0 : i32, i32
  }
  func.func @transform_71(%arg0: i32) -> (i32, i32) {
    %c0_i32 = arith.constant 0 : i32
    %c0_i32_0 = arith.constant 0 : i32
    %c0_i32_1 = arith.constant 0 : i32
    return %c0_i32, %c0_i32_0 : i32, i32
  }
  func.func @transform_72(%arg0: i32) -> (i32, i32) {
    %c0_i32 = arith.constant 0 : i32
    %c0_i32_0 = arith.constant 0 : i32
    %c0_i32_1 = arith.constant 0 : i32
    return %c0_i32, %c0_i32_0 : i32, i32
  }
  func.func @transform_73(%arg0: i32) -> (i32, i32) {
    %c0_i32 = arith.constant 0 : i32
    %c0_i32_0 = arith.constant 0 : i32
    %c0_i32_1 = arith.constant 0 : i32
    return %c0_i32, %c0_i32_0 : i32, i32
  }
  func.func @transform_74(%arg0: i32) -> (i32, i32) {
    %c0_i32 = arith.constant 0 : i32
    %c0_i32_0 = arith.constant 0 : i32
    %c0_i32_1 = arith.constant 0 : i32
    return %c0_i32, %c0_i32_0 : i32, i32
  }
  func.func @transform_75(%arg0: i32) -> (i32, i32) {
    %c0_i32 = arith.constant 0 : i32
    %c0_i32_0 = arith.constant 0 : i32
    %c0_i32_1 = arith.constant 0 : i32
    return %c0_i32, %c0_i32_0 : i32, i32
  }
  func.func @transform_76(%arg0: i32) -> (i32, i32) {
    %c0_i32 = arith.constant 0 : i32
    %c0_i32_0 = arith.constant 0 : i32
    %c0_i32_1 = arith.constant 0 : i32
    return %c0_i32, %c0_i32_0 : i32, i32
  }
  func.func @transform_77(%arg0: i32) -> (i32, i32) {
    %c0_i32 = arith.constant 0 : i32
    %c0_i32_0 = arith.constant 0 : i32
    %c0_i32_1 = arith.constant 0 : i32
    return %c0_i32, %c0_i32_0 : i32, i32
  }
  func.func @transform_78(%arg0: i32) -> (i32, i32) {
    %c0_i32 = arith.constant 0 : i32
    %c0_i32_0 = arith.constant 0 : i32
    %c0_i32_1 = arith.constant 0 : i32
    return %c0_i32, %c0_i32_0 : i32, i32
  }
  func.func @transform_79(%arg0: i32) -> (i32, i32) {
    %c0_i32 = arith.constant 0 : i32
    %c0_i32_0 = arith.constant 0 : i32
    %c0_i32_1 = arith.constant 0 : i32
    return %c0_i32, %c0_i32_0 : i32, i32
  }
  func.func @transform_80(%arg0: i32) -> (i32, i32) {
    %c0_i32 = arith.constant 0 : i32
    %c0_i32_0 = arith.constant 0 : i32
    %c0_i32_1 = arith.constant 0 : i32
    return %c0_i32, %c0_i32_0 : i32, i32
  }
}

</mosaic_0001>

<bundles_post_ra>
// kernel: graph_diffusion_forward.1
= control target key start
LH: loop header
LB: loop body
LE: loop exit
PB: predicated region body
PF: predicated region fallthrough
CT: control target
= control target key end

     0   :  { %s10747_s6 = smov 1   ;;  %s10748_s10 = smov 2   ;;  %s12266_s0 = inlined_call_operand.smem [shape: u32[81], index: -1, kind: input, shape index: {}] }
   0x1   :  { %s10891_s5 = sld [smem:[%s12266_s0]]   ;;  %s10749_s14 = smov 3  }
   0x2   :  { %s10896_s9 = sld [smem:[%s12266_s0 + %s10747_s6]]   ;;  %s10750_s18 = smov 4  }
   0x3   :  { %s10901_s13 = sld [smem:[%s12266_s0 + %s10748_s10]]   ;;  %s10751_s22 = smov 5  }
   0x4   :  { %s10906_s17 = sld [smem:[%s12266_s0 + %s10749_s14]]   ;;  %s10752_s26 = smov 6  }
   0x5   :  { %s10911_s21 = sld [smem:[%s12266_s0 + %s10750_s18]]   ;;  %s10753_s30 = smov 7  }
   0x6   :  { %s10916_s25 = sld [smem:[%s12266_s0 + %s10751_s22]]   ;;  %s10754_s4 = smov 8  }
   0x7   :  { %12327 = sst [smem:[#allocation110_spill]] %s10891_s5  ;;  %s10755_s10 = smov 9  }
   0x8   :  { %12328 = sst [smem:[#allocation111_spill]] %s10896_s9  ;;  %s10756_s15 = smov 10  }
   0x9   :  { %12329 = sst [smem:[#allocation112_spill]] %s10901_s13  ;;  %s10757_s20 = smov 11  }
   0xa   :  { %12330 = sst [smem:[#allocation113_spill]] %s10906_s17  ;;  %s10759_s1 = smov 13  }
   0xb   :  { %12331 = sst [smem:[#allocation114_spill]] %s10911_s21  ;;  %s10760_s7 = smov 14  }
   0xc   :  { %12332 = sst [smem:[#allocation115_spill]] %s10916_s25  ;;  %s10762_s22 = smov 16  }
   0xd   :  { %s10921_s29 = sld [smem:[%s12266_s0 + %s10752_s26]]   ;;  %s10758_s26 = smov 12  }
   0xe   :  { %s10926_s3 = sld [smem:[%s12266_s0 + %s10753_s30]]   ;;  %s10763_s28 = smov 17  }
   0xf   :  { %s10931_s8 = sld [smem:[%s12266_s0 + %s10754_s4]]   ;;  %s10782_s23 = smov 36  }
  0x10   :  { %s10936_s14 = sld [smem:[%s12266_s0 + %s10755_s10]]   ;;  %s10784_s10 = smov 38  }
  0x11   :  { %s10941_s19 = sld [smem:[%s12266_s0 + %s10756_s15]]   ;;  %s10761_s15 = smov 15  }
  0x12   :  { %s10946_s24 = sld [smem:[%s12266_s0 + %s10757_s20]]   ;;  %s10785_s16 = smov 39  }
  0x13   :  { %12333 = sst [smem:[#allocation116_spill]] %s10921_s29 }
  0x14   :  { %s10951_s30 = sld [smem:[%s12266_s0 + %s10758_s26]]  }
  0x15   :  { %12334 = sst [smem:[#allocation117_spill]] %s10931_s8 }
  0x16   :  { %12335 = sst [smem:[#allocation118_spill]] %s10936_s14 }
  0x17   :  { %12336 = sst [smem:[#allocation119_spill]] %s10941_s19 }
  0x18   :  { %12337 = sst [smem:[#allocation120_spill]] %s10946_s24 }
  0x19   :  { %s10956_s6 = sld [smem:[%s12266_s0 + %s10759_s1]]   ;;  %s10783_s1 = smov 37  }
  0x1a   :  { %12338 = sst [smem:[#allocation121_spill]] %s10951_s30 }
  0x1b   :  { %s10961_s12 = sld [smem:[%s12266_s0 + %s10760_s7]]   ;;  %s10764_s7 = smov 18  }
  0x1c   :  { %s10966_s20 = sld [smem:[%s12266_s0 + %s10761_s15]]   ;;  %s10765_s15 = smov 19  }
  0x1d   :  { %s10971_s27 = sld [smem:[%s12266_s0 + %s10762_s22]]   ;;  %s10766_s22 = smov 20  }
  0x1e   :  { %s10976_s4 = sld [smem:[%s12266_s0 + %s10763_s28]]   ;;  %s10767_s28 = smov 21  }
  0x1f   :  { %s10981_s21 = sld [smem:[%s12266_s0 + %s10764_s7]]   ;;  %s10768_s7 = smov 22  }
  0x20   :  { %s11001_s19 = sld [smem:[%s12266_s0 + %s10768_s7]]   ;;  %s10772_s7 = smov 26  }
  0x21   :  { %12339 = sst [smem:[#allocation122_spill]] %s10961_s12 }
  0x22   :  { %12340 = sst [smem:[#allocation123_spill]] %s10966_s20 }
  0x23   :  { %12341 = sst [smem:[#allocation124_spill]] %s10971_s27 }
  0x24   :  { %12342 = sst [smem:[#allocation125_spill]] %s10976_s4 }
  0x25   :  { %s10986_s20 = sld [smem:[%s12266_s0 + %s10765_s15]]   ;;  %s10769_s15 = smov 23  }
  0x26   :  { %s10991_s27 = sld [smem:[%s12266_s0 + %s10766_s22]]   ;;  %s10770_s22 = smov 24  }
  0x27   :  { %s10996_s4 = sld [smem:[%s12266_s0 + %s10767_s28]]   ;;  %s10771_s28 = smov 25  }
  0x28   :  { %12346 = sst [smem:[#allocation129_spill]] %s11001_s19 }
  0x29   :  { %s11006_s30 = sld [smem:[%s12266_s0 + %s10769_s15]]   ;;  %s10773_s15 = smov 27  }
  0x2a   :  { %s11021_s19 = sld [smem:[%s12266_s0 + %s10772_s7]]   ;;  %s10776_s7 = smov 30  }
  0x2b   :  { %12343 = sst [smem:[#allocation126_spill]] %s10986_s20 }
  0x2c   :  { %12344 = sst [smem:[#allocation127_spill]] %s10991_s27 }
  0x2d   :  { %12345 = sst [smem:[#allocation128_spill]] %s10996_s4 }
  0x2e   :  { %s11011_s27 = sld [smem:[%s12266_s0 + %s10770_s22]]   ;;  %s10774_s22 = smov 28  }
  0x2f   :  { %s11016_s4 = sld [smem:[%s12266_s0 + %s10771_s28]]   ;;  %s10775_s28 = smov 29  }
  0x30   :  { %12348 = sst [smem:[#allocation131_spill]] %s11021_s19 }
  0x31   :  { %s11026_s24 = sld [smem:[%s12266_s0 + %s10773_s15]]   ;;  %s10777_s15 = smov 31  }
  0x32   :  { %s11031_s14 = sld [smem:[%s12266_s0 + %s10774_s22]]   ;;  %s10778_s22 = smov 32  }
  0x33   :  { %s11036_s5 = sld [smem:[%s12266_s0 + %s10775_s28]]   ;;  %s10779_s28 = smov 33  }
  0x34   :  { %12347 = sst [smem:[#allocation130_spill]] %s11011_s27 }
  0x35   :  { %s11041_s25 = sld [smem:[%s12266_s0 + %s10776_s7]]   ;;  %s10780_s7 = smov 34  }
  0x36   :  { %s11046_s9 = sld [smem:[%s12266_s0 + %s10777_s15]]   ;;  %s10781_s15 = smov 35  }
  0x37   :  { %s11051_s17 = sld [smem:[%s12266_s0 + %s10778_s22]]   ;;  %s10790_s22 = smov 44  }
  0x38   :  { %12349 = sst [smem:[#allocation132_spill]] %s11031_s14 }
  0x39   :  { %s11056_s13 = sld [smem:[%s12266_s0 + %s10779_s28]]   ;;  %s10819_s28 = smov 73  }
  0x3a   :  { %s7442_s14 = sld [smem:[%s12266_s0 + %s10781_s15]]  }
  0x3b   :  { %12350 = sst [smem:[#allocation133_spill]] %s11041_s25 }
  0x3c   :  { %s11061_s25 = sld [smem:[%s12266_s0 + %s10780_s7]]  }
  0x3d   :  { %12351 = sst [smem:[#allocation134_spill]] %s11051_s17 }
  0x3e   :  { %s11069_s17 = sld [smem:[%s12266_s0 + %s10782_s23]]   ;;  %s10786_s23 = smov 40  }
  0x3f   :  { %12352 = sst [smem:[#allocation135_spill]] %s11056_s13 }
  0x40   :  { %s11074_s13 = sld [smem:[%s12266_s0 + %s10783_s1]]   ;;  %s10787_s1 = smov 41   ;;  %v166_v0 = vstv %s7442_s14 }
  0x41   :  { %s11079_s19 = sld [smem:[%s12266_s0 + %s10784_s10]]   ;;  %s10788_s10 = smov 42   ;;  %167 = vst [vmem:[#allocation2] sm:$0x1] %v166_v0 }
  0x42   :  { %s11084_s27 = sld [smem:[%s12266_s0 + %s10785_s16]]   ;;  %s10789_s16 = smov 43  }
  0x43   :  { %s11094_s20 = sld [smem:[%s12266_s0 + %s10787_s1]]   ;;  %s10791_s14 = smov 45  }
  0x44   :  { %12353 = sst [smem:[#allocation136_spill]] %s11069_s17 }
  0x45   :  { %s11089_s17 = sld [smem:[%s12266_s0 + %s10786_s23]]  }
  0x46   :  { %s11099_s15 = sld [smem:[%s12266_s0 + %s10788_s10]]   ;;  %s10792_s10 = smov 46  }
  0x47   :  { %12354 = sst [smem:[#allocation137_spill]] %s11079_s19  ;;  %s10794_s19 = smov 48  }
  0x48   :  { %12355 = sst [smem:[#allocation138_spill]] %s11084_s27  ;;  %s10793_s27 = smov 47  }
  0x49   :  { %s11104_s23 = sld [smem:[%s12266_s0 + %s10789_s16]]   ;;  %s10821_s16 = smov 75  }
  0x4a   :  { %s11109_s1 = sld [smem:[%s12266_s0 + %s10790_s22]]   ;;  %s10822_s22 = smov 76  }
  0x4b   :  { %12356 = sst [smem:[#allocation139_spill]] %s11089_s17 }
  0x4c   :  { %12357 = sst [smem:[#allocation140_spill]] %s11099_s15  ;;  %s10796_s15 = smov 50  }
  0x4d   :  { %s11114_s7 = sld [smem:[%s12266_s0 + %s10791_s14]]   ;;  %s10795_s14 = smov 49  }
  0x4e   :  { %s11119_s17 = sld [smem:[%s12266_s0 + %s10792_s10]]   ;;  %s10820_s10 = smov 74  }
  0x4f   :  { %s11124_s12 = sld [smem:[%s12266_s0 + %s10793_s27]]   ;;  %s10797_s27 = smov 51  }
  0x50   :  { %12358 = sst [smem:[#allocation141_spill]] %s11109_s1 }
  0x51   :  { %s11129_s1 = sld [smem:[%s12266_s0 + %s10794_s19]]   ;;  %s10798_s19 = smov 52  }
  0x52   :  { %s11134_s8 = sld [smem:[%s12266_s0 + %s10795_s14]]   ;;  %s10799_s14 = smov 53  }
  0x53   :  { %s11144_s29 = sld [smem:[%s12266_s0 + %s10797_s27]]   ;;  %s10801_s27 = smov 55  }
  0x54   :  { %12359 = sst [smem:[#allocation142_spill]] %s11119_s17 }
  0x55   :  { %12360 = sst [smem:[#allocation143_spill]] %s11124_s12 }
  0x56   :  { %s11139_s17 = sld [smem:[%s12266_s0 + %s10796_s15]]   ;;  %s10800_s15 = smov 54  }
  0x57   :  { %12361 = sst [smem:[#allocation144_spill]] %s11129_s1 }
  0x58   :  { %12362 = sst [smem:[#allocation145_spill]] %s11134_s8 }
  0x59   :  { %12364 = sst [smem:[#allocation147_spill]] %s11144_s29 }
  0x5a   :  { %s11149_s1 = sld [smem:[%s12266_s0 + %s10798_s19]]   ;;  %s10802_s19 = smov 56  }
  0x5b   :  { %s11154_s8 = sld [smem:[%s12266_s0 + %s10799_s14]]   ;;  %s10803_s14 = smov 57  }
  0x5c   :  { %12363 = sst [smem:[#allocation146_spill]] %s11139_s17 }
  0x5d   :  { %s11159_s17 = sld [smem:[%s12266_s0 + %s10800_s15]]   ;;  %s10804_s15 = smov 58  }
  0x5e   :  { %s11164_s29 = sld [smem:[%s12266_s0 + %s10801_s27]]   ;;  %s10805_s27 = smov 59  }
  0x5f   :  { %s11267_s12 = sld [smem:[%s12266_s0 + %s10822_s22]]   ;;  %s10826_s22 = smov 80  }
  0x60   :  { %12365 = sst [smem:[#allocation148_spill]] %s11149_s1 }
  0x61   :  { %12366 = sst [smem:[#allocation149_spill]] %s11154_s8 }
  0x62   :  { %s11169_s1 = sld [smem:[%s12266_s0 + %s10802_s19]]   ;;  %s10806_s19 = smov 60  }
  0x63   :  { %12367 = sst [smem:[#allocation150_spill]] %s11159_s17 }
  0x64   :  { %12368 = sst [smem:[#allocation151_spill]] %s11164_s29 }
  0x65   :  { %s11174_s8 = sld [smem:[%s12266_s0 + %s10803_s14]]   ;;  %s10807_s14 = smov 61  }
  0x66   :  { %s11179_s17 = sld [smem:[%s12266_s0 + %s10804_s15]]   ;;  %s10808_s15 = smov 62  }
  0x67   :  { %s11184_s29 = sld [smem:[%s12266_s0 + %s10805_s27]]   ;;  %s10809_s27 = smov 63  }
  0x68   :  { %12369 = sst [smem:[#allocation152_spill]] %s11169_s1 }
  0x69   :  { %s11189_s1 = sld [smem:[%s12266_s0 + %s10806_s19]]   ;;  %s10810_s19 = smov 64  }
  0x6a   :  { %12387 = sst [smem:[#allocation170_spill]] %s11267_s12 }
  0x6b   :  { %12370 = sst [smem:[#allocation153_spill]] %s11174_s8 }
  0x6c   :  { %12371 = sst [smem:[#allocation154_spill]] %s11179_s17 }
  0x6d   :  { %12372 = sst [smem:[#allocation155_spill]] %s11184_s29 }
  0x6e   :  { %s11194_s8 = sld [smem:[%s12266_s0 + %s10807_s14]]   ;;  %s10811_s14 = smov 65  }
  0x6f   :  { %12373 = sst [smem:[#allocation156_spill]] %s11189_s1 }
  0x70   :  { %s11199_s17 = sld [smem:[%s12266_s0 + %s10808_s15]]   ;;  %s10812_s15 = smov 66  }
  0x71   :  { %s11204_s29 = sld [smem:[%s12266_s0 + %s10809_s27]]   ;;  %s10813_s27 = smov 67  }
  0x72   :  { %s11209_s1 = sld [smem:[%s12266_s0 + %s10810_s19]]   ;;  %s10814_s19 = smov 68  }
  0x74   :  { %12374 = sst [smem:[#allocation157_spill]] %s11194_s8 }
  0x75   :  { %s11214_s8 = sld [smem:[%s12266_s0 + %s10811_s14]]   ;;  %s10815_s14 = smov 69  }
  0x76   :  { %12375 = sst [smem:[#allocation158_spill]] %s11199_s17 }
  0x77   :  { %12376 = sst [smem:[#allocation159_spill]] %s11204_s29 }
  0x78   :  { %12377 = sst [smem:[#allocation160_spill]] %s11209_s1 }
  0x79   :  { %s11219_s17 = sld [smem:[%s12266_s0 + %s10812_s15]]   ;;  %s10816_s15 = smov 70  }
  0x7a   :  { %s11224_s29 = sld [smem:[%s12266_s0 + %s10813_s27]]   ;;  %s10817_s27 = smov 71  }
  0x7b   :  { %12378 = sst [smem:[#allocation161_spill]] %s11214_s8 }
  0x7c   :  { %s11229_s1 = sld [smem:[%s12266_s0 + %s10814_s19]]   ;;  %s10818_s19 = smov 72  }
  0x7d   :  { %s11234_s8 = sld [smem:[%s12266_s0 + %s10815_s14]]  }
  0x7f   :  { %12379 = sst [smem:[#allocation162_spill]] %s11219_s17 }
  0x80   :  { %12380 = sst [smem:[#allocation163_spill]] %s11224_s29 }
  0x81   :  { %s11239_s17 = sld [smem:[%s12266_s0 + %s10816_s15]]  }
  0x82   :  { %12381 = sst [smem:[#allocation164_spill]] %s11229_s1 }
  0x83   :  { %12382 = sst [smem:[#allocation165_spill]] %s11234_s8 }
  0x84   :  { %s11244_s29 = sld [smem:[%s12266_s0 + %s10817_s27]]  }
  0x85   :  { %s7479_s1 = sld [smem:[%s12266_s0 + %s10818_s19]]  }
  0x86   :  { %s11252_s8 = sld [smem:[%s12266_s0 + %s10819_s28]]   ;;  %s10823_s28 = smov 77  }
  0x87   :  { %12383 = sst [smem:[#allocation166_spill]] %s11239_s17 }
  0x88   :  { %s11257_s17 = sld [smem:[%s12266_s0 + %s10820_s10]]   ;;  %s10824_s10 = smov 78  }
  0x8a   :  { %12384 = sst [smem:[#allocation167_spill]] %s11244_s29 }
  0x8b   :  { %s11262_s29 = sld [smem:[%s12266_s0 + %s10821_s16]]   ;;  %v168_v1 = vstv %s7479_s1  ;;  %s10825_s16 = smov 79  }
  0x8c   :  { %12385 = sst [smem:[#allocation168_spill]] %s11252_s8  ;;  %169 = vst [vmem:[#allocation3] sm:$0x1] %v168_v1 }
  0x8d   :  { %s11272_s8 = sld [smem:[%s12266_s0 + %s10823_s28]]  }
  0x8e   :  { %12386 = sst [smem:[#allocation169_spill]] %s11257_s17 }
  0x8f   :  { %s11277_s17 = sld [smem:[%s12266_s0 + %s10824_s10]]  }
  0x90   :  { %s11282_s19 = sld [smem:[%s12266_s0 + %s10825_s16]]  }
  0x91   :  { %s11287_s28 = sld [smem:[%s12266_s0 + %s10826_s22]]  }
  0x92   :  { %170 = vsyncpa [#allocation5], 0 }
  0x93   :  { %171 = vsyncpa [#allocation7], 0 }
  0x94   :  { %172 = vsyncpa [#allocation10], 0 }
  0x95   :  { %173 = vsyncpa [#allocation13], 0 }
  0x96   :  { %174 = vsyncpa [#allocation16], 0 }
  0x97   :  { %175 = vsyncpa [#allocation19], 0 }
  0x98   :  { %176 = vsyncpa [#allocation22], 0 }
  0x99   :  { %177 = vsyncpa [#allocation25], 0 }
  0x9a   :  { %178 = vsyncpa [#allocation28], 0 }
  0x9b   :  { %179 = vsyncpa [#allocation31], 0 }
  0x9c   :  { %180 = vsyncpa [#allocation34], 0 }
  0x9d   :  { %181 = vsyncpa [#allocation37], 0 }
  0x9e   :  { %182 = vsyncpa [#allocation40], 0 }
  0x9f   :  { %183 = vsyncpa [#allocation43], 0 }
  0xa0   :  { %184 = vsyncpa [#allocation46], 0 }
  0xa1   :  { %185 = vsyncpa [#allocation49], 0 }
  0xa2   :  { %186 = vsyncpa [#allocation52], 0 }
  0xa3   :  { %187 = vsyncpa [#allocation55], 0 }
  0xa4   :  { %188 = vsyncpa [#allocation58], 0 }
  0xa5   :  { %189 = vsyncpa [#allocation61], 0 }
  0xa6   :  { %190 = vsyncpa [#allocation64], 0 }
  0xa7   :  { %191 = vsyncpa [#allocation67], 0 }
  0xa8   :  { %192 = vsyncpa [#allocation70], 0 }
  0xa9   :  { %193 = vsyncpa [#allocation73], 0 }
  0xaa   :  { %194 = vsyncpa [#allocation76], 0 }
  0xab   :  { %195 = vsyncpa [#allocation79], 0 }
  0xac   :  { %196 = vsyncpa [#allocation82], 0  ;;  %s10827_s0 = smov [#allocation6]   ;;  %s10828_s1 = smov [#allocation9]  }
  0xad   :  { %s225_s12 = sshll.u32 %s10827_s0, 4  ;;  %s253_s14 = sshll.u32 %s10828_s1, 4  ;;  %s226_s12 = int_to_ptr.vmem [resolvable:$true] %s225_s12  ;;  %s254_s14 = int_to_ptr.vmem [resolvable:$true] %s253_s14 }
  0xae   :  { %s9549_s2 = scalar_lea.hbm %s10926_s3, 16 }
  0xaf   :  { %p9550_p0 = scmp.ne.s32.totalorder %s10926_s3, %s9549_s2  ;;  %p9553_p1 = scmp.lt.u32.totalorder %s9549_s2, %s10926_s3 }
  0xb1   :  { %p9555_p2 = pnand %p9553_p1, %p9550_p0 }
  0xb3   :  { %9558 = shalt.err (!%p9555_p2)
}
  0xb4   :  { %s9559_s10 = scalar_lea.vmem %s226_s12, 16  ;;  %s9563_s15 = scalar_lea.vmem %s226_s12, 32 }
  0xb5   :  { %p9560_p3 = scmp.ne.s32.totalorder %s226_s12, %s9559_s10  ;;  %p9564_p4 = scmp.lt.s32.totalorder %s226_s12, %s226_s12 }
  0xb6   :  { %p9565_p5 = scmp.lt.s32.totalorder %s9563_s15, %s9559_s10 }
  0xb8   :  { %p9566_p6 = por %p9565_p5, %p9564_p4 }
  0xba   :  { %p9567_p7 = pnand %p9566_p6, %p9560_p3 }
  0xbc   :  { %9570 = shalt.err (!%p9567_p7)
}
  0xbd   :  { %228 = dma.hbm_to_vmem [thread:$0]  %s10926_s3, 16, %s226_s12, [#allocation7]  }
  0xbe   :  { %s9571_s11 = scalar_lea.hbm %s10956_s6, 16 }
  0xbf   :  { %p9572_p8 = scmp.ne.s32.totalorder %s10956_s6, %s9571_s11  ;;  %p9575_p9 = scmp.lt.u32.totalorder %s9571_s11, %s10956_s6 }
  0xc1   :  { %p9577_p10 = pnand %p9575_p9, %p9572_p8 }
  0xc3   :  { %9580 = shalt.err (!%p9577_p10)
}
  0xc4   :  { %s9581_s16 = scalar_lea.vmem %s254_s14, 16  ;;  %s9585_s27 = scalar_lea.vmem %s254_s14, 32 }
  0xc5   :  { %p9582_p11 = scmp.ne.s32.totalorder %s254_s14, %s9581_s16  ;;  %p9586_p12 = scmp.lt.s32.totalorder %s254_s14, %s254_s14 }
  0xc6   :  { %p9587_p13 = scmp.lt.s32.totalorder %s9585_s27, %s9581_s16 }
  0xc8   :  { %p9588_p0 = por %p9587_p13, %p9586_p12 }
  0xca   :  { %p9589_p1 = pnand %p9588_p0, %p9582_p11 }
  0xcc   :  { %9592 = shalt.err (!%p9589_p1)
}
  0xcd   :  { %256 = dma.hbm_to_vmem [thread:$0]  %s10956_s6, 16, %s254_s14, [#allocation10]  }
  0xce   :  { %s10829_s18 = smov [#allocation12]   ;;  %s10830_s22 = smov [#allocation15]  }
  0xcf   :  { %s279_s3 = sshll.u32 %s10829_s18, 4  ;;  %s304_s26 = sshll.u32 %s10830_s22, 4  ;;  %s280_s3 = int_to_ptr.vmem [resolvable:$true] %s279_s3  ;;  %s11297_s26 = int_to_ptr.vmem [resolvable:$true] %s304_s26 }
  0xd0   :  { %s9593_s0 = scalar_lea.hbm %s10981_s21, 16 }
  0xd1   :  { %p9594_p2 = scmp.ne.s32.totalorder %s10981_s21, %s9593_s0  ;;  %p9597_p3 = scmp.lt.u32.totalorder %s9593_s0, %s10981_s21 }
  0xd3   :  { %p9599_p4 = pnand %p9597_p3, %p9594_p2 }
  0xd5   :  { %9602 = shalt.err (!%p9599_p4)
}
  0xd6   :  { %s9603_s12 = scalar_lea.vmem %s280_s3, 16  ;;  %s9607_s1 = scalar_lea.vmem %s280_s3, 32 }
  0xd7   :  { %p9604_p5 = scmp.ne.s32.totalorder %s280_s3, %s9603_s12  ;;  %p9608_p6 = scmp.lt.s32.totalorder %s280_s3, %s280_s3 }
  0xd8   :  { %p9609_p7 = scmp.lt.s32.totalorder %s9607_s1, %s9603_s12 }
  0xda   :  { %p9610_p8 = por %p9609_p7, %p9608_p6 }
  0xdc   :  { %p9611_p9 = pnand %p9610_p8, %p9604_p5 }
  0xde   :  { %9614 = shalt.err (!%p9611_p9)
}
  0xdf   :  { %282 = dma.hbm_to_vmem [thread:$0]  %s10981_s21, 16, %s280_s3, [#allocation13]  }
  0xe0   :  { %s9615_s6 = scalar_lea.hbm %s11006_s30, 512 }
  0xe1   :  { %p9616_p10 = scmp.ne.s32.totalorder %s11006_s30, %s9615_s6  ;;  %p9619_p11 = scmp.lt.u32.totalorder %s9615_s6, %s11006_s30 }
  0xe3   :  { %p9621_p12 = pnand %p9619_p11, %p9616_p10 }
  0xe5   :  { %9624 = shalt.err (!%p9621_p12)
}
  0xe6   :  { %s9625_s14 = scalar_lea.vmem %s11297_s26, 512  ;;  %p9630_p0 = scmp.lt.s32.totalorder %s11297_s26, %s11297_s26 }
  0xe7   :  { %p9626_p13 = scmp.ne.s32.totalorder %s11297_s26, %s9625_s14  ;;  %p9631_p1 = scmp.lt.s32.totalorder %s9625_s14, %s9625_s14 }
  0xe9   :  { %p9632_p2 = por %p9631_p1, %p9630_p0 }
  0xeb   :  { %p9633_p3 = pnand %p9632_p2, %p9626_p13 }
  0xed   :  { %9636 = shalt.err (!%p9633_p3)
}
  0xee   :  { %s10831_s2 = smov 128   ;;  %s10832_s21 = smov 8  }
  0xef   :  { %310 = dma.hbm_to_vmem [thread:$0]  %s11006_s30, 512, %s11297_s26, [#allocation16], %s10831_s2, %s10831_s2, %s10832_s21  }
  0xf0   :  { %s10833_s10 = smov [#allocation18]   ;;  %s10834_s11 = smov [#allocation21]  }
  0xf1   :  { %s327_s15 = sshll.u32 %s10833_s10, 4  ;;  %s348_s16 = sshll.u32 %s10834_s11, 4  ;;  %s328_s15 = int_to_ptr.vmem [resolvable:$true] %s327_s15  ;;  %s11315_s16 = int_to_ptr.vmem [resolvable:$true] %s348_s16 }
  0xf2   :  { %s9637_s27 = scalar_lea.hbm %s11016_s4, 16 }
  0xf3   :  { %p9638_p4 = scmp.ne.s32.totalorder %s11016_s4, %s9637_s27  ;;  %p9641_p5 = scmp.lt.u32.totalorder %s9637_s27, %s11016_s4 }
  0xf5   :  { %p9643_p6 = pnand %p9641_p5, %p9638_p4 }
  0xf7   :  { %9646 = shalt.err (!%p9643_p6)
}
  0xf8   :  { %s9647_s18 = scalar_lea.vmem %s328_s15, 16  ;;  %s9651_s3 = scalar_lea.vmem %s328_s15, 32 }
  0xf9   :  { %p9648_p7 = scmp.ne.s32.totalorder %s328_s15, %s9647_s18  ;;  %p9652_p8 = scmp.lt.s32.totalorder %s328_s15, %s328_s15 }
  0xfa   :  { %p9653_p9 = scmp.lt.s32.totalorder %s9651_s3, %s9647_s18 }
  0xfc   :  { %p9654_p10 = por %p9653_p9, %p9652_p8 }
  0xfe   :  { %p9655_p11 = pnand %p9654_p10, %p9648_p7 }
 0x100   :  { %9658 = shalt.err (!%p9655_p11)
}
 0x101   :  { %330 = dma.hbm_to_vmem [thread:$0]  %s11016_s4, 16, %s328_s15, [#allocation19]  }
 0x102   :  { %s9659_s30 = scalar_lea.hbm %s11026_s24, 512 }
 0x103   :  { %p9660_p12 = scmp.ne.s32.totalorder %s11026_s24, %s9659_s30  ;;  %p9663_p13 = scmp.lt.u32.totalorder %s9659_s30, %s11026_s24 }
 0x105   :  { %p9665_p0 = pnand %p9663_p13, %p9660_p12 }
 0x107   :  { %9668 = shalt.err (!%p9665_p0)
}
 0x108   :  { %s9669_s22 = scalar_lea.vmem %s11315_s16, 512  ;;  %p9674_p2 = scmp.lt.s32.totalorder %s11315_s16, %s11315_s16 }
 0x109   :  { %p9670_p1 = scmp.ne.s32.totalorder %s11315_s16, %s9669_s22  ;;  %p9675_p3 = scmp.lt.s32.totalorder %s9669_s22, %s9669_s22 }
 0x10b   :  { %p9676_p4 = por %p9675_p3, %p9674_p2 }
 0x10d   :  { %p9677_p5 = pnand %p9676_p4, %p9670_p1 }
 0x10f   :  { %9680 = shalt.err (!%p9677_p5)
}
 0x110   :  { %354 = dma.hbm_to_vmem [thread:$0]  %s11026_s24, 512, %s11315_s16, [#allocation22], %s10831_s2, %s10831_s2, %s10832_s21  }
 0x111   :  { %s10835_s4 = smov [#allocation24]   ;;  %s10836_s0 = smov [#allocation27]  }
 0x112   :  { %s373_s26 = sshll.u32 %s10835_s4, 4  ;;  %s393_s12 = sshll.u32 %s10836_s0, 4  ;;  %s374_s26 = int_to_ptr.vmem [resolvable:$true] %s373_s26  ;;  %s394_s12 = int_to_ptr.vmem [resolvable:$true] %s393_s12 }
 0x113   :  { %s9681_s1 = scalar_lea.hbm %s11036_s5, 16 }
 0x114   :  { %p9682_p6 = scmp.ne.s32.totalorder %s11036_s5, %s9681_s1  ;;  %p9685_p7 = scmp.lt.u32.totalorder %s9681_s1, %s11036_s5 }
 0x116   :  { %p9687_p8 = pnand %p9685_p7, %p9682_p6 }
 0x118   :  { %9690 = shalt.err (!%p9687_p8)
}
 0x119   :  { %s9691_s6 = scalar_lea.vmem %s374_s26, 16  ;;  %s9695_s14 = scalar_lea.vmem %s374_s26, 32 }
 0x11a   :  { %p9692_p9 = scmp.ne.s32.totalorder %s374_s26, %s9691_s6  ;;  %p9696_p10 = scmp.lt.s32.totalorder %s374_s26, %s374_s26 }
 0x11b   :  { %p9697_p11 = scmp.lt.s32.totalorder %s9695_s14, %s9691_s6 }
 0x11d   :  { %p9698_p12 = por %p9697_p11, %p9696_p10 }
 0x11f   :  { %p9699_p13 = pnand %p9698_p12, %p9692_p9 }
 0x121   :  { %9702 = shalt.err (!%p9699_p13)
}
 0x122   :  { %376 = dma.hbm_to_vmem [thread:$0]  %s11036_s5, 16, %s374_s26, [#allocation25]  }
 0x123   :  { %s9703_s24 = scalar_lea.hbm %s11046_s9, 16 }
 0x124   :  { %p9704_p0 = scmp.ne.s32.totalorder %s11046_s9, %s9703_s24  ;;  %p9707_p1 = scmp.lt.u32.totalorder %s9703_s24, %s11046_s9 }
 0x126   :  { %p9709_p2 = pnand %p9707_p1, %p9704_p0 }
 0x128   :  { %9712 = shalt.err (!%p9709_p2)
}
 0x129   :  { %s9713_s10 = scalar_lea.vmem %s394_s12, 16  ;;  %s9717_s15 = scalar_lea.vmem %s394_s12, 32 }
 0x12a   :  { %p9714_p3 = scmp.ne.s32.totalorder %s394_s12, %s9713_s10  ;;  %p9718_p4 = scmp.lt.s32.totalorder %s394_s12, %s394_s12 }
 0x12b   :  { %p9719_p5 = scmp.lt.s32.totalorder %s9717_s15, %s9713_s10 }
 0x12d   :  { %p9720_p6 = por %p9719_p5, %p9718_p4 }
 0x12f   :  { %p9721_p7 = pnand %p9720_p6, %p9714_p3 }
 0x131   :  { %9724 = shalt.err (!%p9721_p7)
}
 0x132   :  { %396 = dma.hbm_to_vmem [thread:$0]  %s11046_s9, 16, %s394_s12, [#allocation28]  }
 0x133   :  { %s10837_s11 = smov [#allocation30]   ;;  %s10838_s16 = smov [#allocation33]  }
 0x134   :  { %s415_s5 = sshll.u32 %s10837_s11, 4  ;;  %s438_s27 = sshll.u32 %s10838_s16, 4  ;;  %s416_s5 = int_to_ptr.vmem [resolvable:$true] %s415_s5  ;;  %s11341_s27 = int_to_ptr.vmem [resolvable:$true] %s438_s27 }
 0x135   :  { %s9725_s18 = scalar_lea.hbm %s11061_s25, 16 }
 0x136   :  { %p9726_p8 = scmp.ne.s32.totalorder %s11061_s25, %s9725_s18  ;;  %p9729_p9 = scmp.lt.u32.totalorder %s9725_s18, %s11061_s25 }
 0x138   :  { %p9731_p10 = pnand %p9729_p9, %p9726_p8 }
 0x13a   :  { %9734 = shalt.err (!%p9731_p10)
}
 0x13b   :  { %s9735_s3 = scalar_lea.vmem %s416_s5, 16  ;;  %s9739_s30 = scalar_lea.vmem %s416_s5, 32 }
 0x13c   :  { %p9736_p11 = scmp.ne.s32.totalorder %s416_s5, %s9735_s3  ;;  %p9740_p12 = scmp.lt.s32.totalorder %s416_s5, %s416_s5 }
 0x13d   :  { %p9741_p13 = scmp.lt.s32.totalorder %s9739_s30, %s9735_s3 }
 0x13f   :  { %p9742_p0 = por %p9741_p13, %p9740_p12 }
 0x141   :  { %p9743_p1 = pnand %p9742_p0, %p9736_p11 }
 0x143   :  { %9746 = shalt.err (!%p9743_p1)
}
 0x144   :  { %418 = dma.hbm_to_vmem [thread:$0]  %s11061_s25, 16, %s416_s5, [#allocation31]  }
 0x145   :  { %s9747_s9 = scalar_lea.hbm %s11074_s13, 512 }
 0x146   :  { %p9748_p2 = scmp.ne.s32.totalorder %s11074_s13, %s9747_s9  ;;  %p9751_p3 = scmp.lt.u32.totalorder %s9747_s9, %s11074_s13 }
 0x148   :  { %p9753_p4 = pnand %p9751_p3, %p9748_p2 }
 0x14a   :  { %9756 = shalt.err (!%p9753_p4)
}
 0x14b   :  { %s9757_s22 = scalar_lea.vmem %s11341_s27, 512  ;;  %p9762_p6 = scmp.lt.s32.totalorder %s11341_s27, %s11341_s27 }
 0x14c   :  { %p9758_p5 = scmp.ne.s32.totalorder %s11341_s27, %s9757_s22  ;;  %p9763_p7 = scmp.lt.s32.totalorder %s9757_s22, %s9757_s22 }
 0x14e   :  { %p9764_p8 = por %p9763_p7, %p9762_p6 }
 0x150   :  { %p9765_p9 = pnand %p9764_p8, %p9758_p5 }
 0x152   :  { %9768 = shalt.err (!%p9765_p9)
}
 0x153   :  { %444 = dma.hbm_to_vmem [thread:$0]  %s11074_s13, 512, %s11341_s27, [#allocation34], %s10831_s2, %s10831_s2, %s10832_s21  }
 0x154   :  { %s10839_s25 = smov [#allocation36]   ;;  %s10840_s26 = smov [#allocation39]  }
 0x155   :  { %s465_s4 = sshll.u32 %s10839_s25, 4  ;;  %s485_s0 = sshll.u32 %s10840_s26, 4  ;;  %s466_s4 = int_to_ptr.vmem [resolvable:$true] %s465_s4  ;;  %s486_s0 = int_to_ptr.vmem [resolvable:$true] %s485_s0 }
 0x156   :  { %s9769_s12 = scalar_lea.hbm %s11094_s20, 16 }
 0x157   :  { %p9770_p10 = scmp.ne.s32.totalorder %s11094_s20, %s9769_s12  ;;  %p9773_p11 = scmp.lt.u32.totalorder %s9769_s12, %s11094_s20 }
 0x159   :  { %p9775_p12 = pnand %p9773_p11, %p9770_p10 }
 0x15b   :  { %9778 = shalt.err (!%p9775_p12)
}
 0x15c   :  { %s9779_s1 = scalar_lea.vmem %s466_s4, 16  ;;  %s9783_s6 = scalar_lea.vmem %s466_s4, 32 }
 0x15d   :  { %p9780_p13 = scmp.ne.s32.totalorder %s466_s4, %s9779_s1  ;;  %p9784_p0 = scmp.lt.s32.totalorder %s466_s4, %s466_s4 }
 0x15e   :  { %p9785_p1 = scmp.lt.s32.totalorder %s9783_s6, %s9779_s1 }
 0x160   :  { %p9786_p2 = por %p9785_p1, %p9784_p0 }
 0x162   :  { %p9787_p3 = pnand %p9786_p2, %p9780_p13 }
 0x164   :  { %9790 = shalt.err (!%p9787_p3)
}
 0x165   :  { %468 = dma.hbm_to_vmem [thread:$0]  %s11094_s20, 16, %s466_s4, [#allocation37]  }
 0x166   :  { %s9791_s13 = scalar_lea.hbm %s11104_s23, 128 }
 0x167   :  { %p9792_p4 = scmp.ne.s32.totalorder %s11104_s23, %s9791_s13  ;;  %p9795_p5 = scmp.lt.u32.totalorder %s9791_s13, %s11104_s23 }
 0x169   :  { %p9797_p6 = pnand %p9795_p5, %p9792_p4 }
 0x16b   :  { %9800 = shalt.err (!%p9797_p6)
}
 0x16c   :  { %s9801_s14 = scalar_lea.vmem %s486_s0, 128  ;;  %p9806_p8 = scmp.lt.s32.totalorder %s486_s0, %s486_s0 }
 0x16d   :  { %p9802_p7 = scmp.ne.s32.totalorder %s486_s0, %s9801_s14  ;;  %p9807_p9 = scmp.lt.s32.totalorder %s9801_s14, %s9801_s14 }
 0x16f   :  { %p9808_p10 = por %p9807_p9, %p9806_p8 }
 0x171   :  { %p9809_p11 = pnand %p9808_p10, %p9802_p7 }
 0x173   :  { %9812 = shalt.err (!%p9809_p11)
}
 0x174   :  { %488 = dma.hbm_to_vmem [thread:$0]  %s11104_s23, 128, %s486_s0, [#allocation40]  }
 0x175   :  { %s10841_s24 = smov [#allocation42]   ;;  %s10842_s20 = smov [#allocation45]  }
 0x176   :  { %s505_s10 = sshll.u32 %s10841_s24, 4  ;;  %s526_s15 = sshll.u32 %s10842_s20, 4  ;;  %s506_s10 = int_to_ptr.vmem [resolvable:$true] %s505_s10  ;;  %s11367_s15 = int_to_ptr.vmem [resolvable:$true] %s526_s15 }
 0x177   :  { %s9813_s11 = scalar_lea.hbm %s11114_s7, 16 }
 0x178   :  { %p9814_p12 = scmp.ne.s32.totalorder %s11114_s7, %s9813_s11  ;;  %p9817_p13 = scmp.lt.u32.totalorder %s9813_s11, %s11114_s7 }
 0x17a   :  { %p9819_p0 = pnand %p9817_p13, %p9814_p12 }
 0x17c   :  { %9822 = shalt.err (!%p9819_p0)
}
 0x17d   :  { %s9823_s5 = scalar_lea.vmem %s506_s10, 16  ;;  %s9827_s16 = scalar_lea.vmem %s506_s10, 32 }
 0x17e   :  { %p9824_p1 = scmp.ne.s32.totalorder %s506_s10, %s9823_s5  ;;  %p9828_p2 = scmp.lt.s32.totalorder %s506_s10, %s506_s10 }
 0x17f   :  { %p9829_p3 = scmp.lt.s32.totalorder %s9827_s16, %s9823_s5 }
 0x181   :  { %p9830_p4 = por %p9829_p3, %p9828_p2 }
 0x183   :  { %p9831_p5 = pnand %p9830_p4, %p9824_p1 }
 0x185   :  { %9834 = shalt.err (!%p9831_p5)
}
 0x186   :  { %s12388_s23 = sld [smem:[#allocation143_spill]] }
 0x187   :  { %508 = dma.hbm_to_vmem [thread:$0]  %s11114_s7, 16, %s506_s10, [#allocation43]  }
 0x18c   :  { %s9835_s27 = scalar_lea.hbm %s12388_s23, 512 }
 0x18d   :  { %p9836_p6 = scmp.ne.s32.totalorder %s12388_s23, %s9835_s27  ;;  %p9839_p7 = scmp.lt.u32.totalorder %s9835_s27, %s12388_s23 }
 0x18f   :  { %p9841_p8 = pnand %p9839_p7, %p9836_p6 }
 0x191   :  { %9844 = shalt.err (!%p9841_p8)
}
 0x192   :  { %s9845_s18 = scalar_lea.vmem %s11367_s15, 512  ;;  %p9850_p10 = scmp.lt.s32.totalorder %s11367_s15, %s11367_s15 }
 0x193   :  { %p9846_p9 = scmp.ne.s32.totalorder %s11367_s15, %s9845_s18  ;;  %p9851_p11 = scmp.lt.s32.totalorder %s9845_s18, %s9845_s18 }
 0x195   :  { %p9852_p12 = por %p9851_p11, %p9850_p10 }
 0x197   :  { %p9853_p13 = pnand %p9852_p12, %p9846_p9 }
 0x199   :  { %9856 = shalt.err (!%p9853_p13)
}
 0x19a   :  { %s12389_s7 = sld [smem:[#allocation146_spill]]  ;;  %s10843_s3 = smov [#allocation48]  }
 0x19b   :  { %532 = dma.hbm_to_vmem [thread:$0]  %s12388_s23, 512, %s11367_s15, [#allocation46], %s10831_s2, %s10831_s2, %s10832_s21  }
 0x19c   :  { %s553_s30 = sshll.u32 %s10843_s3, 4  ;;  %s10844_s9 = smov [#allocation51]   ;;  %s554_s30 = int_to_ptr.vmem [resolvable:$true] %s553_s30 }
 0x19d   :  { %s572_s22 = sshll.u32 %s10844_s9, 4  ;;  %s11385_s22 = int_to_ptr.vmem [resolvable:$true] %s572_s22 }
 0x1a0   :  { %s9857_s25 = scalar_lea.hbm %s12389_s7, 16 }
 0x1a1   :  { %p9858_p0 = scmp.ne.s32.totalorder %s12389_s7, %s9857_s25  ;;  %p9861_p1 = scmp.lt.u32.totalorder %s9857_s25, %s12389_s7 }
 0x1a3   :  { %p9863_p2 = pnand %p9861_p1, %p9858_p0 }
 0x1a5   :  { %9866 = shalt.err (!%p9863_p2)
}
 0x1a6   :  { %s9867_s4 = scalar_lea.vmem %s554_s30, 16  ;;  %s9871_s26 = scalar_lea.vmem %s554_s30, 32 }
 0x1a7   :  { %p9868_p3 = scmp.ne.s32.totalorder %s554_s30, %s9867_s4  ;;  %p9872_p4 = scmp.lt.s32.totalorder %s554_s30, %s554_s30 }
 0x1a8   :  { %p9873_p5 = scmp.lt.s32.totalorder %s9871_s26, %s9867_s4 }
 0x1aa   :  { %p9874_p6 = por %p9873_p5, %p9872_p4 }
 0x1ac   :  { %p9875_p7 = pnand %p9874_p6, %p9868_p3 }
 0x1ae   :  { %9878 = shalt.err (!%p9875_p7)
}
 0x1af   :  { %s12390_s0 = sld [smem:[#allocation148_spill]] }
 0x1b0   :  { %556 = dma.hbm_to_vmem [thread:$0]  %s12389_s7, 16, %s554_s30, [#allocation49]  }
 0x1b5   :  { %s9879_s12 = scalar_lea.hbm %s12390_s0, 512 }
 0x1b6   :  { %p9880_p8 = scmp.ne.s32.totalorder %s12390_s0, %s9879_s12  ;;  %p9883_p9 = scmp.lt.u32.totalorder %s9879_s12, %s12390_s0 }
 0x1b8   :  { %p9885_p10 = pnand %p9883_p9, %p9880_p8 }
 0x1ba   :  { %9888 = shalt.err (!%p9885_p10)
}
 0x1bb   :  { %s9889_s1 = scalar_lea.vmem %s11385_s22, 512  ;;  %p9894_p12 = scmp.lt.s32.totalorder %s11385_s22, %s11385_s22 }
 0x1bc   :  { %p9890_p11 = scmp.ne.s32.totalorder %s11385_s22, %s9889_s1  ;;  %p9895_p13 = scmp.lt.s32.totalorder %s9889_s1, %s9889_s1 }
 0x1be   :  { %p9896_p0 = por %p9895_p13, %p9894_p12 }
 0x1c0   :  { %p9897_p1 = pnand %p9896_p0, %p9890_p11 }
 0x1c2   :  { %9900 = shalt.err (!%p9897_p1)
}
 0x1c3   :  { %s12391_s6 = sld [smem:[#allocation150_spill]]  ;;  %s10845_s13 = smov [#allocation54]  }
 0x1c4   :  { %578 = dma.hbm_to_vmem [thread:$0]  %s12390_s0, 512, %s11385_s22, [#allocation52], %s10831_s2, %s10831_s2, %s10832_s21  }
 0x1c5   :  { %s596_s14 = sshll.u32 %s10845_s13, 4  ;;  %s10846_s24 = smov [#allocation57]   ;;  %s597_s14 = int_to_ptr.vmem [resolvable:$true] %s596_s14 }
 0x1c6   :  { %s619_s10 = sshll.u32 %s10846_s24, 4  ;;  %s620_s10 = int_to_ptr.vmem [resolvable:$true] %s619_s10 }
 0x1c9   :  { %s9901_s20 = scalar_lea.hbm %s12391_s6, 512 }
 0x1ca   :  { %p9902_p2 = scmp.ne.s32.totalorder %s12391_s6, %s9901_s20  ;;  %p9905_p3 = scmp.lt.u32.totalorder %s9901_s20, %s12391_s6 }
 0x1cc   :  { %p9907_p4 = pnand %p9905_p3, %p9902_p2 }
 0x1ce   :  { %9910 = shalt.err (!%p9907_p4)
}
 0x1cf   :  { %s9911_s15 = scalar_lea.vmem %s597_s14, 512  ;;  %p9916_p6 = scmp.lt.s32.totalorder %s597_s14, %s597_s14 }
 0x1d0   :  { %p9912_p5 = scmp.ne.s32.totalorder %s597_s14, %s9911_s15  ;;  %p9917_p7 = scmp.lt.s32.totalorder %s9911_s15, %s9911_s15 }
 0x1d2   :  { %p9918_p8 = por %p9917_p7, %p9916_p6 }
 0x1d4   :  { %p9919_p9 = pnand %p9918_p8, %p9912_p5 }
 0x1d6   :  { %9922 = shalt.err (!%p9919_p9)
}
 0x1d7   :  { %s12392_s11 = sld [smem:[#allocation152_spill]] }
 0x1d8   :  { %602 = dma.hbm_to_vmem [thread:$0]  %s12391_s6, 512, %s597_s14, [#allocation55], %s10831_s2, %s10831_s2, %s10832_s21  }
 0x1dd   :  { %s9923_s5 = scalar_lea.hbm %s12392_s11, 16 }
 0x1de   :  { %p9924_p10 = scmp.ne.s32.totalorder %s12392_s11, %s9923_s5  ;;  %p9927_p11 = scmp.lt.u32.totalorder %s9923_s5, %s12392_s11 }
 0x1e0   :  { %p9929_p12 = pnand %p9927_p11, %p9924_p10 }
 0x1e2   :  { %9932 = shalt.err (!%p9929_p12)
}
 0x1e3   :  { %s9933_s16 = scalar_lea.vmem %s620_s10, 16  ;;  %s9937_s23 = scalar_lea.vmem %s620_s10, 32 }
 0x1e4   :  { %p9934_p13 = scmp.ne.s32.totalorder %s620_s10, %s9933_s16  ;;  %p9938_p0 = scmp.lt.s32.totalorder %s620_s10, %s620_s10 }
 0x1e5   :  { %p9939_p1 = scmp.lt.s32.totalorder %s9937_s23, %s9933_s16 }
 0x1e7   :  { %p9940_p2 = por %p9939_p1, %p9938_p0 }
 0x1e9   :  { %p9941_p3 = pnand %p9940_p2, %p9934_p13 }
 0x1eb   :  { %9944 = shalt.err (!%p9941_p3)
}
 0x1ec   :  { %s12393_s27 = sld [smem:[#allocation155_spill]]  ;;  %s10847_s18 = smov [#allocation60]  }
 0x1ed   :  { %622 = dma.hbm_to_vmem [thread:$0]  %s12392_s11, 16, %s620_s10, [#allocation58]  }
 0x1ee   :  { %s642_s7 = sshll.u32 %s10847_s18, 4  ;;  %s10848_s3 = smov [#allocation63]   ;;  %s643_s7 = int_to_ptr.vmem [resolvable:$true] %s642_s7 }
 0x1ef   :  { %s667_s30 = sshll.u32 %s10848_s3, 4  ;;  %s668_s30 = int_to_ptr.vmem [resolvable:$true] %s667_s30 }
 0x1f2   :  { %s9945_s9 = scalar_lea.hbm %s12393_s27, 512 }
 0x1f3   :  { %p9946_p4 = scmp.ne.s32.totalorder %s12393_s27, %s9945_s9  ;;  %p9949_p5 = scmp.lt.u32.totalorder %s9945_s9, %s12393_s27 }
 0x1f5   :  { %p9951_p6 = pnand %p9949_p5, %p9946_p4 }
 0x1f7   :  { %9954 = shalt.err (!%p9951_p6)
}
 0x1f8   :  { %s9955_s22 = scalar_lea.vmem %s643_s7, 512  ;;  %p9960_p8 = scmp.lt.s32.totalorder %s643_s7, %s643_s7 }
 0x1f9   :  { %p9956_p7 = scmp.ne.s32.totalorder %s643_s7, %s9955_s22  ;;  %p9961_p9 = scmp.lt.s32.totalorder %s9955_s22, %s9955_s22 }
 0x1fb   :  { %p9962_p10 = por %p9961_p9, %p9960_p8 }
 0x1fd   :  { %p9963_p11 = pnand %p9962_p10, %p9956_p7 }
 0x1ff   :  { %9966 = shalt.err (!%p9963_p11)
}
 0x200   :  { %s12394_s25 = sld [smem:[#allocation157_spill]] }
 0x201   :  { %648 = dma.hbm_to_vmem [thread:$0]  %s12393_s27, 512, %s643_s7, [#allocation61], %s10831_s2, %s10831_s2, %s10832_s21  }
 0x206   :  { %s9967_s4 = scalar_lea.hbm %s12394_s25, 16 }
 0x207   :  { %p9968_p12 = scmp.ne.s32.totalorder %s12394_s25, %s9967_s4  ;;  %p9971_p13 = scmp.lt.u32.totalorder %s9967_s4, %s12394_s25 }
 0x209   :  { %p9973_p0 = pnand %p9971_p13, %p9968_p12 }
 0x20b   :  { %9976 = shalt.err (!%p9973_p0)
}
 0x20c   :  { %s9977_s26 = scalar_lea.vmem %s668_s30, 16  ;;  %s9981_s0 = scalar_lea.vmem %s668_s30, 32 }
 0x20d   :  { %p9978_p1 = scmp.ne.s32.totalorder %s668_s30, %s9977_s26  ;;  %p9982_p2 = scmp.lt.s32.totalorder %s668_s30, %s668_s30 }
 0x20e   :  { %p9983_p3 = scmp.lt.s32.totalorder %s9981_s0, %s9977_s26 }
 0x210   :  { %p9984_p4 = por %p9983_p3, %p9982_p2 }
 0x212   :  { %p9985_p5 = pnand %p9984_p4, %p9978_p1 }
 0x214   :  { %9988 = shalt.err (!%p9985_p5)
}
 0x215   :  { %s12395_s12 = sld [smem:[#allocation159_spill]]  ;;  %s10849_s1 = smov [#allocation66]  }
 0x216   :  { %670 = dma.hbm_to_vmem [thread:$0]  %s12394_s25, 16, %s668_s30, [#allocation64]  }
 0x217   :  { %s686_s6 = sshll.u32 %s10849_s1, 4  ;;  %s10850_s13 = smov [#allocation69]   ;;  %s687_s6 = int_to_ptr.vmem [resolvable:$true] %s686_s6 }
 0x218   :  { %s713_s14 = sshll.u32 %s10850_s13, 4  ;;  %s714_s14 = int_to_ptr.vmem [resolvable:$true] %s713_s14 }
 0x21b   :  { %s9989_s24 = scalar_lea.hbm %s12395_s12, 512 }
 0x21c   :  { %p9990_p6 = scmp.ne.s32.totalorder %s12395_s12, %s9989_s24  ;;  %p9993_p7 = scmp.lt.u32.totalorder %s9989_s24, %s12395_s12 }
 0x21e   :  { %p9995_p8 = pnand %p9993_p7, %p9990_p6 }
 0x220   :  { %9998 = shalt.err (!%p9995_p8)
}
 0x221   :  { %s9999_s10 = scalar_lea.vmem %s687_s6, 512  ;;  %p10004_p10 = scmp.lt.s32.totalorder %s687_s6, %s687_s6 }
 0x222   :  { %p10000_p9 = scmp.ne.s32.totalorder %s687_s6, %s9999_s10  ;;  %p10005_p11 = scmp.lt.s32.totalorder %s9999_s10, %s9999_s10 }
 0x224   :  { %p10006_p12 = por %p10005_p11, %p10004_p10 }
 0x226   :  { %p10007_p13 = pnand %p10006_p12, %p10000_p9 }
 0x228   :  { %10010 = shalt.err (!%p10007_p13)
}
 0x229   :  { %s12396_s20 = sld [smem:[#allocation162_spill]] }
 0x22a   :  { %692 = dma.hbm_to_vmem [thread:$0]  %s12395_s12, 512, %s687_s6, [#allocation67], %s10831_s2, %s10831_s2, %s10832_s21  }
 0x22f   :  { %s10011_s15 = scalar_lea.hbm %s12396_s20, 16 }
 0x230   :  { %p10012_p0 = scmp.ne.s32.totalorder %s12396_s20, %s10011_s15  ;;  %p10015_p1 = scmp.lt.u32.totalorder %s10011_s15, %s12396_s20 }
 0x232   :  { %p10017_p2 = pnand %p10015_p1, %p10012_p0 }
 0x234   :  { %10020 = shalt.err (!%p10017_p2)
}
 0x235   :  { %s10021_s11 = scalar_lea.vmem %s714_s14, 16  ;;  %s10025_s5 = scalar_lea.vmem %s714_s14, 32 }
 0x236   :  { %p10022_p3 = scmp.ne.s32.totalorder %s714_s14, %s10021_s11  ;;  %p10026_p4 = scmp.lt.s32.totalorder %s714_s14, %s714_s14 }
 0x237   :  { %p10027_p5 = scmp.lt.s32.totalorder %s10025_s5, %s10021_s11 }
 0x239   :  { %p10028_p6 = por %p10027_p5, %p10026_p4 }
 0x23b   :  { %p10029_p7 = pnand %p10028_p6, %p10022_p3 }
 0x23d   :  { %10032 = shalt.err (!%p10029_p7)
}
 0x23e   :  { %s12397_s16 = sld [smem:[#allocation164_spill]]  ;;  %s10851_s23 = smov [#allocation72]  }
 0x23f   :  { %716 = dma.hbm_to_vmem [thread:$0]  %s12396_s20, 16, %s714_s14, [#allocation70]  }
 0x240   :  { %s733_s27 = sshll.u32 %s10851_s23, 4  ;;  %s10852_s18 = smov [#allocation75]   ;;  %s734_s27 = int_to_ptr.vmem [resolvable:$true] %s733_s27 }
 0x241   :  { %s755_s7 = sshll.u32 %s10852_s18, 4  ;;  %s756_s7 = int_to_ptr.vmem [resolvable:$true] %s755_s7 }
 0x244   :  { %s10033_s3 = scalar_lea.hbm %s12397_s16, 16 }
 0x245   :  { %p10034_p8 = scmp.ne.s32.totalorder %s12397_s16, %s10033_s3  ;;  %p10037_p9 = scmp.lt.u32.totalorder %s10033_s3, %s12397_s16 }
 0x247   :  { %p10039_p10 = pnand %p10037_p9, %p10034_p8 }
 0x249   :  { %10042 = shalt.err (!%p10039_p10)
}
 0x24a   :  { %s10043_s30 = scalar_lea.vmem %s734_s27, 16  ;;  %s10047_s9 = scalar_lea.vmem %s734_s27, 32 }
 0x24b   :  { %p10044_p11 = scmp.ne.s32.totalorder %s734_s27, %s10043_s30  ;;  %p10048_p12 = scmp.lt.s32.totalorder %s734_s27, %s734_s27 }
 0x24c   :  { %p10049_p13 = scmp.lt.s32.totalorder %s10047_s9, %s10043_s30 }
 0x24e   :  { %p10050_p0 = por %p10049_p13, %p10048_p12 }
 0x250   :  { %p10051_p1 = pnand %p10050_p0, %p10044_p11 }
 0x252   :  { %10054 = shalt.err (!%p10051_p1)
}
 0x253   :  { %s12398_s22 = sld [smem:[#allocation166_spill]] }
 0x254   :  { %736 = dma.hbm_to_vmem [thread:$0]  %s12397_s16, 16, %s734_s27, [#allocation73]  }
 0x259   :  { %s10055_s25 = scalar_lea.hbm %s12398_s22, 16 }
 0x25a   :  { %p10056_p2 = scmp.ne.s32.totalorder %s12398_s22, %s10055_s25  ;;  %p10059_p3 = scmp.lt.u32.totalorder %s10055_s25, %s12398_s22 }
 0x25c   :  { %p10061_p4 = pnand %p10059_p3, %p10056_p2 }
 0x25e   :  { %10064 = shalt.err (!%p10061_p4)
}
 0x25f   :  { %s10065_s4 = scalar_lea.vmem %s756_s7, 16  ;;  %s10069_s26 = scalar_lea.vmem %s756_s7, 32 }
 0x260   :  { %p10066_p5 = scmp.ne.s32.totalorder %s756_s7, %s10065_s4  ;;  %p10070_p6 = scmp.lt.s32.totalorder %s756_s7, %s756_s7 }
 0x261   :  { %p10071_p7 = scmp.lt.s32.totalorder %s10069_s26, %s10065_s4 }
 0x263   :  { %p10072_p8 = por %p10071_p7, %p10070_p6 }
 0x265   :  { %p10073_p9 = pnand %p10072_p8, %p10066_p5 }
 0x267   :  { %10076 = shalt.err (!%p10073_p9)
}
 0x268   :  { %s12399_s0 = sld [smem:[#allocation169_spill]]  ;;  %s10853_s12 = smov [#allocation78]  }
 0x269   :  { %758 = dma.hbm_to_vmem [thread:$0]  %s12398_s22, 16, %s756_s7, [#allocation76]  }
 0x26a   :  { %s778_s1 = sshll.u32 %s10853_s12, 4  ;;  %s10854_s6 = smov [#allocation4]   ;;  %s779_s1 = int_to_ptr.vmem [resolvable:$true] %s778_s1 }
 0x26b   :  { %s215_s13 = sshll.u32 %s10854_s6, 4  ;;  %s216_s13 = int_to_ptr.vmem [resolvable:$true] %s215_s13 }
 0x26e   :  { %s10077_s14 = scalar_lea.hbm %s12399_s0, 512 }
 0x26f   :  { %p10078_p10 = scmp.ne.s32.totalorder %s12399_s0, %s10077_s14  ;;  %p10081_p11 = scmp.lt.u32.totalorder %s10077_s14, %s12399_s0 }
 0x271   :  { %p10083_p12 = pnand %p10081_p11, %p10078_p10 }
 0x273   :  { %10086 = shalt.err (!%p10083_p12)
}
 0x274   :  { %s10087_s24 = scalar_lea.vmem %s779_s1, 512  ;;  %p10092_p0 = scmp.lt.s32.totalorder %s779_s1, %s779_s1 }
 0x275   :  { %p10088_p13 = scmp.ne.s32.totalorder %s779_s1, %s10087_s24  ;;  %p10093_p1 = scmp.lt.s32.totalorder %s10087_s24, %s10087_s24 }
 0x277   :  { %p10094_p2 = por %p10093_p1, %p10092_p0 }
 0x279   :  { %p10095_p3 = pnand %p10094_p2, %p10088_p13 }
 0x27b   :  { %10098 = shalt.err (!%p10095_p3)
}
 0x27c   :  { %s12400_s10 = sld [smem:[#allocation116_spill]] }
 0x27d   :  { %784 = dma.hbm_to_vmem [thread:$0]  %s12399_s0, 512, %s779_s1, [#allocation79], %s10831_s2, %s10831_s2, %s10832_s21  }
 0x282   :  { %s10099_s20 = scalar_lea.hbm %s12400_s10, 128 }
 0x283   :  { %p10100_p4 = scmp.ne.s32.totalorder %s12400_s10, %s10099_s20  ;;  %p10103_p5 = scmp.lt.u32.totalorder %s10099_s20, %s12400_s10 }
 0x285   :  { %p10105_p6 = pnand %p10103_p5, %p10100_p4 }
 0x287   :  { %10108 = shalt.err (!%p10105_p6)
}
 0x288   :  { %s10109_s15 = scalar_lea.vmem %s216_s13, 128  ;;  %p10114_p8 = scmp.lt.s32.totalorder %s216_s13, %s216_s13 }
 0x289   :  { %p10110_p7 = scmp.ne.s32.totalorder %s216_s13, %s10109_s15  ;;  %p10115_p9 = scmp.lt.s32.totalorder %s10109_s15, %s10109_s15 }
 0x28b   :  { %p10116_p10 = por %p10115_p9, %p10114_p8 }
 0x28d   :  { %p10117_p11 = pnand %p10116_p10, %p10110_p7 }
 0x28f   :  { %10120 = shalt.err (!%p10117_p11)
}
 0x290   :  { %s12401_s11 = sld [smem:[#allocation117_spill]]  ;;  %s10855_s5 = smov [#allocation8]  }
 0x291   :  { %218 = dma.hbm_to_vmem [thread:$0]  %s12400_s10, 128, %s216_s13, [#allocation5]  }
 0x292   :  { %s235_s16 = sshll.u32 %s10855_s5, 4  ;;  %s10856_s23 = smov [#allocation11]   ;;  %s236_s16 = int_to_ptr.vmem [resolvable:$true] %s235_s16 }
 0x293   :  { %s263_s27 = sshll.u32 %s10856_s23, 4  ;;  %s264_s27 = int_to_ptr.vmem [resolvable:$true] %s263_s27 }
 0x296   :  { %s10121_s18 = scalar_lea.hbm %s12401_s11, 16 }
 0x297   :  { %p10122_p12 = scmp.ne.s32.totalorder %s12401_s11, %s10121_s18  ;;  %p10125_p13 = scmp.lt.u32.totalorder %s10121_s18, %s12401_s11 }
 0x299   :  { %p10127_p0 = pnand %p10125_p13, %p10122_p12 }
 0x29b   :  { %10130 = shalt.err (!%p10127_p0)
}
 0x29c   :  { %s10131_s7 = scalar_lea.vmem %s236_s16, 16  ;;  %s10135_s3 = scalar_lea.vmem %s236_s16, 32 }
 0x29d   :  { %p10132_p1 = scmp.ne.s32.totalorder %s236_s16, %s10131_s7  ;;  %p10136_p2 = scmp.lt.s32.totalorder %s236_s16, %s236_s16 }
 0x29e   :  { %p10137_p3 = scmp.lt.s32.totalorder %s10135_s3, %s10131_s7 }
 0x2a0   :  { %p10138_p4 = por %p10137_p3, %p10136_p2 }
 0x2a2   :  { %p10139_p5 = pnand %p10138_p4, %p10132_p1 }
 0x2a4   :  { %10142 = shalt.err (!%p10139_p5)
}
 0x2a5   :  { %s12402_s30 = sld [smem:[#allocation122_spill]] }
 0x2a6   :  { %238 = dma.hbm_to_vmem [thread:$0]  %s12401_s11, 16, %s236_s16, [#allocation7]  }
 0x2ab   :  { %s10143_s9 = scalar_lea.hbm %s12402_s30, 16 }
 0x2ac   :  { %p10144_p6 = scmp.ne.s32.totalorder %s12402_s30, %s10143_s9  ;;  %p10147_p7 = scmp.lt.u32.totalorder %s10143_s9, %s12402_s30 }
 0x2ae   :  { %p10149_p8 = pnand %p10147_p7, %p10144_p6 }
 0x2b0   :  { %10152 = shalt.err (!%p10149_p8)
}
 0x2b1   :  { %s10153_s22 = scalar_lea.vmem %s264_s27, 16  ;;  %s10157_s25 = scalar_lea.vmem %s264_s27, 32 }
 0x2b2   :  { %p10154_p9 = scmp.ne.s32.totalorder %s264_s27, %s10153_s22  ;;  %p10158_p10 = scmp.lt.s32.totalorder %s264_s27, %s264_s27 }
 0x2b3   :  { %p10159_p11 = scmp.lt.s32.totalorder %s10157_s25, %s10153_s22 }
 0x2b5   :  { %p10160_p12 = por %p10159_p11, %p10158_p10 }
 0x2b7   :  { %p10161_p13 = pnand %p10160_p12, %p10154_p9 }
 0x2b9   :  { %10164 = shalt.err (!%p10161_p13)
}
 0x2ba   :  { %s12403_s4 = sld [smem:[#allocation126_spill]]  ;;  %s10857_s26 = smov [#allocation14]  }
 0x2bb   :  { %266 = dma.hbm_to_vmem [thread:$0]  %s12402_s30, 16, %s264_s27, [#allocation10]  }
 0x2bc   :  { %s289_s0 = sshll.u32 %s10857_s26, 4  ;;  %s10858_s12 = smov [#allocation17]   ;;  %s290_s0 = int_to_ptr.vmem [resolvable:$true] %s289_s0 }
 0x2bd   :  { %s317_s1 = sshll.u32 %s10858_s12, 4  ;;  %s318_s1 = int_to_ptr.vmem [resolvable:$true] %s317_s1 }
 0x2c0   :  { %s10165_s6 = scalar_lea.hbm %s12403_s4, 16 }
 0x2c1   :  { %p10166_p0 = scmp.ne.s32.totalorder %s12403_s4, %s10165_s6  ;;  %p10169_p1 = scmp.lt.u32.totalorder %s10165_s6, %s12403_s4 }
 0x2c3   :  { %p10171_p2 = pnand %p10169_p1, %p10166_p0 }
 0x2c5   :  { %10174 = shalt.err (!%p10171_p2)
}
 0x2c6   :  { %s10175_s13 = scalar_lea.vmem %s290_s0, 16  ;;  %s10179_s14 = scalar_lea.vmem %s290_s0, 32 }
 0x2c7   :  { %p10176_p3 = scmp.ne.s32.totalorder %s290_s0, %s10175_s13  ;;  %p10180_p4 = scmp.lt.s32.totalorder %s290_s0, %s290_s0 }
 0x2c8   :  { %p10181_p5 = scmp.lt.s32.totalorder %s10179_s14, %s10175_s13 }
 0x2ca   :  { %p10182_p6 = por %p10181_p5, %p10180_p4 }
 0x2cc   :  { %p10183_p7 = pnand %p10182_p6, %p10176_p3 }
 0x2ce   :  { %10186 = shalt.err (!%p10183_p7)
}
 0x2cf   :  { %s12404_s24 = sld [smem:[#allocation130_spill]] }
 0x2d0   :  { %292 = dma.hbm_to_vmem [thread:$0]  %s12403_s4, 16, %s290_s0, [#allocation13]  }
 0x2d5   :  { %s10187_s10 = scalar_lea.hbm %s12404_s24, 16 }
 0x2d6   :  { %p10188_p8 = scmp.ne.s32.totalorder %s12404_s24, %s10187_s10  ;;  %p10191_p9 = scmp.lt.u32.totalorder %s10187_s10, %s12404_s24 }
 0x2d8   :  { %p10193_p10 = pnand %p10191_p9, %p10188_p8 }
 0x2da   :  { %10196 = shalt.err (!%p10193_p10)
}
 0x2db   :  { %s10197_s20 = scalar_lea.vmem %s318_s1, 16  ;;  %s10201_s15 = scalar_lea.vmem %s318_s1, 32 }
 0x2dc   :  { %p10198_p11 = scmp.ne.s32.totalorder %s318_s1, %s10197_s20  ;;  %p10202_p12 = scmp.lt.s32.totalorder %s318_s1, %s318_s1 }
 0x2dd   :  { %p10203_p13 = scmp.lt.s32.totalorder %s10201_s15, %s10197_s20 }
 0x2df   :  { %p10204_p0 = por %p10203_p13, %p10202_p12 }
 0x2e1   :  { %p10205_p1 = pnand %p10204_p0, %p10198_p11 }
 0x2e3   :  { %10208 = shalt.err (!%p10205_p1)
}
 0x2e4   :  { %s12405_s11 = sld [smem:[#allocation131_spill]]  ;;  %s10859_s5 = smov [#allocation20]  }
 0x2e5   :  { %320 = dma.hbm_to_vmem [thread:$0]  %s12404_s24, 16, %s318_s1, [#allocation16]  }
 0x2e6   :  { %s336_s16 = sshll.u32 %s10859_s5, 4  ;;  %s10860_s23 = smov [#allocation23]   ;;  %s337_s16 = int_to_ptr.vmem [resolvable:$true] %s336_s16 }
 0x2e7   :  { %s360_s27 = sshll.u32 %s10860_s23, 4  ;;  %s11471_s27 = int_to_ptr.vmem [resolvable:$true] %s360_s27 }
 0x2ea   :  { %s10209_s18 = scalar_lea.hbm %s12405_s11, 512 }
 0x2eb   :  { %p10210_p2 = scmp.ne.s32.totalorder %s12405_s11, %s10209_s18  ;;  %p10213_p3 = scmp.lt.u32.totalorder %s10209_s18, %s12405_s11 }
 0x2ed   :  { %p10215_p4 = pnand %p10213_p3, %p10210_p2 }
 0x2ef   :  { %10218 = shalt.err (!%p10215_p4)
}
 0x2f0   :  { %s10219_s7 = scalar_lea.vmem %s337_s16, 512  ;;  %p10224_p6 = scmp.lt.s32.totalorder %s337_s16, %s337_s16 }
 0x2f1   :  { %p10220_p5 = scmp.ne.s32.totalorder %s337_s16, %s10219_s7  ;;  %p10225_p7 = scmp.lt.s32.totalorder %s10219_s7, %s10219_s7 }
 0x2f3   :  { %p10226_p8 = por %p10225_p7, %p10224_p6 }
 0x2f5   :  { %p10227_p9 = pnand %p10226_p8, %p10220_p5 }
 0x2f7   :  { %10230 = shalt.err (!%p10227_p9)
}
 0x2f8   :  { %s12406_s3 = sld [smem:[#allocation132_spill]] }
 0x2f9   :  { %342 = dma.hbm_to_vmem [thread:$0]  %s12405_s11, 512, %s337_s16, [#allocation19], %s10831_s2, %s10831_s2, %s10832_s21  }
 0x2fe   :  { %s10231_s30 = scalar_lea.hbm %s12406_s3, 512 }
 0x2ff   :  { %p10232_p10 = scmp.ne.s32.totalorder %s12406_s3, %s10231_s30  ;;  %p10235_p11 = scmp.lt.u32.totalorder %s10231_s30, %s12406_s3 }
 0x301   :  { %p10237_p12 = pnand %p10235_p11, %p10232_p10 }
 0x303   :  { %10240 = shalt.err (!%p10237_p12)
}
 0x304   :  { %s10241_s9 = scalar_lea.vmem %s11471_s27, 512  ;;  %p10246_p0 = scmp.lt.s32.totalorder %s11471_s27, %s11471_s27 }
 0x305   :  { %p10242_p13 = scmp.ne.s32.totalorder %s11471_s27, %s10241_s9  ;;  %p10247_p1 = scmp.lt.s32.totalorder %s10241_s9, %s10241_s9 }
 0x307   :  { %p10248_p2 = por %p10247_p1, %p10246_p0 }
 0x309   :  { %p10249_p3 = pnand %p10248_p2, %p10242_p13 }
 0x30b   :  { %10252 = shalt.err (!%p10249_p3)
}
 0x30c   :  { %s12407_s22 = sld [smem:[#allocation133_spill]]  ;;  %s10861_s25 = smov [#allocation26]  }
 0x30d   :  { %366 = dma.hbm_to_vmem [thread:$0]  %s12406_s3, 512, %s11471_s27, [#allocation22], %s10831_s2, %s10831_s2, %s10832_s21  }
 0x30e   :  { %s383_s4 = sshll.u32 %s10861_s25, 4  ;;  %s10862_s26 = smov [#allocation29]   ;;  %s384_s4 = int_to_ptr.vmem [resolvable:$true] %s383_s4 }
 0x30f   :  { %s405_s0 = sshll.u32 %s10862_s26, 4  ;;  %s406_s0 = int_to_ptr.vmem [resolvable:$true] %s405_s0 }
 0x312   :  { %s10253_s12 = scalar_lea.hbm %s12407_s22, 16 }
 0x313   :  { %p10254_p4 = scmp.ne.s32.totalorder %s12407_s22, %s10253_s12  ;;  %p10257_p5 = scmp.lt.u32.totalorder %s10253_s12, %s12407_s22 }
 0x315   :  { %p10259_p6 = pnand %p10257_p5, %p10254_p4 }
 0x317   :  { %10262 = shalt.err (!%p10259_p6)
}
 0x318   :  { %s10263_s1 = scalar_lea.vmem %s384_s4, 16  ;;  %s10267_s6 = scalar_lea.vmem %s384_s4, 32 }
 0x319   :  { %p10264_p7 = scmp.ne.s32.totalorder %s384_s4, %s10263_s1  ;;  %p10268_p8 = scmp.lt.s32.totalorder %s384_s4, %s384_s4 }
 0x31a   :  { %p10269_p9 = scmp.lt.s32.totalorder %s10267_s6, %s10263_s1 }
 0x31c   :  { %p10270_p10 = por %p10269_p9, %p10268_p8 }
 0x31e   :  { %p10271_p11 = pnand %p10270_p10, %p10264_p7 }
 0x320   :  { %10274 = shalt.err (!%p10271_p11)
}
 0x321   :  { %s12408_s13 = sld [smem:[#allocation135_spill]] }
 0x322   :  { %386 = dma.hbm_to_vmem [thread:$0]  %s12407_s22, 16, %s384_s4, [#allocation25]  }
 0x327   :  { %s10275_s14 = scalar_lea.hbm %s12408_s13, 16 }
 0x328   :  { %p10276_p12 = scmp.ne.s32.totalorder %s12408_s13, %s10275_s14  ;;  %p10279_p13 = scmp.lt.u32.totalorder %s10275_s14, %s12408_s13 }
 0x32a   :  { %p10281_p0 = pnand %p10279_p13, %p10276_p12 }
 0x32c   :  { %10284 = shalt.err (!%p10281_p0)
}
 0x32d   :  { %s10285_s24 = scalar_lea.vmem %s406_s0, 16  ;;  %s10289_s10 = scalar_lea.vmem %s406_s0, 32 }
 0x32e   :  { %p10286_p1 = scmp.ne.s32.totalorder %s406_s0, %s10285_s24  ;;  %p10290_p2 = scmp.lt.s32.totalorder %s406_s0, %s406_s0 }
 0x32f   :  { %p10291_p3 = scmp.lt.s32.totalorder %s10289_s10, %s10285_s24 }
 0x331   :  { %p10292_p4 = por %p10291_p3, %p10290_p2 }
 0x333   :  { %p10293_p5 = pnand %p10292_p4, %p10286_p1 }
 0x335   :  { %10296 = shalt.err (!%p10293_p5)
}
 0x336   :  { %s12409_s20 = sld [smem:[#allocation136_spill]]  ;;  %s10863_s15 = smov [#allocation32]  }
 0x337   :  { %408 = dma.hbm_to_vmem [thread:$0]  %s12408_s13, 16, %s406_s0, [#allocation28]  }
 0x338   :  { %s426_s11 = sshll.u32 %s10863_s15, 4  ;;  %s10864_s5 = smov [#allocation35]   ;;  %s427_s11 = int_to_ptr.vmem [resolvable:$true] %s426_s11 }
 0x339   :  { %s455_s16 = sshll.u32 %s10864_s5, 4  ;;  %s456_s16 = int_to_ptr.vmem [resolvable:$true] %s455_s16 }
 0x33c   :  { %s10297_s23 = scalar_lea.hbm %s12409_s20, 512 }
 0x33d   :  { %p10298_p6 = scmp.ne.s32.totalorder %s12409_s20, %s10297_s23  ;;  %p10301_p7 = scmp.lt.u32.totalorder %s10297_s23, %s12409_s20 }
 0x33f   :  { %p10303_p8 = pnand %p10301_p7, %p10298_p6 }
 0x341   :  { %10306 = shalt.err (!%p10303_p8)
}
 0x342   :  { %s10307_s27 = scalar_lea.vmem %s427_s11, 512  ;;  %p10312_p10 = scmp.lt.s32.totalorder %s427_s11, %s427_s11 }
 0x343   :  { %p10308_p9 = scmp.ne.s32.totalorder %s427_s11, %s10307_s27  ;;  %p10313_p11 = scmp.lt.s32.totalorder %s10307_s27, %s10307_s27 }
 0x345   :  { %p10314_p12 = por %p10313_p11, %p10312_p10 }
 0x347   :  { %p10315_p13 = pnand %p10314_p12, %p10308_p9 }
 0x349   :  { %10318 = shalt.err (!%p10315_p13)
}
 0x34a   :  { %s12410_s18 = sld [smem:[#allocation139_spill]] }
 0x34b   :  { %432 = dma.hbm_to_vmem [thread:$0]  %s12409_s20, 512, %s427_s11, [#allocation31], %s10831_s2, %s10831_s2, %s10832_s21  }
 0x350   :  { %s10319_s7 = scalar_lea.hbm %s12410_s18, 16 }
 0x351   :  { %p10320_p0 = scmp.ne.s32.totalorder %s12410_s18, %s10319_s7  ;;  %p10323_p1 = scmp.lt.u32.totalorder %s10319_s7, %s12410_s18 }
 0x353   :  { %p10325_p2 = pnand %p10323_p1, %p10320_p0 }
 0x355   :  { %10328 = shalt.err (!%p10325_p2)
}
 0x356   :  { %s10329_s3 = scalar_lea.vmem %s456_s16, 16  ;;  %s10333_s30 = scalar_lea.vmem %s456_s16, 32 }
 0x357   :  { %p10330_p3 = scmp.ne.s32.totalorder %s456_s16, %s10329_s3  ;;  %p10334_p4 = scmp.lt.s32.totalorder %s456_s16, %s456_s16 }
 0x358   :  { %p10335_p5 = scmp.lt.s32.totalorder %s10333_s30, %s10329_s3 }
 0x35a   :  { %p10336_p6 = por %p10335_p5, %p10334_p4 }
 0x35c   :  { %p10337_p7 = pnand %p10336_p6, %p10330_p3 }
 0x35e   :  { %10340 = shalt.err (!%p10337_p7)
}
 0x35f   :  { %s12411_s9 = sld [smem:[#allocation140_spill]]  ;;  %s10865_s22 = smov [#allocation38]  }
 0x360   :  { %458 = dma.hbm_to_vmem [thread:$0]  %s12410_s18, 16, %s456_s16, [#allocation34]  }
 0x361   :  { %s475_s25 = sshll.u32 %s10865_s22, 4  ;;  %s10866_s4 = smov [#allocation41]   ;;  %s476_s25 = int_to_ptr.vmem [resolvable:$true] %s475_s25 }
 0x362   :  { %s495_s26 = sshll.u32 %s10866_s4, 4  ;;  %s496_s26 = int_to_ptr.vmem [resolvable:$true] %s495_s26 }
 0x365   :  { %s10341_s0 = scalar_lea.hbm %s12411_s9, 128 }
 0x366   :  { %p10342_p8 = scmp.ne.s32.totalorder %s12411_s9, %s10341_s0  ;;  %p10345_p9 = scmp.lt.u32.totalorder %s10341_s0, %s12411_s9 }
 0x368   :  { %p10347_p10 = pnand %p10345_p9, %p10342_p8 }
 0x36a   :  { %10350 = shalt.err (!%p10347_p10)
}
 0x36b   :  { %s10351_s12 = scalar_lea.vmem %s476_s25, 128  ;;  %p10356_p12 = scmp.lt.s32.totalorder %s476_s25, %s476_s25 }
 0x36c   :  { %p10352_p11 = scmp.ne.s32.totalorder %s476_s25, %s10351_s12  ;;  %p10357_p13 = scmp.lt.s32.totalorder %s10351_s12, %s10351_s12 }
 0x36e   :  { %p10358_p0 = por %p10357_p13, %p10356_p12 }
 0x370   :  { %p10359_p1 = pnand %p10358_p0, %p10352_p11 }
 0x372   :  { %10362 = shalt.err (!%p10359_p1)
}
 0x373   :  { %s12412_s1 = sld [smem:[#allocation141_spill]] }
 0x374   :  { %478 = dma.hbm_to_vmem [thread:$0]  %s12411_s9, 128, %s476_s25, [#allocation37]  }
 0x379   :  { %s10363_s6 = scalar_lea.hbm %s12412_s1, 16 }
 0x37a   :  { %p10364_p2 = scmp.ne.s32.totalorder %s12412_s1, %s10363_s6  ;;  %p10367_p3 = scmp.lt.u32.totalorder %s10363_s6, %s12412_s1 }
 0x37c   :  { %p10369_p4 = pnand %p10367_p3, %p10364_p2 }
 0x37e   :  { %10372 = shalt.err (!%p10369_p4)
}
 0x37f   :  { %s10373_s13 = scalar_lea.vmem %s496_s26, 16  ;;  %s10377_s14 = scalar_lea.vmem %s496_s26, 32 }
 0x380   :  { %p10374_p5 = scmp.ne.s32.totalorder %s496_s26, %s10373_s13  ;;  %p10378_p6 = scmp.lt.s32.totalorder %s496_s26, %s496_s26 }
 0x381   :  { %p10379_p7 = scmp.lt.s32.totalorder %s10377_s14, %s10373_s13 }
 0x383   :  { %p10380_p8 = por %p10379_p7, %p10378_p6 }
 0x385   :  { %p10381_p9 = pnand %p10380_p8, %p10374_p5 }
 0x387   :  { %10384 = shalt.err (!%p10381_p9)
}
 0x388   :  { %s12413_s24 = sld [smem:[#allocation142_spill]]  ;;  %s10867_s10 = smov [#allocation44]  }
 0x389   :  { %498 = dma.hbm_to_vmem [thread:$0]  %s12412_s1, 16, %s496_s26, [#allocation40]  }
 0x38a   :  { %s514_s20 = sshll.u32 %s10867_s10, 4  ;;  %s10868_s15 = smov [#allocation47]   ;;  %s515_s20 = int_to_ptr.vmem [resolvable:$true] %s514_s20 }
 0x38b   :  { %s540_s11 = sshll.u32 %s10868_s15, 4  ;;  %s11519_s11 = int_to_ptr.vmem [resolvable:$true] %s540_s11 }
 0x38e   :  { %s10385_s5 = scalar_lea.hbm %s12413_s24, 512 }
 0x38f   :  { %p10386_p10 = scmp.ne.s32.totalorder %s12413_s24, %s10385_s5  ;;  %p10389_p11 = scmp.lt.u32.totalorder %s10385_s5, %s12413_s24 }
 0x391   :  { %p10391_p12 = pnand %p10389_p11, %p10386_p10 }
 0x393   :  { %10394 = shalt.err (!%p10391_p12)
}
 0x394   :  { %s10395_s16 = scalar_lea.vmem %s515_s20, 512  ;;  %p10400_p0 = scmp.lt.s32.totalorder %s515_s20, %s515_s20 }
 0x395   :  { %p10396_p13 = scmp.ne.s32.totalorder %s515_s20, %s10395_s16  ;;  %p10401_p1 = scmp.lt.s32.totalorder %s10395_s16, %s10395_s16 }
 0x397   :  { %p10402_p2 = por %p10401_p1, %p10400_p0 }
 0x399   :  { %p10403_p3 = pnand %p10402_p2, %p10396_p13 }
 0x39b   :  { %10406 = shalt.err (!%p10403_p3)
}
 0x39c   :  { %s12414_s23 = sld [smem:[#allocation145_spill]] }
 0x39d   :  { %520 = dma.hbm_to_vmem [thread:$0]  %s12413_s24, 512, %s515_s20, [#allocation43], %s10831_s2, %s10831_s2, %s10832_s21  }
 0x3a2   :  { %s10407_s27 = scalar_lea.hbm %s12414_s23, 512 }
 0x3a3   :  { %p10408_p4 = scmp.ne.s32.totalorder %s12414_s23, %s10407_s27  ;;  %p10411_p5 = scmp.lt.u32.totalorder %s10407_s27, %s12414_s23 }
 0x3a5   :  { %p10413_p6 = pnand %p10411_p5, %p10408_p4 }
 0x3a7   :  { %10416 = shalt.err (!%p10413_p6)
}
 0x3a8   :  { %s10417_s18 = scalar_lea.vmem %s11519_s11, 512  ;;  %p10422_p8 = scmp.lt.s32.totalorder %s11519_s11, %s11519_s11 }
 0x3a9   :  { %p10418_p7 = scmp.ne.s32.totalorder %s11519_s11, %s10417_s18  ;;  %p10423_p9 = scmp.lt.s32.totalorder %s10417_s18, %s10417_s18 }
 0x3ab   :  { %p10424_p10 = por %p10423_p9, %p10422_p8 }
 0x3ad   :  { %p10425_p11 = pnand %p10424_p10, %p10418_p7 }
 0x3af   :  { %10428 = shalt.err (!%p10425_p11)
}
 0x3b0   :  { %s12415_s7 = sld [smem:[#allocation147_spill]]  ;;  %s10869_s3 = smov [#allocation50]  }
 0x3b1   :  { %546 = dma.hbm_to_vmem [thread:$0]  %s12414_s23, 512, %s11519_s11, [#allocation46], %s10831_s2, %s10831_s2, %s10832_s21  }
 0x3b2   :  { %s563_s30 = sshll.u32 %s10869_s3, 4  ;;  %s10870_s9 = smov [#allocation53]   ;;  %s564_s30 = int_to_ptr.vmem [resolvable:$true] %s563_s30 }
 0x3b3   :  { %s584_s22 = sshll.u32 %s10870_s9, 4  ;;  %s11540_s22 = int_to_ptr.vmem [resolvable:$true] %s584_s22 }
 0x3b6   :  { %s10429_s25 = scalar_lea.hbm %s12415_s7, 16 }
 0x3b7   :  { %p10430_p12 = scmp.ne.s32.totalorder %s12415_s7, %s10429_s25  ;;  %p10433_p13 = scmp.lt.u32.totalorder %s10429_s25, %s12415_s7 }
 0x3b9   :  { %p10435_p0 = pnand %p10433_p13, %p10430_p12 }
 0x3bb   :  { %10438 = shalt.err (!%p10435_p0)
}
 0x3bc   :  { %s10439_s4 = scalar_lea.vmem %s564_s30, 16  ;;  %s10443_s26 = scalar_lea.vmem %s564_s30, 32 }
 0x3bd   :  { %p10440_p1 = scmp.ne.s32.totalorder %s564_s30, %s10439_s4  ;;  %p10444_p2 = scmp.lt.s32.totalorder %s564_s30, %s564_s30 }
 0x3be   :  { %p10445_p3 = scmp.lt.s32.totalorder %s10443_s26, %s10439_s4 }
 0x3c0   :  { %p10446_p4 = por %p10445_p3, %p10444_p2 }
 0x3c2   :  { %p10447_p5 = pnand %p10446_p4, %p10440_p1 }
 0x3c4   :  { %10450 = shalt.err (!%p10447_p5)
}
 0x3c5   :  { %s12416_s0 = sld [smem:[#allocation149_spill]] }
 0x3c6   :  { %566 = dma.hbm_to_vmem [thread:$0]  %s12415_s7, 16, %s564_s30, [#allocation49]  }
 0x3cb   :  { %s10451_s12 = scalar_lea.hbm %s12416_s0, 512 }
 0x3cc   :  { %p10452_p6 = scmp.ne.s32.totalorder %s12416_s0, %s10451_s12  ;;  %p10455_p7 = scmp.lt.u32.totalorder %s10451_s12, %s12416_s0 }
 0x3ce   :  { %p10457_p8 = pnand %p10455_p7, %p10452_p6 }
 0x3d0   :  { %10460 = shalt.err (!%p10457_p8)
}
 0x3d1   :  { %s10461_s1 = scalar_lea.vmem %s11540_s22, 512  ;;  %p10466_p10 = scmp.lt.s32.totalorder %s11540_s22, %s11540_s22 }
 0x3d2   :  { %p10462_p9 = scmp.ne.s32.totalorder %s11540_s22, %s10461_s1  ;;  %p10467_p11 = scmp.lt.s32.totalorder %s10461_s1, %s10461_s1 }
 0x3d4   :  { %p10468_p12 = por %p10467_p11, %p10466_p10 }
 0x3d6   :  { %p10469_p13 = pnand %p10468_p12, %p10462_p9 }
 0x3d8   :  { %10472 = shalt.err (!%p10469_p13)
}
 0x3d9   :  { %s12417_s6 = sld [smem:[#allocation151_spill]]  ;;  %s10871_s13 = smov [#allocation56]  }
 0x3da   :  { %590 = dma.hbm_to_vmem [thread:$0]  %s12416_s0, 512, %s11540_s22, [#allocation52], %s10831_s2, %s10831_s2, %s10832_s21  }
 0x3db   :  { %s609_s14 = sshll.u32 %s10871_s13, 4  ;;  %s10872_s24 = smov [#allocation59]   ;;  %s610_s14 = int_to_ptr.vmem [resolvable:$true] %s609_s14 }
 0x3dc   :  { %s630_s10 = sshll.u32 %s10872_s24, 4  ;;  %s11558_s10 = int_to_ptr.vmem [resolvable:$true] %s630_s10 }
 0x3df   :  { %s10473_s20 = scalar_lea.hbm %s12417_s6, 16 }
 0x3e0   :  { %p10474_p0 = scmp.ne.s32.totalorder %s12417_s6, %s10473_s20  ;;  %p10477_p1 = scmp.lt.u32.totalorder %s10473_s20, %s12417_s6 }
 0x3e2   :  { %p10479_p2 = pnand %p10477_p1, %p10474_p0 }
 0x3e4   :  { %10482 = shalt.err (!%p10479_p2)
}
 0x3e5   :  { %s10483_s15 = scalar_lea.vmem %s610_s14, 16  ;;  %s10487_s11 = scalar_lea.vmem %s610_s14, 32 }
 0x3e6   :  { %p10484_p3 = scmp.ne.s32.totalorder %s610_s14, %s10483_s15  ;;  %p10488_p4 = scmp.lt.s32.totalorder %s610_s14, %s610_s14 }
 0x3e7   :  { %p10489_p5 = scmp.lt.s32.totalorder %s10487_s11, %s10483_s15 }
 0x3e9   :  { %p10490_p6 = por %p10489_p5, %p10488_p4 }
 0x3eb   :  { %p10491_p7 = pnand %p10490_p6, %p10484_p3 }
 0x3ed   :  { %10494 = shalt.err (!%p10491_p7)
}
 0x3ee   :  { %s12418_s5 = sld [smem:[#allocation154_spill]] }
 0x3ef   :  { %612 = dma.hbm_to_vmem [thread:$0]  %s12417_s6, 16, %s610_s14, [#allocation55]  }
 0x3f4   :  { %s10495_s16 = scalar_lea.hbm %s12418_s5, 512 }
 0x3f5   :  { %p10496_p8 = scmp.ne.s32.totalorder %s12418_s5, %s10495_s16  ;;  %p10499_p9 = scmp.lt.u32.totalorder %s10495_s16, %s12418_s5 }
 0x3f7   :  { %p10501_p10 = pnand %p10499_p9, %p10496_p8 }
 0x3f9   :  { %10504 = shalt.err (!%p10501_p10)
}
 0x3fa   :  { %s10505_s23 = scalar_lea.vmem %s11558_s10, 512  ;;  %p10510_p12 = scmp.lt.s32.totalorder %s11558_s10, %s11558_s10 }
 0x3fb   :  { %p10506_p11 = scmp.ne.s32.totalorder %s11558_s10, %s10505_s23  ;;  %p10511_p13 = scmp.lt.s32.totalorder %s10505_s23, %s10505_s23 }
 0x3fd   :  { %p10512_p0 = por %p10511_p13, %p10510_p12 }
 0x3ff   :  { %p10513_p1 = pnand %p10512_p0, %p10506_p11 }
 0x401   :  { %10516 = shalt.err (!%p10513_p1)
}
 0x402   :  { %s12419_s27 = sld [smem:[#allocation156_spill]]  ;;  %s10873_s18 = smov [#allocation62]  }
 0x403   :  { %636 = dma.hbm_to_vmem [thread:$0]  %s12418_s5, 512, %s11558_s10, [#allocation58], %s10831_s2, %s10831_s2, %s10832_s21  }
 0x404   :  { %s654_s7 = sshll.u32 %s10873_s18, 4  ;;  %s10874_s3 = smov [#allocation65]   ;;  %s655_s7 = int_to_ptr.vmem [resolvable:$true] %s654_s7 }
 0x405   :  { %s677_s30 = sshll.u32 %s10874_s3, 4  ;;  %s678_s30 = int_to_ptr.vmem [resolvable:$true] %s677_s30 }
 0x408   :  { %s10517_s9 = scalar_lea.hbm %s12419_s27, 512 }
 0x409   :  { %p10518_p2 = scmp.ne.s32.totalorder %s12419_s27, %s10517_s9  ;;  %p10521_p3 = scmp.lt.u32.totalorder %s10517_s9, %s12419_s27 }
 0x40b   :  { %p10523_p4 = pnand %p10521_p3, %p10518_p2 }
 0x40d   :  { %10526 = shalt.err (!%p10523_p4)
}
 0x40e   :  { %s10527_s22 = scalar_lea.vmem %s655_s7, 512  ;;  %p10532_p6 = scmp.lt.s32.totalorder %s655_s7, %s655_s7 }
 0x40f   :  { %p10528_p5 = scmp.ne.s32.totalorder %s655_s7, %s10527_s22  ;;  %p10533_p7 = scmp.lt.s32.totalorder %s10527_s22, %s10527_s22 }
 0x411   :  { %p10534_p8 = por %p10533_p7, %p10532_p6 }
 0x413   :  { %p10535_p9 = pnand %p10534_p8, %p10528_p5 }
 0x415   :  { %10538 = shalt.err (!%p10535_p9)
}
 0x416   :  { %s12420_s25 = sld [smem:[#allocation158_spill]] }
 0x417   :  { %660 = dma.hbm_to_vmem [thread:$0]  %s12419_s27, 512, %s655_s7, [#allocation61], %s10831_s2, %s10831_s2, %s10832_s21  }
 0x41c   :  { %s10539_s4 = scalar_lea.hbm %s12420_s25, 16 }
 0x41d   :  { %p10540_p10 = scmp.ne.s32.totalorder %s12420_s25, %s10539_s4  ;;  %p10543_p11 = scmp.lt.u32.totalorder %s10539_s4, %s12420_s25 }
 0x41f   :  { %p10545_p12 = pnand %p10543_p11, %p10540_p10 }
 0x421   :  { %10548 = shalt.err (!%p10545_p12)
}
 0x422   :  { %s10549_s26 = scalar_lea.vmem %s678_s30, 16  ;;  %s10553_s0 = scalar_lea.vmem %s678_s30, 32 }
 0x423   :  { %p10550_p13 = scmp.ne.s32.totalorder %s678_s30, %s10549_s26  ;;  %p10554_p0 = scmp.lt.s32.totalorder %s678_s30, %s678_s30 }
 0x424   :  { %p10555_p1 = scmp.lt.s32.totalorder %s10553_s0, %s10549_s26 }
 0x426   :  { %p10556_p2 = por %p10555_p1, %p10554_p0 }
 0x428   :  { %p10557_p3 = pnand %p10556_p2, %p10550_p13 }
 0x42a   :  { %10560 = shalt.err (!%p10557_p3)
}
 0x42b   :  { %s12421_s12 = sld [smem:[#allocation161_spill]]  ;;  %s10875_s1 = smov [#allocation68]  }
 0x42c   :  { %680 = dma.hbm_to_vmem [thread:$0]  %s12420_s25, 16, %s678_s30, [#allocation64]  }
 0x42d   :  { %s700_s6 = sshll.u32 %s10875_s1, 4  ;;  %s10876_s13 = smov [#allocation71]   ;;  %s701_s6 = int_to_ptr.vmem [resolvable:$true] %s700_s6 }
 0x42e   :  { %s723_s14 = sshll.u32 %s10876_s13, 4  ;;  %s724_s14 = int_to_ptr.vmem [resolvable:$true] %s723_s14 }
 0x431   :  { %s10561_s24 = scalar_lea.hbm %s12421_s12, 512 }
 0x432   :  { %p10562_p4 = scmp.ne.s32.totalorder %s12421_s12, %s10561_s24  ;;  %p10565_p5 = scmp.lt.u32.totalorder %s10561_s24, %s12421_s12 }
 0x434   :  { %p10567_p6 = pnand %p10565_p5, %p10562_p4 }
 0x436   :  { %10570 = shalt.err (!%p10567_p6)
}
 0x437   :  { %s10571_s10 = scalar_lea.vmem %s701_s6, 512  ;;  %p10576_p8 = scmp.lt.s32.totalorder %s701_s6, %s701_s6 }
 0x438   :  { %p10572_p7 = scmp.ne.s32.totalorder %s701_s6, %s10571_s10  ;;  %p10577_p9 = scmp.lt.s32.totalorder %s10571_s10, %s10571_s10 }
 0x43a   :  { %p10578_p10 = por %p10577_p9, %p10576_p8 }
 0x43c   :  { %p10579_p11 = pnand %p10578_p10, %p10572_p7 }
 0x43e   :  { %10582 = shalt.err (!%p10579_p11)
}
 0x43f   :  { %s12422_s20 = sld [smem:[#allocation163_spill]] }
 0x440   :  { %706 = dma.hbm_to_vmem [thread:$0]  %s12421_s12, 512, %s701_s6, [#allocation67], %s10831_s2, %s10831_s2, %s10832_s21  }
 0x445   :  { %s10583_s15 = scalar_lea.hbm %s12422_s20, 16 }
 0x446   :  { %p10584_p12 = scmp.ne.s32.totalorder %s12422_s20, %s10583_s15  ;;  %p10587_p13 = scmp.lt.u32.totalorder %s10583_s15, %s12422_s20 }
 0x448   :  { %p10589_p0 = pnand %p10587_p13, %p10584_p12 }
 0x44a   :  { %10592 = shalt.err (!%p10589_p0)
}
 0x44b   :  { %s10593_s11 = scalar_lea.vmem %s724_s14, 16  ;;  %s10597_s5 = scalar_lea.vmem %s724_s14, 32 }
 0x44c   :  { %p10594_p1 = scmp.ne.s32.totalorder %s724_s14, %s10593_s11  ;;  %p10598_p2 = scmp.lt.s32.totalorder %s724_s14, %s724_s14 }
 0x44d   :  { %p10599_p3 = scmp.lt.s32.totalorder %s10597_s5, %s10593_s11 }
 0x44f   :  { %p10600_p4 = por %p10599_p3, %p10598_p2 }
 0x451   :  { %p10601_p5 = pnand %p10600_p4, %p10594_p1 }
 0x453   :  { %10604 = shalt.err (!%p10601_p5)
}
 0x454   :  { %s12423_s16 = sld [smem:[#allocation165_spill]]  ;;  %s10877_s23 = smov [#allocation74]  }
 0x455   :  { %726 = dma.hbm_to_vmem [thread:$0]  %s12422_s20, 16, %s724_s14, [#allocation70]  }
 0x456   :  { %s742_s27 = sshll.u32 %s10877_s23, 4  ;;  %s10878_s18 = smov [#allocation77]   ;;  %s743_s27 = int_to_ptr.vmem [resolvable:$true] %s742_s27 }
 0x457   :  { %s765_s7 = sshll.u32 %s10878_s18, 4  ;;  %s766_s7 = int_to_ptr.vmem [resolvable:$true] %s765_s7 }
 0x45a   :  { %s10605_s3 = scalar_lea.hbm %s12423_s16, 512 }
 0x45b   :  { %p10606_p6 = scmp.ne.s32.totalorder %s12423_s16, %s10605_s3  ;;  %p10609_p7 = scmp.lt.u32.totalorder %s10605_s3, %s12423_s16 }
 0x45d   :  { %p10611_p8 = pnand %p10609_p7, %p10606_p6 }
 0x45f   :  { %10614 = shalt.err (!%p10611_p8)
}
 0x460   :  { %s10615_s30 = scalar_lea.vmem %s743_s27, 512  ;;  %p10620_p10 = scmp.lt.s32.totalorder %s743_s27, %s743_s27 }
 0x461   :  { %p10616_p9 = scmp.ne.s32.totalorder %s743_s27, %s10615_s30  ;;  %p10621_p11 = scmp.lt.s32.totalorder %s10615_s30, %s10615_s30 }
 0x463   :  { %p10622_p12 = por %p10621_p11, %p10620_p10 }
 0x465   :  { %p10623_p13 = pnand %p10622_p12, %p10616_p9 }
 0x467   :  { %10626 = shalt.err (!%p10623_p13)
}
 0x468   :  { %s12424_s9 = sld [smem:[#allocation167_spill]] }
 0x469   :  { %748 = dma.hbm_to_vmem [thread:$0]  %s12423_s16, 512, %s743_s27, [#allocation73], %s10831_s2, %s10831_s2, %s10832_s21  }
 0x46e   :  { %s10627_s22 = scalar_lea.hbm %s12424_s9, 16 }
 0x46f   :  { %p10628_p0 = scmp.ne.s32.totalorder %s12424_s9, %s10627_s22  ;;  %p10631_p1 = scmp.lt.u32.totalorder %s10627_s22, %s12424_s9 }
 0x471   :  { %p10633_p2 = pnand %p10631_p1, %p10628_p0 }
 0x473   :  { %10636 = shalt.err (!%p10633_p2)
}
 0x474   :  { %s10637_s25 = scalar_lea.vmem %s766_s7, 16  ;;  %s10641_s4 = scalar_lea.vmem %s766_s7, 32 }
 0x475   :  { %p10638_p3 = scmp.ne.s32.totalorder %s766_s7, %s10637_s25  ;;  %p10642_p4 = scmp.lt.s32.totalorder %s766_s7, %s766_s7 }
 0x476   :  { %p10643_p5 = scmp.lt.s32.totalorder %s10641_s4, %s10637_s25 }
 0x478   :  { %p10644_p6 = por %p10643_p5, %p10642_p4 }
 0x47a   :  { %p10645_p7 = pnand %p10644_p6, %p10638_p3 }
 0x47c   :  { %10648 = shalt.err (!%p10645_p7)
}
 0x47d   :  { %768 = dma.hbm_to_vmem [thread:$0]  %s12424_s9, 16, %s766_s7, [#allocation76]  }
 0x47e   :  { %s10879_s26 = smov [#allocation80]   ;;  %s10880_s12 = smov [#allocation81]  }
 0x47f   :  { %s790_s0 = sshll.u32 %s10879_s26, 4  ;;  %s807_s1 = sshll.u32 %s10880_s12, 4  ;;  %s791_s0 = int_to_ptr.vmem [resolvable:$true] %s790_s0  ;;  %s808_s1 = int_to_ptr.vmem [resolvable:$true] %s807_s1 }
 0x480   :  { %s10649_s6 = scalar_lea.hbm %s11262_s29, 512 }
 0x481   :  { %p10650_p8 = scmp.ne.s32.totalorder %s11262_s29, %s10649_s6  ;;  %p10653_p9 = scmp.lt.u32.totalorder %s10649_s6, %s11262_s29 }
 0x483   :  { %p10655_p10 = pnand %p10653_p9, %p10650_p8 }
 0x485   :  { %10658 = shalt.err (!%p10655_p10)
}
 0x486   :  { %s10659_s13 = scalar_lea.vmem %s791_s0, 512  ;;  %p10664_p12 = scmp.lt.s32.totalorder %s791_s0, %s791_s0 }
 0x487   :  { %p10660_p11 = scmp.ne.s32.totalorder %s791_s0, %s10659_s13  ;;  %p10665_p13 = scmp.lt.s32.totalorder %s10659_s13, %s10659_s13 }
 0x489   :  { %p10666_p0 = por %p10665_p13, %p10664_p12 }
 0x48b   :  { %p10667_p1 = pnand %p10666_p0, %p10660_p11 }
 0x48d   :  { %10670 = shalt.err (!%p10667_p1)
}
 0x48e   :  { %796 = dma.hbm_to_vmem [thread:$0]  %s11262_s29, 512, %s791_s0, [#allocation79], %s10831_s2, %s10831_s2, %s10832_s21  }
 0x48f   :  { %s10671_s14 = scalar_lea.hbm %s11277_s17, 16 }
 0x490   :  { %p10672_p2 = scmp.ne.s32.totalorder %s11277_s17, %s10671_s14  ;;  %p10675_p3 = scmp.lt.u32.totalorder %s10671_s14, %s11277_s17 }
 0x492   :  { %p10677_p4 = pnand %p10675_p3, %p10672_p2 }
 0x494   :  { %10680 = shalt.err (!%p10677_p4)
}
 0x495   :  { %s10681_s24 = scalar_lea.vmem %s808_s1, 16  ;;  %s10685_s10 = scalar_lea.vmem %s808_s1, 32 }
 0x496   :  { %p10682_p5 = scmp.ne.s32.totalorder %s808_s1, %s10681_s24  ;;  %p10686_p6 = scmp.lt.s32.totalorder %s808_s1, %s808_s1 }
 0x497   :  { %p10687_p7 = scmp.lt.s32.totalorder %s10685_s10, %s10681_s24 }
 0x499   :  { %p10688_p8 = por %p10687_p7, %p10686_p6 }
 0x49b   :  { %p10689_p9 = pnand %p10688_p8, %p10682_p5 }
 0x49d   :  { %10692 = shalt.err (!%p10689_p9)
}
 0x49e   :  { %810 = dma.hbm_to_vmem [thread:$0]  %s11277_s17, 16, %s808_s1, [#allocation82]  }
 0x49f   :  { %10693 = dma.done.wait [#allocation5], 128  }
 0x4a0   :  { %10694 = vsyncadd [#allocation5], 4294967168 }
 0x4a1   :  { %10695 = dma.done.wait [#allocation7], 32  }
 0x4a2   :  { %10696 = vsyncadd [#allocation7], 4294967264 }
 0x4a3   :  { %10697 = dma.done.wait [#allocation10], 32  }
 0x4a4   :  { %10698 = vsyncadd [#allocation10], 4294967264 }
 0x4a5   :  { %10699 = dma.done.wait [#allocation13], 32  }
 0x4a6   :  { %10700 = vsyncadd [#allocation13], 4294967264 }
 0x4a7   :  { %10701 = dma.done.wait [#allocation16], 528  }
 0x4a8   :  { %10702 = vsyncadd [#allocation16], 4294966768 }
 0x4a9   :  { %10703 = dma.done.wait [#allocation19], 528  }
 0x4aa   :  { %10704 = vsyncadd [#allocation19], 4294966768 }
 0x4ab   :  { %10705 = dma.done.wait [#allocation22], 1024  }
 0x4ac   :  { %10706 = vsyncadd [#allocation22], 4294966272 }
 0x4ad   :  { %10707 = dma.done.wait [#allocation25], 32  }
 0x4ae   :  { %10708 = vsyncadd [#allocation25], 4294967264 }
 0x4af   :  { %10709 = dma.done.wait [#allocation28], 32  }
 0x4b0   :  { %10710 = vsyncadd [#allocation28], 4294967264 }
 0x4b1   :  { %10711 = dma.done.wait [#allocation31], 528  }
 0x4b2   :  { %10712 = vsyncadd [#allocation31], 4294966768 }
 0x4b3   :  { %10713 = dma.done.wait [#allocation34], 528  }
 0x4b4   :  { %10714 = vsyncadd [#allocation34], 4294966768 }
 0x4b5   :  { %10715 = dma.done.wait [#allocation37], 144  }
 0x4b6   :  { %10716 = vsyncadd [#allocation37], 4294967152 }
 0x4b7   :  { %10717 = dma.done.wait [#allocation40], 144  }
 0x4b8   :  { %10718 = vsyncadd [#allocation40], 4294967152 }
 0x4b9   :  { %10719 = dma.done.wait [#allocation43], 528  }
 0x4ba   :  { %10720 = vsyncadd [#allocation43], 4294966768 }
 0x4bb   :  { %10721 = dma.done.wait [#allocation46], 1024  }
 0x4bc   :  { %10722 = vsyncadd [#allocation46], 4294966272 }
 0x4bd   :  { %10723 = dma.done.wait [#allocation49], 32  }
 0x4be   :  { %10724 = vsyncadd [#allocation49], 4294967264 }
 0x4bf   :  { %10725 = dma.done.wait [#allocation52], 1024  }
 0x4c0   :  { %10726 = vsyncadd [#allocation52], 4294966272 }
 0x4c1   :  { %10727 = dma.done.wait [#allocation55], 528  }
 0x4c2   :  { %10728 = vsyncadd [#allocation55], 4294966768 }
 0x4c3   :  { %10729 = dma.done.wait [#allocation58], 528  }
 0x4c4   :  { %10730 = vsyncadd [#allocation58], 4294966768 }
 0x4c5   :  { %10731 = dma.done.wait [#allocation61], 1024  }
 0x4c6   :  { %10732 = vsyncadd [#allocation61], 4294966272 }
 0x4c7   :  { %10733 = dma.done.wait [#allocation64], 32  }
 0x4c8   :  { %10734 = vsyncadd [#allocation64], 4294967264 }
 0x4c9   :  { %10735 = dma.done.wait [#allocation67], 1024  }
 0x4ca   :  { %10736 = vsyncadd [#allocation67], 4294966272 }
 0x4cb   :  { %10737 = dma.done.wait [#allocation70], 32  }
 0x4cc   :  { %10738 = vsyncadd [#allocation70], 4294967264 }
 0x4cd   :  { %10739 = dma.done.wait [#allocation73], 528  }
 0x4ce   :  { %10740 = vsyncadd [#allocation73], 4294966768 }
 0x4cf   :  { %10741 = dma.done.wait [#allocation76], 32  }
 0x4d0   :  { %10742 = vsyncadd [#allocation76], 4294967264 }
 0x4d1   :  { %10743 = dma.done.wait [#allocation79], 1024  }
 0x4d2   :  { %10744 = vsyncadd [#allocation79], 4294966272 }
 0x4d3   :  { %10745 = dma.done.wait [#allocation82], 16  }
 0x4d4   :  { %10746 = vsyncadd [#allocation82], 4294967280  ;;  %s12425_s17 = sld [smem:[#allocation112_spill]]  ;;  %s12426_s29 = sld [smem:[#allocation113_spill]]  ;;  %v10881_v2 = vmov 0   ;;  %v986_v14 = vlaneseq  ;;  %vm1049_vm0 = vcmask 130048  }
 0x4d5   :  { %s12427_s2 = sld [smem:[#allocation111_spill]]  ;;  %9536 = vset.pattern.permute.xlu1 %v10881_v2  ;;  %9535 = vset.pattern.permute.xlu0 %v10881_v2  ;;  %v10882_v18 = vmov 0.0   ;;  %vm1252_vm9 = vcmask 23552   ;;  %s12428_s21 = sld [smem:[#allocation115_spill]]  ;;  %v1456_v63 = vld [vmem:[#allocation4] sm:$0xff]  ;;  %vm1457_vm10 = vcmask 64512  }
 0x4d6   :  { %v11631_v15 = vand.u32 127, %v986_v14  ;;  %s12429_s20 = sld [smem:[#allocation134_spill]]  ;;  %v1559_v0 = vld [vmem:[#allocation38] sm:$0xff]  ;;  %s12432_s5 = sld [smem:[#allocation120_spill]] }
 0x4d7   :  { %s12430_s15 = sld [smem:[#allocation110_spill]]  ;;  %s12433_s16 = sld [smem:[#allocation121_spill]] }
 0x4d8   :  { %s12431_s11 = sld [smem:[#allocation118_spill]]  ;;  %s12434_s23 = sld [smem:[#allocation119_spill]] }
 0x4d9   :  { %s12435_s27 = sld [smem:[#allocation114_spill]]  ;;  %s12436_s18 = sld [smem:[#allocation123_spill]] }
 0x4da   :  { %v974_v3 = vld [vmem:[%s12425_s17 + $0x8] sm:$0xff]  ;;  %v973_v4 = vld [vmem:[%s12425_s17] sm:$0xff]  ;;  %v979_v10 = vld [vmem:[%s12426_s29 + $0x10] sm:$0xff]  ;;  %s12437_s7 = sld [smem:[#allocation124_spill]]  ;;  %s12438_s3 = sld [smem:[#allocation125_spill]] }
 0x4db   :  { %992 = vperm.xlu1 %9536, %v974_v3   ;;  %989 = vperm.xlu0 %9535, %v973_v4   ;;  %v978_v5 = vld [vmem:[%s12426_s29 + $0x8] sm:$0xff]  ;;  %v977_v6 = vld [vmem:[%s12426_s29] sm:$0xff]  ;;  %v975_v11 = vld [vmem:[%s12425_s17 + $0x10] sm:$0xff]  ;;  %s12439_s30 = sld [smem:[#allocation127_spill]]  ;;  %s12440_s9 = sld [smem:[#allocation129_spill]] }
 0x4dc   :  { %v971_v7 = vld [vmem:[%s12427_s2] sm:$0xff]  ;;  %v972_v8 = vld [vmem:[%s12427_s2 + $0x8] sm:$0xff]  ;;  %v980_v12 = vld [vmem:[%s12426_s29 + $0x18] sm:$0xff]  ;;  %s12441_s22 = sld [smem:[#allocation128_spill]]  ;;  %s12442_s25 = sld [smem:[#allocation137_spill]] }
 0x4dd   :  { %v8927_v9 = vpack.c.bf16 %v972_v8, %v971_v7  ;;  %v976_v13 = vld [vmem:[%s12425_s17 + $0x18] sm:$0xff]  ;;  %v982_v53 = vld [vmem:[%s12428_s21] sm:$0xff]  ;;  %v984_v54 = vld [vmem:[%s12428_s21 + $0x10] sm:$0xff]  ;;  %s12443_s4 = sld [smem:[#allocation138_spill]]  ;;  %s12445_s26 = sld [smem:[#allocation153_spill]] }
 0x4de   :  { %v985_v55 = vld [vmem:[%s12428_s21 + $0x18] sm:$0xff]  ;;  %v1347_v56 = vld [vmem:[%s12429_s20] sm:$0xff]  ;;  %v1348_v57 = vld [vmem:[%s12429_s20 + $0x8] sm:$0xff]  ;;  %s12446_s0 = sld [smem:[#allocation160_spill]]  ;;  %s12447_s12 = sld [smem:[#allocation170_spill]] }
 0x4df   :  { %1016 = vperm.xlu1 %9536, %v978_v5   ;;  %1013 = vperm.xlu0 %9535, %v977_v6   ;;  %v8935_v58 = vpack.c.bf16 %v1348_v57, %v1347_v56  ;;  %v983_v59 = vld [vmem:[%s12428_s21 + $0x8] sm:$0xff]  ;;  %v1349_v60 = vld [vmem:[%s12429_s20 + $0x10] sm:$0xff]  ;;  %v1350_v61 = vld [vmem:[%s12429_s20 + $0x18] sm:$0xff]  ;;  %s12448_s1 = sld [smem:[#allocation168_spill]] }
 0x4e0   :  { %8928 = vmatprep.subr.bf16.mxu0 %v8927_v9  ;;  %8932 = vmatprep.subr.bf16.mxu1 %v8927_v9  ;;  %v8939_v62 = vpack.c.bf16 %v1350_v61, %v1349_v60  ;;  %v969_v61 = vld [vmem:[%s12430_s15] sm:$0xff] }
 0x4e1   :  { %8930 = vmatpush3.bf16.msra.mxu0 %v8927_v9  ;;  %8934 = vmatpush3.bf16.msra.mxu1 %v8927_v9 }
 0x4e2   :  { %8936 = vmatprep.subr.bf16.mxu0 %v8935_v58  ;;  %8213 = vmatprep.subr.mxu1 %v1456_v63 }
 0x4e3   :  { %1019 = vperm.xlu1 %9536, %v979_v10   ;;  %995 = vperm.xlu0 %9535, %v975_v11  }
 0x4e7   :  { %1022 = vperm.xlu1 %9536, %v980_v12   ;;  %998 = vperm.xlu0 %9535, %v976_v13   ;;  %v7511_v12 = vld [vmem:[#allocation27] ss:$0 sm:$0xff] }
 0x55a   :  { %v993_v16 = vpop.permute.xlu1 %992  ;;  %v990_v17 = vpop.permute.xlu0 %989 }
 0x55b   :  { %vm1001_vm1 = vcmp.eq.s32.totalorder %v993_v16, %v11631_v15  ;;  %vm1000_vm2 = vcmp.eq.s32.totalorder %v990_v17, %v11631_v15 }
 0x55c   :  { %v11636_v19 = vsel %vm1001_vm1, 1.0, %v10882_v18  ;;  %v11639_v20 = vsel %vm1000_vm2, 1.0, %v10882_v18  ;;  %vm1358_vm2 = vcmask 261120  }
 0x55d   :  { %8183 = vmatprep.mubr.msk.f32.mxu0 %vm1049_vm0, %v11639_v20 }
 0x55e   :  { %v1017_v21 = vpop.permute.xlu1 %1016  ;;  %v1014_v22 = vpop.permute.xlu0 %1013  ;;  %8184 = vmatmul.mubr.msk.f32.vlgmr.msra.gmra.mrb[0].mxu0 %vm1049_vm0, %v11636_v19 }
 0x55f   :  { %vm1025_vm3 = vcmp.eq.s32.totalorder %v1017_v21, %v11631_v15  ;;  %vm1024_vm4 = vcmp.eq.s32.totalorder %v1014_v22, %v11631_v15  ;;  %8938 = vmatpush3.bf16.msra.mxu0 %v8935_v58 }
 0x560   :  { %v11648_v23 = vsel %vm1025_vm3, 1.0, %v10882_v18  ;;  %v11651_v24 = vsel %vm1024_vm4, 1.0, %v10882_v18  ;;  %8940 = vmatprep.subr.bf16.mxu0 %v8939_v62 }
 0x561   :  { %8193 = vmatprep.mubr.msk.f32.mxu1 %vm1049_vm0, %v11651_v24 }
 0x562   :  { %v1020_v25 = vpop.permute.xlu1 %1019  ;;  %v996_v26 = vpop.permute.xlu0 %995  ;;  %8194 = vmatmul.mubr.msk.f32.vlgmr.msra.gmra.mrb[0].mxu1 %vm1049_vm0, %v11648_v23 }
 0x563   :  { %vm1026_vm5 = vcmp.eq.s32.totalorder %v1020_v25, %v11631_v15  ;;  %vm1002_vm6 = vcmp.eq.s32.totalorder %v996_v26, %v11631_v15  ;;  %8942 = vmatpush3.bf16.msra.mxu0 %v8939_v62  ;;  %8214 = vmatpush3.msra.mxu1 %v1456_v63  ;;  %v7512_v25 = vld [vmem:[#allocation24] ss:$0 sm:$0xff]  ;;  %v970_v62 = vld [vmem:[%s12430_s15 + $0x8] sm:$0xff]  ;;  %v7513_v63 = vld [vmem:[#allocation26] ss:$0 sm:$0xff] }
 0x564   :  { %v11660_v27 = vsel %vm1026_vm5, 1.0, %v10882_v18  ;;  %v11663_v28 = vsel %vm1002_vm6, 1.0, %v10882_v18  ;;  %8221 = vmatprep.subr.mxu0 %v1559_v0 }
 0x565   :  { %8186 = vmatprep.mubr.msk.f32.mxu0 %vm1049_vm0, %v11663_v28  ;;  %8196 = vmatprep.mubr.msk.f32.mxu1 %vm1049_vm0, %v11660_v27 }
 0x566   :  { %v1023_v29 = vpop.permute.xlu1 %1022  ;;  %v999_v30 = vpop.permute.xlu0 %998 }
 0x567   :  { %vm1027_vm7 = vcmp.eq.s32.totalorder %v1023_v29, %v11631_v15  ;;  %vm1003_vm8 = vcmp.eq.s32.totalorder %v999_v30, %v11631_v15 }
 0x568   :  { %v11672_v31 = vsel %vm1027_vm7, 1.0, %v10882_v18  ;;  %v11675_v32 = vsel %vm1003_vm8, 1.0, %v10882_v18 }
 0x569   :  { %8187 = vmatmul.mubr.msk.f32.gmra.mrb[2].mxu0 %vm1049_vm0, %v11675_v32  ;;  %8197 = vmatmul.mubr.msk.f32.gmra.mrb[2].mxu1 %vm1049_vm0, %v11672_v31 }
 0x631   :  { %v8185_v33 = vpop.f32.mrb[0].mxu0 }
 0x632   :  { %v1128_v34 = vpop.f32.mrb[1].mxu0 }
 0x635   :  { %v8195_v35 = vpop.f32.mrb[0].mxu1 }
 0x636   :  { %v11681_v36 = vsub.f32 %v8185_v33, %v8195_v35  ;;  %v1225_v37 = vpop.f32.mrb[1].mxu1 }
 0x637   :  { %v11683_v38 = vsub.f32 %v1128_v34, %v1225_v37 }
 0x638   :  { %v1249_v39 = vmul.f32 %v11681_v36, %v11681_v36 }
 0x639   :  { %v1248_v40 = vmul.f32 %v11683_v38, %v11683_v38 }
 0x63a   :  { %v1256_v41 = vsel %vm1252_vm9, %v1249_v39, 0.0 }
 0x63b   :  { %1257 = vadd.xlane.f32.xlu1 %v1256_v41  ;;  %v1253_v42 = vsel %vm1252_vm9, %v1248_v40, 0.0 }
 0x63c   :  { %v8198_v43 = vpop.f32.mrb[2].mxu1  ;;  %1254 = vadd.xlane.f32.xlu0 %v1253_v42  ;;  %v8188_v44 = vpop.f32.mrb[2].mxu0 }
 0x63d   :  { %v11691_v45 = vsub.f32 %v8188_v44, %v8198_v43  ;;  %v1138_v46 = vpop.f32.mrb[3].mxu0  ;;  %v1235_v47 = vpop.f32.mrb[3].mxu1 }
 0x63e   :  { %v11693_v48 = vsub.f32 %v1138_v46, %v1235_v47 }
 0x63f   :  { %v1251_v51 = vmul.f32 %v11691_v45, %v11691_v45 }
 0x640   :  { %v1250_v49 = vmul.f32 %v11693_v48, %v11693_v48 }
 0x641   :  { %v1262_v52 = vsel %vm1252_vm9, %v1251_v51, 0.0 }
 0x642   :  { %v1259_v50 = vsel %vm1252_vm9, %v1250_v49, 0.0 }
 0x643   :  { %1260 = vadd.xlane.f32.xlu0 %v1259_v50 }
 0x647   :  { %1263 = vadd.xlane.f32.xlu0 %v1262_v52 }
 0x64c   :  { %1298 = vperm.xlu1 %9536, %v982_v53  }
 0x650   :  { %1304 = vperm.xlu1 %9536, %v984_v54  }
 0x654   :  { %1307 = vperm.xlu1 %9536, %v985_v55  }
 0x65d   :  { %1301 = vperm.xlu0 %9535, %v983_v59  }
 0x6c8   :  { %v1258_v1 = vpop.xlane.xlu1 %1257 }
 0x6c9   :  { %9537 = vrsqrt.f32 %v1258_v1  ;;  %v1255_v2 = vpop.xlane.xlu0 %1254  ;;  %vm1278_vm12 = vcmp.eq.f32.partialorder %v1258_v1, inf  ;;  %v1281_v10 = vand.u32 2147483648, %v1258_v1  ;;  %vm1280_vm13 = vcmp.eq.f32.partialorder %v1258_v1, 0.0 }
 0x6ca   :  { %9539 = vrsqrt.f32 %v1255_v2  ;;  %vm1271_vm14 = vcmp.eq.f32.partialorder %v1255_v2, inf  ;;  %v1274_v16 = vand.u32 2147483648, %v1255_v2  ;;  %vm1273_vm15 = vcmp.eq.f32.partialorder %v1255_v2, 0.0 }
 0x6cc   :  { %v1299_v3 = vpop.permute.xlu1 %1298 }
 0x6cd   :  { %vm1309_vm11 = vcmp.eq.s32.totalorder %v1299_v3, %v11631_v15 }
 0x6ce   :  { %v11711_v4 = vsel %vm1309_vm11, 1.0, %v10882_v18 }
 0x6cf   :  { %8215 = vmatprep.mubr.msk.f32.mxu1 %vm1457_vm10, %v11711_v4 }
 0x6d0   :  { %v1261_v5 = vpop.xlane.xlu0 %1260  ;;  %v1305_v17 = vpop.permute.xlu1 %1304 }
 0x6d1   :  { %9541 = vrsqrt.f32 %v1261_v5  ;;  %vm1311_vm1 = vcmp.eq.s32.totalorder %v1305_v17, %v11631_v15  ;;  %vm1285_vm3 = vcmp.eq.f32.partialorder %v1261_v5, inf  ;;  %v1288_v41 = vand.u32 2147483648, %v1261_v5 }
 0x6d2   :  { %vm1287_vm5 = vcmp.eq.f32.partialorder %v1261_v5, 0.0  ;;  %v11738_v49 = vsel %vm1311_vm1, 1.0, %v10882_v18 }
 0x6d3   :  { %v11715_v6 = vpop.eup %9537 }
 0x6d4   :  { %v11717_v7 = vpop.eup %9539  ;;  %v1277_v8 = vmul.f32 %v11715_v6, %v1258_v1  ;;  %v1264_v9 = vpop.xlane.xlu0 %1263 }
 0x6d5   :  { %v1270_v11 = vmul.f32 %v11717_v7, %v1255_v2  ;;  %9543 = vrsqrt.f32 %v1264_v9  ;;  %v1308_v39 = vpop.permute.xlu1 %1307  ;;  %vm1292_vm7 = vcmp.eq.f32.partialorder %v1264_v9, inf  ;;  %v1295_v53 = vand.u32 2147483648, %v1264_v9 }
 0x6d6   :  { %v1279_v13 = vsel %vm1278_vm12, %v1258_v1, %v1277_v8  ;;  %vm1312_vm6 = vcmp.eq.s32.totalorder %v1308_v39, %v11631_v15  ;;  %vm1294_vm8 = vcmp.eq.f32.partialorder %v1264_v9, 0.0  ;;  %v1822_v39 = vld [vmem:[%s12431_s11] sm:$0xff] }
 0x6d7   :  { %v11721_v21 = vsel %vm1280_vm13, %v1281_v10, %v1279_v13  ;;  %v1272_v22 = vsel %vm1271_vm14, %v1255_v2, %v1270_v11 }
 0x6d8   :  { %v11723_v26 = vsel %vm1273_vm15, %v1274_v16, %v1272_v22  ;;  %v1329_v29 = vmul.f32 %v7511_v12, %v11721_v21 }
 0x6d9   :  { %v1328_v30 = vmul.f32 %v7511_v12, %v11723_v26 }
 0x6da   :  { %v1340_v33 = vadd.f32 %v7512_v25, %v1329_v29 }
 0x6db   :  { %v11727_v34 = vpop.eup %9541  ;;  %v1339_v35 = vadd.f32 %v7512_v25, %v1328_v30 }
 0x6dc   :  { %v1284_v37 = vmul.f32 %v11727_v34, %v1261_v5  ;;  %v1302_v40 = vpop.permute.xlu0 %1301  ;;  %v1344_v46 = vmax.f32 %v1340_v33, 0.0 }
 0x6dd   :  { %vm1310_vm4 = vcmp.eq.s32.totalorder %v1302_v40, %v11631_v15  ;;  %v1343_v42 = vmax.f32 %v1339_v35, 0.0  ;;  %v11752_v15 = vsel %vm1312_vm6, 1.0, %v10882_v18  ;;  %v1823_v40 = vld [vmem:[%s12431_s11 + $0x8] sm:$0xff] }
 0x6de   :  { %v1286_v43 = vsel %vm1285_vm3, %v1261_v5, %v1284_v37  ;;  %v11733_v44 = vsel %vm1310_vm4, 1.0, %v10882_v18 }
 0x6df   :  { %v11735_v47 = vpop.eup %9543  ;;  %8207 = vmatprep.mubr.msk.f32.mxu0 %vm1358_vm2, %v1343_v42  ;;  %8216 = vmatmul.mubr.msk.f32.vlgmr.msra.gmra.mrb[4].mxu1 %vm1457_vm10, %v11733_v44  ;;  %v11744_v50 = vsel %vm1287_vm5, %v1288_v41, %v1286_v43  ;;  %v8951_v43 = vpack.c.bf16 %v1823_v40, %v1822_v39  ;;  %v7545_v40 = vld [vmem:[#allocation6] ss:$0 sm:$0xff] }
 0x6e0   :  { %v1291_v51 = vmul.f32 %v11735_v47, %v1264_v9  ;;  %8208 = vmatmul.mubr.msk.f32.vlgmr.msra.gmra.mrb[4].mxu0 %vm1358_vm2, %v1344_v46  ;;  %8218 = vmatprep.mubr.msk.f32.mxu1 %vm1457_vm10, %v11738_v49  ;;  %v1330_v52 = vmul.f32 %v7511_v12, %v11744_v50  ;;  %v1824_v46 = vld [vmem:[%s12431_s11 + $0x10] sm:$0xff] }
 0x6e1   :  { %8222 = vmatpush3.msra.mxu0 %v1559_v0 }
 0x6e2   :  { %v1293_v54 = vsel %vm1292_vm7, %v1264_v9, %v1291_v51  ;;  %v1341_v55 = vadd.f32 %v7512_v25, %v1330_v52  ;;  %v1825_v51 = vld [vmem:[%s12431_s11 + $0x18] sm:$0xff] }
 0x6e3   :  { %8219 = vmatmul.mubr.msk.f32.gmra.mrb[6].mxu1 %vm1457_vm10, %v11752_v15  ;;  %v11756_v56 = vsel %vm1294_vm8, %v1295_v53, %v1293_v54  ;;  %v8955_v52 = vpack.c.bf16 %v1825_v51, %v1824_v46  ;;  %v1818_v53 = vld [vmem:[%s12432_s5] sm:$0xff]  ;;  %v1819_v54 = vld [vmem:[%s12432_s5 + $0x8] sm:$0xff] }
 0x6e4   :  { %8230 = vmatprep.mubr.msk.f32.mxu1 %vm1049_vm0, %v11639_v20  ;;  %v1345_v57 = vmax.f32 %v1341_v55, 0.0  ;;  %v1331_v58 = vmul.f32 %v7511_v12, %v11756_v56  ;;  %v8959_v55 = vpack.c.bf16 %v1819_v54, %v1818_v53 }
 0x6e6   :  { %8210 = vmatprep.mubr.msk.f32.mxu0 %vm1358_vm2, %v1345_v57  ;;  %v1342_v59 = vadd.f32 %v7512_v25, %v1331_v58  ;;  %v7522_v25 = vld [vmem:[#allocation36] ss:$0 sm:$0xff]  ;;  %v2141_v58 = vld [vmem:[%s12433_s16 + $0x8] sm:$0xff] }
 0x6e7   :  { %v2140_v57 = vld [vmem:[%s12433_s16] sm:$0xff] }
 0x6e8   :  { %v1346_v60 = vmax.f32 %v1342_v59, 0.0  ;;  %v8975_v59 = vpack.c.bf16 %v2141_v58, %v2140_v57 }
 0x6ea   :  { %8211 = vmatmul.mubr.msk.f32.gmra.mrb[6].mxu0 %vm1358_vm2, %v1346_v60  ;;  %v1820_v60 = vld [vmem:[%s12432_s5 + $0x10] sm:$0xff] }
 0x6eb   :  { %8223 = vmatprep.mubr.msk.f32.mxu0 %vm1457_vm10, %v969_v61  ;;  %v1821_v61 = vld [vmem:[%s12432_s5 + $0x18] sm:$0xff] }
 0x6ee   :  { %8224 = vmatmul.mubr.msk.f32.vlgmr.msra.gmra.mrb[8].mxu0 %vm1457_vm10, %v970_v62 }
 0x6ef   :  { %8240 = vmatprep.mubr.msk.f32.mxu0 %vm1049_vm0, %v11651_v24 }
 0x7b2   :  { %v8217_v0 = vpop.f32.mrb[4].mxu1 }
 0x7b3   :  { %v8209_v1 = vpop.f32.mrb[4].mxu0  ;;  %v1536_v2 = vpop.f32.mrb[5].mxu1 }
 0x7b4   :  { %v1443_v3 = vadd.f32 %v8209_v1, %v7513_v63  ;;  %v1437_v5 = vpop.f32.mrb[5].mxu0 }
 0x7b5   :  { %v1438_v8 = vadd.f32 %v7513_v63, %v1437_v5  ;;  %v2021_v5 = vld [vmem:[%s12434_s23 + $0x8] sm:$0xff] }
 0x7b6   :  { %v11769_v9 = vmul.f32 %v8217_v0, %v1443_v3  ;;  %v8220_v10 = vpop.f32.mrb[6].mxu1  ;;  %v2020_v3 = vld [vmem:[%s12434_s23] sm:$0xff] }
 0x7b7   :  { %v11771_v11 = vmul.f32 %v1536_v2, %v1438_v8  ;;  %v1546_v12 = vpop.f32.mrb[7].mxu1  ;;  %v8963_v2 = vpack.c.bf16 %v1821_v61, %v1820_v60  ;;  %v1037_v61 = vshrl.u32 %v986_v14, 7 }
 0x7bd   :  { %v8212_v13 = vpop.f32.mrb[6].mxu0 }
 0x7be   :  { %v1453_v16 = vadd.f32 %v8212_v13, %v7513_v63  ;;  %v1447_v17 = vpop.f32.mrb[7].mxu0 }
 0x7bf   :  { %v1448_v22 = vadd.f32 %v7513_v63, %v1447_v17  ;;  %v2022_v17 = vld [vmem:[%s12434_s23 + $0x10] sm:$0xff] }
 0x7c0   :  { %v11773_v29 = vmul.f32 %v8220_v10, %v1453_v16  ;;  %v8967_v16 = vpack.c.bf16 %v2021_v5, %v2020_v3 }
 0x7c1   :  { %v11775_v30 = vmul.f32 %v1546_v12, %v1448_v22  ;;  %v8225_v33 = vpop.f32.mrb[8].mxu0  ;;  %v2023_v22 = vld [vmem:[%s12434_s23 + $0x18] sm:$0xff] }
 0x7c2   :  { %v11777_v35 = vadd.f32 %v8225_v33, %v7522_v25  ;;  %v1639_v37 = vpop.f32.mrb[9].mxu0  ;;  %v2142_v33 = vld [vmem:[%s12433_s16 + $0x10] sm:$0xff] }
 0x7c3   :  { %v11781_v41 = vadd.f32 %v7522_v25, %v1639_v37  ;;  %v8971_v25 = vpack.c.bf16 %v2023_v22, %v2022_v17  ;;  %v2143_v37 = vld [vmem:[%s12433_s16 + $0x18] sm:$0xff]  ;;  %v2334_v17 = vld [vmem:[%s12436_s18 + $0x8] sm:$0xff] }
 0x7c4   :  { %v8979_v39 = vpack.c.bf16 %v2143_v37, %v2142_v33  ;;  %v2335_v37 = vld [vmem:[%s12436_s18 + $0x10] sm:$0xff] }
 0x7c5   :  { %v8943_v42 = vpack.c.bf16 %v11777_v35, %v11781_v41 }
 0x7c7   :  { %8944 = vmatprep.subr.bf16.mxu1 %v8943_v42  ;;  %8948 = vmatprep.subr.bf16.mxu0 %v8943_v42 }
 0x7c8   :  { %8946 = vmatpush3.bf16.msra.mxu1 %v8943_v42  ;;  %8950 = vmatpush3.bf16.msra.mxu0 %v8943_v42 }
 0x7c9   :  { %8952 = vmatprep.subr.bf16.mxu1 %v8951_v43  ;;  %8976 = vmatprep.subr.bf16.mxu0 %v8975_v59 }
 0x7cb   :  { %8231 = vmatmul.mubr.msk.f32.vlgmr.msra.gmra.mrb[8].mxu1 %vm1049_vm0, %v11636_v19  ;;  %8241 = vmatmul.mubr.msk.f32.vlgmr.msra.gmra.mrb[10].mxu0 %vm1049_vm0, %v11648_v23 }
 0x7cc   :  { %8233 = vmatprep.mubr.msk.f32.mxu1 %vm1049_vm0, %v11663_v28  ;;  %8243 = vmatprep.mubr.msk.f32.mxu0 %vm1049_vm0, %v11660_v27 }
 0x7cd   :  { %8954 = vmatpush3.bf16.msra.mxu1 %v8951_v43  ;;  %8978 = vmatpush3.bf16.msra.mxu0 %v8975_v59 }
 0x7ce   :  { %8956 = vmatprep.subr.bf16.mxu1 %v8955_v52  ;;  %8980 = vmatprep.subr.bf16.mxu0 %v8979_v39 }
 0x7cf   :  { %8234 = vmatmul.mubr.msk.f32.gmra.mrb[10].mxu1 %vm1049_vm0, %v11675_v32  ;;  %8244 = vmatmul.mubr.msk.f32.gmra.mrb[12].mxu0 %vm1049_vm0, %v11672_v31 }
 0x7d1   :  { %8958 = vmatpush3.bf16.msra.mxu1 %v8955_v52  ;;  %8982 = vmatpush3.bf16.msra.mxu0 %v8979_v39  ;;  %v2336_v39 = vld [vmem:[%s12436_s18 + $0x18] sm:$0xff] }
 0x7d2   :  { %8960 = vmatprep.subr.bf16.mxu1 %v8959_v55 }
 0x89e   :  { %v8232_v62 = vpop.f32.mrb[8].mxu1  ;;  %v8242_v63 = vpop.f32.mrb[10].mxu0 }
 0x89f   :  { %v1714_v0 = vpop.f32.mrb[9].mxu1  ;;  %v1799_v1 = vpop.f32.mrb[11].mxu0 }
 0x8a0   :  { %8254 = vmatprep.mubr.msk.f32.mxu1 %vm1358_vm2, %v1799_v1  ;;  %v7546_v1 = vld [vmem:[#allocation8] ss:$0 sm:$0xff] }
 0x8a1   :  { %8255 = vmatmul.mubr.msk.f32.vlgmr.msra.gmra.mrb[12].mxu1 %vm1358_vm2, %v8242_v63  ;;  %v1038_v63 = vadd.s32 8, %v1037_v61 }
 0x8a2   :  { %v8235_v8 = vpop.f32.mrb[10].mxu1  ;;  %v8245_v10 = vpop.f32.mrb[12].mxu0  ;;  %8962 = vmatpush3.bf16.msra.mxu1 %v8959_v55 }
 0x8a3   :  { %v1724_v12 = vpop.f32.mrb[11].mxu1  ;;  %v1809_v13 = vpop.f32.mrb[13].mxu0  ;;  %8964 = vmatprep.subr.bf16.mxu1 %v8963_v2 }
 0x8a4   :  { %8257 = vmatprep.mubr.msk.f32.mxu1 %vm1358_vm2, %v1809_v13 }
 0x8a5   :  { %8258 = vmatmul.mubr.msk.f32.gmra.mrb[14].mxu1 %vm1358_vm2, %v8245_v10 }
 0x8a6   :  { %8966 = vmatpush3.bf16.msra.mxu1 %v8963_v2  ;;  %8268 = vmatprep.mubr.msk.f32.mxu1 %vm1358_vm2, %v1714_v0 }
 0x8a7   :  { %8968 = vmatprep.subr.bf16.mxu1 %v8967_v16 }
 0x8a9   :  { %8269 = vmatmul.mubr.msk.f32.vlgmr.msra.gmra.mrb[12].mxu1 %vm1358_vm2, %v8232_v62  ;;  %v7496_v62 = vld [vmem:[%s12435_s27] ss:$0 sm:$0xff] }
 0x8aa   :  { %8271 = vmatprep.mubr.msk.f32.mxu1 %vm1358_vm2, %v1724_v12  ;;  %8970 = vmatpush3.bf16.msra.mxu1 %v8967_v16  ;;  %vm1043_vm11 = vcmp.eq.s32.totalorder %v7496_v62, %v1037_v61  ;;  %vm1044_vm12 = vcmp.eq.s32.totalorder %v7496_v62, %v1038_v63  ;;  %v2333_v16 = vld [vmem:[%s12436_s18] sm:$0xff]  ;;  %v2513_v61 = vld [vmem:[%s12438_s3 + $0x18] sm:$0xff]  ;;  %v7557_v63 = vld [vmem:[#allocation9] ss:$0 sm:$0xff] }
 0x8ab   :  { %8972 = vmatprep.subr.bf16.mxu1 %v8971_v25  ;;  %v11834_v0 = vsel %vm1043_vm11, 1.0, %v10882_v18  ;;  %v8991_v33 = vpack.c.bf16 %v2334_v17, %v2333_v16 }
 0x8ad   :  { %8272 = vmatmul.mubr.msk.f32.gmra.mrb[14].mxu1 %vm1358_vm2, %v8235_v8 }
 0x8ae   :  { %8974 = vmatpush3.bf16.msra.mxu1 %v8971_v25  ;;  %8282 = vmatprep.mubr.msk.f32.mxu1 %vm1358_vm2, %v11771_v11 }
 0x8b1   :  { %8283 = vmatmul.mubr.msk.f32.vlgmr.msra.gmra.mrb[12].mxu1 %vm1358_vm2, %v11769_v9 }
 0x8b2   :  { %8285 = vmatprep.mubr.msk.f32.mxu1 %vm1358_vm2, %v11775_v30 }
 0x8b5   :  { %8286 = vmatmul.mubr.msk.f32.gmra.mrb[14].mxu1 %vm1358_vm2, %v11773_v29 }
 0x984   :  { %v8284_v42 = vpop.f32.mrb[12].mxu1 }
 0x985   :  { %v2133_v43 = vadd.f32 %v8284_v42, %v7545_v40  ;;  %v2102_v46 = vpop.f32.mrb[13].mxu1  ;;  %v8995_v42 = vpack.c.bf16 %v2336_v39, %v2335_v37 }
 0x986   :  { %v2132_v51 = vadd.f32 %v7545_v40, %v2102_v46  ;;  %v2330_v46 = vld [vmem:[%s12437_s7 + $0x8] sm:$0xff] }
 0x987   :  { %v2137_v54 = vmax.f32 %v2133_v43, 0.0  ;;  %v2329_v43 = vld [vmem:[%s12437_s7] sm:$0xff] }
 0x988   :  { %v2136_v52 = vmax.f32 %v2132_v51, 0.0  ;;  %v8287_v53 = vpop.f32.mrb[14].mxu1  ;;  %v8999_v51 = vpack.c.bf16 %v2330_v46, %v2329_v43  ;;  %v2780_v43 = vld [vmem:[%s12439_s30 + $0x10] sm:$0xff]  ;;  %v2781_v46 = vld [vmem:[%s12439_s30 + $0x18] sm:$0xff] }
 0x989   :  { %v2135_v55 = vadd.f32 %v8287_v53, %v7545_v40  ;;  %v2112_v57 = vpop.f32.mrb[15].mxu1  ;;  %v2511_v53 = vld [vmem:[%s12438_s3 + $0x8] sm:$0xff] }
 0x98a   :  { %v2134_v58 = vadd.f32 %v7545_v40, %v2112_v57  ;;  %8296 = vmatprep.mubr.msk.f32.mxu0 %vm1358_vm2, %v2136_v52  ;;  %v11844_v40 = vsel %vm1044_vm12, 1.0, %v10882_v18  ;;  %v2510_v52 = vld [vmem:[%s12438_s3] sm:$0xff]  ;;  %v2331_v18 = vld [vmem:[%s12437_s7 + $0x10] sm:$0xff] }
 0x98b   :  { %8297 = vmatmul.mubr.msk.f32.vlgmr.msra.gmra.mrb[14].mxu0 %vm1358_vm2, %v2137_v54  ;;  %v2139_v60 = vmax.f32 %v2135_v55, 0.0  ;;  %v9007_v54 = vpack.c.bf16 %v2511_v53, %v2510_v52  ;;  %v2332_v55 = vld [vmem:[%s12437_s7 + $0x18] sm:$0xff] }
 0x98c   :  { %v2138_v59 = vmax.f32 %v2134_v58, 0.0  ;;  %v3084_v53 = vld [vmem:[#allocation15] sm:$0xff] }
 0x98d   :  { %9008 = vmatprep.subr.bf16.mxu1 %v9007_v54 }
 0x98e   :  { %8299 = vmatprep.mubr.msk.f32.mxu0 %vm1358_vm2, %v2138_v59  ;;  %9010 = vmatpush3.bf16.msra.mxu1 %v9007_v54  ;;  %v9003_v59 = vpack.c.bf16 %v2332_v55, %v2331_v18  ;;  %v3085_v54 = vld [vmem:[#allocation15 + $0x8] sm:$0xff]  ;;  %v2776_v55 = vld [vmem:[%s12440_s9 + $0x10] sm:$0xff] }
 0x98f   :  { %8300 = vmatmul.mubr.msk.f32.gmra.mrb[16].mxu0 %vm1358_vm2, %v2139_v60  ;;  %v2512_v60 = vld [vmem:[%s12438_s3 + $0x10] sm:$0xff]  ;;  %v9047_v18 = vpack.c.bf16 %v3085_v54, %v3084_v53 }
 0x990   :  { %8310 = vmatprep.mubr.msk.f32.mxu0 %vm1358_vm2, %v11834_v0  ;;  %v9011_v62 = vpack.c.bf16 %v2513_v61, %v2512_v60 }
 0x992   :  { %9012 = vmatprep.subr.bf16.mxu1 %v9011_v62 }
 0x993   :  { %9014 = vmatpush3.bf16.msra.mxu1 %v9011_v62 }
 0xa5e   :  { %v8298_v2 = vpop.f32.mrb[14].mxu0 }
 0xa5f   :  { %v2235_v3 = vadd.f32 %v8298_v2, %v7546_v1  ;;  %v2229_v5 = vpop.f32.mrb[15].mxu0 }
 0xa60   :  { %v2230_v8 = vadd.f32 %v7546_v1, %v2229_v5 }
 0xa62   :  { %v8983_v14 = vpack.c.bf16 %v2235_v3, %v2230_v8  ;;  %v8301_v10 = vpop.f32.mrb[16].mxu0 }
 0xa63   :  { %v2245_v12 = vadd.f32 %v8301_v10, %v7546_v1  ;;  %v2239_v13 = vpop.f32.mrb[17].mxu0  ;;  %v7558_v10 = vld [vmem:[#allocation11] ss:$0 sm:$0xff] }
 0xa64   :  { %v2240_v22 = vadd.f32 %v7546_v1, %v2239_v13  ;;  %8984 = vmatprep.subr.bf16.mxu0 %v8983_v14 }
 0xa65   :  { %8986 = vmatpush3.bf16.msra.mxu0 %v8983_v14 }
 0xa66   :  { %v8987_v25 = vpack.c.bf16 %v2245_v12, %v2240_v22 }
 0xa68   :  { %8988 = vmatprep.subr.bf16.mxu0 %v8987_v25 }
 0xa69   :  { %8990 = vmatpush3.bf16.msra.mxu0 %v8987_v25  ;;  %v2778_v25 = vld [vmem:[%s12439_s30] sm:$0xff] }
 0xa6a   :  { %8992 = vmatprep.subr.bf16.mxu0 %v8991_v33 }
 0xa6c   :  { %8311 = vmatmul.mubr.msk.f32.vlgmr.msra.gmra.mrb[18].mxu0 %vm1358_vm2, %v11844_v40 }
 0xa6d   :  { %8994 = vmatpush3.bf16.msra.mxu0 %v8991_v33  ;;  %v2779_v33 = vld [vmem:[%s12439_s30 + $0x8] sm:$0xff] }
 0xa6e   :  { %8996 = vmatprep.subr.bf16.mxu0 %v8995_v42 }
 0xa71   :  { %8998 = vmatpush3.bf16.msra.mxu0 %v8995_v42  ;;  %v9023_v42 = vpack.c.bf16 %v2779_v33, %v2778_v25  ;;  %v7581_v33 = vld [vmem:[#allocation12] ss:$0 sm:$0xff] }
 0xa72   :  { %9000 = vmatprep.subr.bf16.mxu0 %v8999_v51 }
 0xb3f   :  { %v8312_v57 = vpop.f32.mrb[18].mxu0 }
 0xb40   :  { %v2320_v58 = vpop.f32.mrb[19].mxu0 }
 0xb41   :  { %8321 = vmatprep.mubr.msk.f32.mxu0 %vm1358_vm2, %v2320_v58 }
 0xb42   :  { %8322 = vmatmul.mubr.msk.f32.vlgmr.msra.gmra.mrb[20].mxu0 %vm1358_vm2, %v8312_v57  ;;  %v2777_v57 = vld [vmem:[%s12440_s9 + $0x18] sm:$0xff] }
 0xb43   :  { %9002 = vmatpush3.bf16.msra.mxu0 %v8999_v51  ;;  %8332 = vmatprep.mubr.msk.f32.mxu0 %vm1358_vm2, %v11781_v41  ;;  %v2775_v51 = vld [vmem:[%s12440_s9 + $0x8] sm:$0xff]  ;;  %v9035_v62 = vpack.c.bf16 %v2777_v57, %v2776_v55  ;;  %v7582_v57 = vld [vmem:[#allocation14] ss:$0 sm:$0xff] }
 0xb44   :  { %9004 = vmatprep.subr.bf16.mxu0 %v9003_v59 }
 0xb47   :  { %9006 = vmatpush3.bf16.msra.mxu0 %v9003_v59 }
 0xb4a   :  { %8333 = vmatmul.mubr.msk.f32.vlgmr.msra.gmra.mrb[20].mxu0 %vm1358_vm2, %v11777_v35 }
 0xb4b   :  { %8360 = vmatprep.mubr.msk.f32.mxu0 %vm1049_vm0, %v11651_v24 }
 0xc1d   :  { %v8334_v1 = vpop.f32.mrb[20].mxu0 }
 0xc1e   :  { %v2507_v2 = vadd.f32 %v8334_v1, %v7557_v63  ;;  %v2490_v3 = vpop.f32.mrb[21].mxu0  ;;  %v2977_v1 = vld [vmem:[%s12441_s22 + $0x8] sm:$0xff] }
 0xc1f   :  { %v2506_v5 = vadd.f32 %v7557_v63, %v2490_v3  ;;  %v2976_v63 = vld [vmem:[%s12441_s22] sm:$0xff] }
 0xc20   :  { %v2509_v14 = vmax.f32 %v2507_v2, 0.0 }
 0xc21   :  { %v2508_v8 = vmax.f32 %v2506_v5, 0.0 }
 0xc23   :  { %8343 = vmatprep.mubr.msk.f32.mxu1 %vm1358_vm2, %v2508_v8 }
 0xc24   :  { %8344 = vmatmul.mubr.msk.f32.vlgmr.msra.gmra.mrb[16].mxu1 %vm1358_vm2, %v2509_v14  ;;  %v9039_v14 = vpack.c.bf16 %v2977_v1, %v2976_v63 }
 0xc25   :  { %8350 = vmatprep.mubr.msk.f32.mxu1 %vm1049_vm0, %v11639_v20 }
 0xcf7   :  { %v8345_v12 = vpop.f32.mrb[16].mxu1 }
 0xcf8   :  { %v2599_v13 = vadd.f32 %v8345_v12, %v7558_v10  ;;  %v2593_v16 = vpop.f32.mrb[17].mxu1  ;;  %v2979_v12 = vld [vmem:[%s12441_s22 + $0x18] sm:$0xff] }
 0xcf9   :  { %v2594_v17 = vadd.f32 %v7558_v10, %v2593_v16  ;;  %v2978_v10 = vld [vmem:[%s12441_s22 + $0x10] sm:$0xff]  ;;  %v3086_v16 = vld [vmem:[#allocation15 + $0x10] sm:$0xff] }
 0xcfa   :  { %v11869_v22 = vadd.f32 %v2599_v13, %v11777_v35  ;;  %v9027_v35 = vpack.c.bf16 %v2781_v46, %v2780_v43  ;;  %v9043_v13 = vpack.c.bf16 %v2979_v12, %v2978_v10  ;;  %v3273_v12 = vld [vmem:[#allocation20 + $0x10] sm:$0xff] }
 0xcfb   :  { %v11874_v37 = vadd.f32 %v2594_v17, %v11781_v41  ;;  %v2774_v41 = vld [vmem:[%s12440_s9] sm:$0xff]  ;;  %v3087_v17 = vld [vmem:[#allocation15 + $0x18] sm:$0xff] }
 0xcfc   :  { %v9031_v52 = vpack.c.bf16 %v2775_v51, %v2774_v41  ;;  %v9051_v25 = vpack.c.bf16 %v3087_v17, %v3086_v16  ;;  %v3267_v17 = vld [vmem:[#allocation21] sm:$0xff] }
 0xcfd   :  { %v9015_v39 = vpack.c.bf16 %v11869_v22, %v11874_v37 }
 0xcff   :  { %9016 = vmatprep.subr.bf16.mxu1 %v9015_v39  ;;  %9020 = vmatprep.subr.bf16.mxu0 %v9015_v39 }
 0xd00   :  { %9018 = vmatpush3.bf16.msra.mxu1 %v9015_v39  ;;  %9022 = vmatpush3.bf16.msra.mxu0 %v9015_v39 }
 0xd01   :  { %9024 = vmatprep.subr.bf16.mxu1 %v9023_v42  ;;  %9048 = vmatprep.subr.bf16.mxu0 %v9047_v18 }
 0xd03   :  { %8351 = vmatmul.mubr.msk.f32.vlgmr.msra.gmra.mrb[18].mxu1 %vm1049_vm0, %v11636_v19  ;;  %8361 = vmatmul.mubr.msk.f32.vlgmr.msra.gmra.mrb[22].mxu0 %vm1049_vm0, %v11648_v23 }
 0xd04   :  { %8353 = vmatprep.mubr.msk.f32.mxu1 %vm1049_vm0, %v11663_v28  ;;  %8363 = vmatprep.mubr.msk.f32.mxu0 %vm1049_vm0, %v11660_v27 }
 0xd05   :  { %9026 = vmatpush3.bf16.msra.mxu1 %v9023_v42  ;;  %9050 = vmatpush3.bf16.msra.mxu0 %v9047_v18 }
 0xd06   :  { %9028 = vmatprep.subr.bf16.mxu1 %v9027_v35  ;;  %9052 = vmatprep.subr.bf16.mxu0 %v9051_v25 }
 0xd07   :  { %8354 = vmatmul.mubr.msk.f32.gmra.mrb[20].mxu1 %vm1049_vm0, %v11675_v32  ;;  %8364 = vmatmul.mubr.msk.f32.gmra.mrb[24].mxu0 %vm1049_vm0, %v11672_v31 }
 0xd09   :  { %9030 = vmatpush3.bf16.msra.mxu1 %v9027_v35  ;;  %9054 = vmatpush3.bf16.msra.mxu0 %v9051_v25  ;;  %v3268_v25 = vld [vmem:[#allocation21 + $0x8] sm:$0xff] }
 0xd0a   :  { %9032 = vmatprep.subr.bf16.mxu1 %v9031_v52 }
 0xdd6   :  { %v8352_v58 = vpop.f32.mrb[18].mxu1  ;;  %v8362_v59 = vpop.f32.mrb[22].mxu0 }
 0xdd7   :  { %v2670_v60 = vpop.f32.mrb[19].mxu1  ;;  %v2755_v61 = vpop.f32.mrb[23].mxu0 }
 0xdd8   :  { %8374 = vmatprep.mubr.msk.f32.mxu1 %vm1358_vm2, %v2755_v61 }
 0xdd9   :  { %8375 = vmatmul.mubr.msk.f32.vlgmr.msra.gmra.mrb[22].mxu1 %vm1358_vm2, %v8362_v59 }
 0xdda   :  { %v8355_v2 = vpop.f32.mrb[20].mxu1  ;;  %v8365_v3 = vpop.f32.mrb[24].mxu0  ;;  %9034 = vmatpush3.bf16.msra.mxu1 %v9031_v52 }
 0xddb   :  { %v2680_v5 = vpop.f32.mrb[21].mxu1  ;;  %v2765_v8 = vpop.f32.mrb[25].mxu0  ;;  %9036 = vmatprep.subr.bf16.mxu1 %v9035_v62 }
 0xddc   :  { %8377 = vmatprep.mubr.msk.f32.mxu1 %vm1358_vm2, %v2765_v8 }
 0xddd   :  { %8378 = vmatmul.mubr.msk.f32.gmra.mrb[24].mxu1 %vm1358_vm2, %v8365_v3  ;;  %v3271_v3 = vld [vmem:[#allocation20] sm:$0xff] }
 0xdde   :  { %9038 = vmatpush3.bf16.msra.mxu1 %v9035_v62  ;;  %8388 = vmatprep.mubr.msk.f32.mxu1 %vm1358_vm2, %v2670_v60 }
 0xddf   :  { %9040 = vmatprep.subr.bf16.mxu1 %v9039_v14 }
 0xde1   :  { %8389 = vmatmul.mubr.msk.f32.vlgmr.msra.gmra.mrb[22].mxu1 %vm1358_vm2, %v8352_v58 }
 0xde2   :  { %8391 = vmatprep.mubr.msk.f32.mxu1 %vm1358_vm2, %v2680_v5  ;;  %9042 = vmatpush3.bf16.msra.mxu1 %v9039_v14  ;;  %v3272_v5 = vld [vmem:[#allocation20 + $0x8] sm:$0xff] }
 0xde3   :  { %9044 = vmatprep.subr.bf16.mxu1 %v9043_v13  ;;  %v9063_v10 = vpack.c.bf16 %v3272_v5, %v3271_v3 }
 0xde5   :  { %8392 = vmatmul.mubr.msk.f32.gmra.mrb[24].mxu1 %vm1358_vm2, %v8355_v2 }
 0xde6   :  { %9046 = vmatpush3.bf16.msra.mxu1 %v9043_v13  ;;  %8402 = vmatprep.mubr.msk.f32.mxu1 %vm1358_vm2, %v11771_v11  ;;  %v3274_v13 = vld [vmem:[#allocation20 + $0x18] sm:$0xff] }
 0xde7   :  { %v9067_v16 = vpack.c.bf16 %v3274_v13, %v3273_v12 }
 0xde9   :  { %8403 = vmatmul.mubr.msk.f32.vlgmr.msra.gmra.mrb[22].mxu1 %vm1358_vm2, %v11769_v9 }
 0xdea   :  { %8405 = vmatprep.mubr.msk.f32.mxu1 %vm1358_vm2, %v11775_v30 }
 0xded   :  { %8406 = vmatmul.mubr.msk.f32.gmra.mrb[24].mxu1 %vm1358_vm2, %v11773_v29 }
 0xebc   :  { %v8404_v39 = vpop.f32.mrb[22].mxu1 }
 0xebd   :  { %v3077_v42 = vadd.f32 %v8404_v39, %v7581_v33  ;;  %v3046_v43 = vpop.f32.mrb[23].mxu1  ;;  %v3448_v39 = vld [vmem:[#allocation23] sm:$0xff] }
 0xebe   :  { %v3076_v46 = vadd.f32 %v7581_v33, %v3046_v43 }
 0xebf   :  { %v3081_v51 = vmax.f32 %v3077_v42, 0.0  ;;  %v3449_v42 = vld [vmem:[#allocation23 + $0x8] sm:$0xff] }
 0xec0   :  { %v3080_v35 = vmax.f32 %v3076_v46, 0.0  ;;  %v8407_v41 = vpop.f32.mrb[24].mxu1  ;;  %v9079_v43 = vpack.c.bf16 %v3449_v42, %v3448_v39  ;;  %v3269_v46 = vld [vmem:[#allocation21 + $0x10] sm:$0xff]  ;;  %v4022_v42 = vld [vmem:[%s12443_s4] sm:$0xff] }
 0xec1   :  { %v3079_v52 = vadd.f32 %v8407_v41, %v7581_v33  ;;  %v3056_v53 = vpop.f32.mrb[25].mxu1 }
 0xec2   :  { %v3078_v54 = vadd.f32 %v7581_v33, %v3056_v53  ;;  %8416 = vmatprep.mubr.msk.f32.mxu0 %vm1358_vm2, %v3080_v35  ;;  %v9071_v33 = vpack.c.bf16 %v3268_v25, %v3267_v17  ;;  %9080 = vmatprep.subr.bf16.mxu1 %v9079_v43  ;;  %v3270_v35 = vld [vmem:[#allocation21 + $0x18] sm:$0xff]  ;;  %v3450_v53 = vld [vmem:[#allocation23 + $0x10] sm:$0xff]  ;;  %v3719_v25 = vld [vmem:[#allocation32 + $0x18] sm:$0xff] }
 0xec3   :  { %8417 = vmatmul.mubr.msk.f32.vlgmr.msra.gmra.mrb[26].mxu0 %vm1358_vm2, %v3081_v51  ;;  %v3083_v55 = vmax.f32 %v3079_v52, 0.0  ;;  %9082 = vmatpush3.bf16.msra.mxu1 %v9079_v43  ;;  %v9075_v52 = vpack.c.bf16 %v3270_v35, %v3269_v46  ;;  %v3718_v17 = vld [vmem:[#allocation32 + $0x10] sm:$0xff]  ;;  %v4023_v43 = vld [vmem:[%s12443_s4 + $0x8] sm:$0xff] }
 0xec4   :  { %v3082_v18 = vmax.f32 %v3078_v54, 0.0  ;;  %v3451_v54 = vld [vmem:[#allocation23 + $0x18] sm:$0xff]  ;;  %v9119_v46 = vpack.c.bf16 %v4023_v43, %v4022_v42 }
 0xec5   :  { %v3714_v35 = vld [vmem:[%s12442_s25 + $0x10] sm:$0xff] }
 0xec6   :  { %8419 = vmatprep.mubr.msk.f32.mxu0 %vm1358_vm2, %v3082_v18  ;;  %v9083_v18 = vpack.c.bf16 %v3451_v54, %v3450_v53 }
 0xec7   :  { %8420 = vmatmul.mubr.msk.f32.gmra.mrb[28].mxu0 %vm1358_vm2, %v3083_v55  ;;  %v7593_v55 = vld [vmem:[#allocation17] ss:$0 sm:$0xff] }
 0xec8   :  { %8430 = vmatprep.mubr.msk.f32.mxu0 %vm1358_vm2, %v11834_v0  ;;  %9084 = vmatprep.subr.bf16.mxu1 %v9083_v18 }
 0xec9   :  { %9086 = vmatpush3.bf16.msra.mxu1 %v9083_v18 }
 0xf96   :  { %v8418_v58 = vpop.f32.mrb[26].mxu0 }
 0xf97   :  { %v3179_v59 = vadd.f32 %v8418_v58, %v7582_v57  ;;  %v3173_v60 = vpop.f32.mrb[27].mxu0 }
 0xf98   :  { %v3174_v61 = vadd.f32 %v7582_v57, %v3173_v60 }
 0xf9a   :  { %v9055_v62 = vpack.c.bf16 %v3179_v59, %v3174_v61  ;;  %v8421_v63 = vpop.f32.mrb[28].mxu0 }
 0xf9b   :  { %v3189_v1 = vadd.f32 %v8421_v63, %v7582_v57  ;;  %v3183_v2 = vpop.f32.mrb[29].mxu0  ;;  %v7594_v63 = vld [vmem:[#allocation18] ss:$0 sm:$0xff] }
 0xf9c   :  { %v3184_v8 = vadd.f32 %v7582_v57, %v3183_v2  ;;  %9056 = vmatprep.subr.bf16.mxu0 %v9055_v62 }
 0xf9d   :  { %9058 = vmatpush3.bf16.msra.mxu0 %v9055_v62 }
 0xf9e   :  { %v9059_v14 = vpack.c.bf16 %v3189_v1, %v3184_v8 }
 0xfa0   :  { %9060 = vmatprep.subr.bf16.mxu0 %v9059_v14 }
 0xfa1   :  { %9062 = vmatpush3.bf16.msra.mxu0 %v9059_v14  ;;  %v3716_v14 = vld [vmem:[#allocation32] sm:$0xff] }
 0xfa2   :  { %9064 = vmatprep.subr.bf16.mxu0 %v9063_v10 }
 0xfa4   :  { %8431 = vmatmul.mubr.msk.f32.vlgmr.msra.gmra.mrb[30].mxu0 %vm1358_vm2, %v11844_v40 }
 0xfa5   :  { %9066 = vmatpush3.bf16.msra.mxu0 %v9063_v10  ;;  %v3717_v10 = vld [vmem:[#allocation32 + $0x8] sm:$0xff] }
 0xfa6   :  { %9068 = vmatprep.subr.bf16.mxu0 %v9067_v16 }
 0xfa9   :  { %9070 = vmatpush3.bf16.msra.mxu0 %v9067_v16  ;;  %v9095_v16 = vpack.c.bf16 %v3717_v10, %v3716_v14 }
 0xfaa   :  { %9072 = vmatprep.subr.bf16.mxu0 %v9071_v33 }
0x1077   :  { %v8432_v41 = vpop.f32.mrb[30].mxu0 }
0x1078   :  { %v3258_v51 = vpop.f32.mrb[31].mxu0 }
0x1079   :  { %8441 = vmatprep.mubr.msk.f32.mxu0 %vm1358_vm2, %v3258_v51 }
0x107a   :  { %8442 = vmatmul.mubr.msk.f32.vlgmr.msra.gmra.mrb[32].mxu0 %vm1358_vm2, %v8432_v41  ;;  %v3715_v41 = vld [vmem:[%s12442_s25 + $0x18] sm:$0xff] }
0x107b   :  { %9074 = vmatpush3.bf16.msra.mxu0 %v9071_v33  ;;  %8452 = vmatprep.mubr.msk.f32.mxu0 %vm1358_vm2, %v11874_v37  ;;  %v9099_v33 = vpack.c.bf16 %v3719_v25, %v3718_v17  ;;  %v9107_v18 = vpack.c.bf16 %v3715_v41, %v3714_v35  ;;  %v7623_v41 = vld [vmem:[#allocation35] ss:$0 sm:$0xff] }
0x107c   :  { %9076 = vmatprep.subr.bf16.mxu0 %v9075_v52 }
0x107f   :  { %9078 = vmatpush3.bf16.msra.mxu0 %v9075_v52 }
0x1082   :  { %8453 = vmatmul.mubr.msk.f32.vlgmr.msra.gmra.mrb[32].mxu0 %vm1358_vm2, %v11869_v22 }
0x1083   :  { %8480 = vmatprep.mubr.msk.f32.mxu0 %vm1049_vm0, %v11651_v24 }
0x1155   :  { %v8454_v57 = vpop.f32.mrb[32].mxu0 }
0x1156   :  { %v3445_v58 = vadd.f32 %v8454_v57, %v7593_v55  ;;  %v3428_v59 = vpop.f32.mrb[33].mxu0  ;;  %v3915_v57 = vld [vmem:[#allocation33 + $0x8] sm:$0xff] }
0x1157   :  { %v3444_v60 = vadd.f32 %v7593_v55, %v3428_v59  ;;  %v3914_v55 = vld [vmem:[#allocation33] sm:$0xff] }
0x1158   :  { %v3447_v62 = vmax.f32 %v3445_v58, 0.0 }
0x1159   :  { %v3446_v61 = vmax.f32 %v3444_v60, 0.0 }
0x115b   :  { %8463 = vmatprep.mubr.msk.f32.mxu1 %vm1358_vm2, %v3446_v61 }
0x115c   :  { %8464 = vmatmul.mubr.msk.f32.vlgmr.msra.gmra.mrb[26].mxu1 %vm1358_vm2, %v3447_v62  ;;  %v9111_v62 = vpack.c.bf16 %v3915_v57, %v3914_v55 }
0x115d   :  { %8470 = vmatprep.mubr.msk.f32.mxu1 %vm1049_vm0, %v11639_v20 }
0x122f   :  { %v8465_v1 = vpop.f32.mrb[26].mxu1 }
0x1230   :  { %v3537_v2 = vadd.f32 %v8465_v1, %v7594_v63  ;;  %v3531_v3 = vpop.f32.mrb[27].mxu1  ;;  %v3917_v1 = vld [vmem:[#allocation33 + $0x18] sm:$0xff] }
0x1231   :  { %v3532_v5 = vadd.f32 %v7594_v63, %v3531_v3  ;;  %v3916_v63 = vld [vmem:[#allocation33 + $0x10] sm:$0xff] }
0x1232   :  { %v3541_v8 = vadd.f32 %v3537_v2, %v11869_v22  ;;  %v3712_v22 = vld [vmem:[%s12442_s25] sm:$0xff]  ;;  %v9115_v2 = vpack.c.bf16 %v3917_v1, %v3916_v63  ;;  %v4407_v3 = vld [vmem:[#allocation39] sm:$0xff] }
0x1233   :  { %v3540_v12 = vadd.f32 %v3532_v5, %v11874_v37  ;;  %v3713_v37 = vld [vmem:[%s12442_s25 + $0x8] sm:$0xff] }
0x1234   :  { %v9103_v39 = vpack.c.bf16 %v3713_v37, %v3712_v22 }
0x1235   :  { %v9087_v13 = vpack.c.bf16 %v3541_v8, %v3540_v12 }
0x1237   :  { %9088 = vmatprep.subr.bf16.mxu1 %v9087_v13  ;;  %9092 = vmatprep.subr.bf16.mxu0 %v9087_v13 }
0x1238   :  { %9090 = vmatpush3.bf16.msra.mxu1 %v9087_v13  ;;  %9094 = vmatpush3.bf16.msra.mxu0 %v9087_v13 }
0x1239   :  { %9096 = vmatprep.subr.bf16.mxu1 %v9095_v16  ;;  %9120 = vmatprep.subr.bf16.mxu0 %v9119_v46 }
0x123b   :  { %8471 = vmatmul.mubr.msk.f32.vlgmr.msra.gmra.mrb[28].mxu1 %vm1049_vm0, %v11636_v19  ;;  %8481 = vmatmul.mubr.msk.f32.vlgmr.msra.gmra.mrb[34].mxu0 %vm1049_vm0, %v11648_v23 }
0x123c   :  { %8473 = vmatprep.mubr.msk.f32.mxu1 %vm1049_vm0, %v11663_v28  ;;  %8483 = vmatprep.mubr.msk.f32.mxu0 %vm1049_vm0, %v11660_v27 }
0x123d   :  { %9098 = vmatpush3.bf16.msra.mxu1 %v9095_v16  ;;  %9122 = vmatpush3.bf16.msra.mxu0 %v9119_v46 }
0x123e   :  { %9100 = vmatprep.subr.bf16.mxu1 %v9099_v33 }
0x123f   :  { %8474 = vmatmul.mubr.msk.f32.gmra.mrb[30].mxu1 %vm1049_vm0, %v11675_v32  ;;  %8484 = vmatmul.mubr.msk.f32.gmra.mrb[36].mxu0 %vm1049_vm0, %v11672_v31 }
0x1241   :  { %9102 = vmatpush3.bf16.msra.mxu1 %v9099_v33 }
0x1242   :  { %9104 = vmatprep.subr.bf16.mxu1 %v9103_v39 }
0x130e   :  { %v8472_v51 = vpop.f32.mrb[28].mxu1  ;;  %v8482_v52 = vpop.f32.mrb[34].mxu0 }
0x130f   :  { %v3608_v53 = vpop.f32.mrb[29].mxu1  ;;  %v3693_v54 = vpop.f32.mrb[35].mxu0 }
0x1310   :  { %8494 = vmatprep.mubr.msk.f32.mxu1 %vm1358_vm2, %v3693_v54 }
0x1311   :  { %8495 = vmatmul.mubr.msk.f32.vlgmr.msra.gmra.mrb[32].mxu1 %vm1358_vm2, %v8482_v52 }
0x1312   :  { %v8475_v58 = vpop.f32.mrb[30].mxu1  ;;  %v8485_v59 = vpop.f32.mrb[36].mxu0  ;;  %9106 = vmatpush3.bf16.msra.mxu1 %v9103_v39  ;;  %v7618_v39 = vld [vmem:[#allocation30] ss:$0 sm:$0xff] }
0x1313   :  { %v3618_v60 = vpop.f32.mrb[31].mxu1  ;;  %v3703_v61 = vpop.f32.mrb[37].mxu0  ;;  %9108 = vmatprep.subr.bf16.mxu1 %v9107_v18 }
0x1314   :  { %8497 = vmatprep.mubr.msk.f32.mxu1 %vm1358_vm2, %v3703_v61 }
0x1315   :  { %8498 = vmatmul.mubr.msk.f32.gmra.mrb[34].mxu1 %vm1358_vm2, %v8485_v59 }
0x1316   :  { %9110 = vmatpush3.bf16.msra.mxu1 %v9107_v18  ;;  %8508 = vmatprep.mubr.msk.f32.mxu1 %vm1358_vm2, %v3608_v53 }
0x1317   :  { %9112 = vmatprep.subr.bf16.mxu1 %v9111_v62 }
0x1319   :  { %8509 = vmatmul.mubr.msk.f32.vlgmr.msra.gmra.mrb[32].mxu1 %vm1358_vm2, %v8472_v51 }
0x131a   :  { %8511 = vmatprep.mubr.msk.f32.mxu1 %vm1358_vm2, %v3618_v60  ;;  %9114 = vmatpush3.bf16.msra.mxu1 %v9111_v62 }
0x131b   :  { %9116 = vmatprep.subr.bf16.mxu1 %v9115_v2 }
0x131d   :  { %8512 = vmatmul.mubr.msk.f32.gmra.mrb[34].mxu1 %vm1358_vm2, %v8475_v58 }
0x131e   :  { %9118 = vmatpush3.bf16.msra.mxu1 %v9115_v2  ;;  %8522 = vmatprep.mubr.msk.f32.mxu1 %vm1358_vm2, %v11771_v11  ;;  %v4025_v11 = vld [vmem:[%s12443_s4 + $0x18] sm:$0xff] }
0x131f   :  { %8567 = vmatprep.subr.mxu1 %v4407_v3 }
0x1321   :  { %8523 = vmatmul.mubr.msk.f32.vlgmr.msra.gmra.mrb[32].mxu1 %vm1358_vm2, %v11769_v9  ;;  %v4024_v9 = vld [vmem:[%s12443_s4 + $0x10] sm:$0xff] }
0x1322   :  { %8525 = vmatprep.mubr.msk.f32.mxu1 %vm1358_vm2, %v11775_v30  ;;  %8568 = vmatpush3.msra.mxu1 %v4407_v3  ;;  %v9123_v30 = vpack.c.bf16 %v4025_v11, %v4024_v9  ;;  %v7624_v9 = vld [vmem:[#allocation2] ss:$0 sm:$0xff] }
0x1324   :  { %9124 = vmatprep.subr.bf16.mxu0 %v9123_v30 }
0x1325   :  { %8526 = vmatmul.mubr.msk.f32.gmra.mrb[34].mxu1 %vm1358_vm2, %v11773_v29  ;;  %9126 = vmatpush3.bf16.msra.mxu0 %v9123_v30  ;;  %v7617_v29 = vld [vmem:[#allocation29] ss:$0 sm:$0xff] }
0x1326   :  { %8569 = vmatprep.mubr.msk.f32.mxu1 %vm1457_vm10, %v11711_v4 }
0x1329   :  { %8570 = vmatmul.mubr.msk.f32.vlgmr.msra.gmra.mrb[36].mxu1 %vm1457_vm10, %v11733_v44 }
0x132a   :  { %8572 = vmatprep.mubr.msk.f32.mxu1 %vm1457_vm10, %v11738_v49 }
0x132d   :  { %8573 = vmatmul.mubr.msk.f32.gmra.mrb[38].mxu1 %vm1457_vm10, %v11752_v15 }
0x132e   :  { %8594 = vmatprep.mubr.msk.f32.mxu1 %vm1049_vm0, %v11651_v24 }
0x13f4   :  { %v8524_v5 = vpop.f32.mrb[32].mxu1 }
0x13f5   :  { %v4015_v4 = vadd.f32 %v8524_v5, %v7617_v29  ;;  %v3984_v8 = vpop.f32.mrb[33].mxu1 }
0x13f6   :  { %v4014_v14 = vadd.f32 %v7617_v29, %v3984_v8 }
0x13f7   :  { %v4019_v12 = vmax.f32 %v4015_v4, 0.0 }
0x13f8   :  { %v4018_v44 = vmax.f32 %v4014_v14, 0.0  ;;  %v8527_v10 = vpop.f32.mrb[34].mxu1 }
0x13f9   :  { %v4017_v49 = vadd.f32 %v8527_v10, %v7617_v29  ;;  %v3994_v13 = vpop.f32.mrb[35].mxu1  ;;  %v4169_v10 = vmul.f32 %v11715_v6, %v11681_v36  ;;  %v4299_v36 = vld [vmem:[#allocation74] sm:$0xff] }
0x13fa   :  { %v4016_v16 = vadd.f32 %v7617_v29, %v3994_v13  ;;  %8536 = vmatprep.mubr.msk.f32.mxu0 %vm1358_vm2, %v4018_v44 }
0x13fb   :  { %8537 = vmatmul.mubr.msk.f32.vlgmr.msra.gmra.mrb[38].mxu0 %vm1358_vm2, %v4019_v12  ;;  %v4021_v25 = vmax.f32 %v4017_v49, 0.0  ;;  %v4168_v49 = vmul.f32 %v11717_v7, %v11683_v38 }
0x13fc   :  { %v4020_v15 = vmax.f32 %v4016_v16, 0.0  ;;  %v11986_v17 = vpop.f32.mrb[36].mxu1 }
0x13fd   :  { %v11988_v33 = vpop.f32.mrb[37].mxu1 }
0x13fe   :  { %8539 = vmatprep.mubr.msk.f32.mxu0 %vm1358_vm2, %v4020_v15 }
0x13ff   :  { %8540 = vmatmul.mubr.msk.f32.gmra.mrb[40].mxu0 %vm1358_vm2, %v4021_v25 }
0x1400   :  { %v11992_v22 = vpop.f32.mrb[38].mxu1  ;;  %8550 = vmatprep.mubr.msk.f32.mxu0 %vm1358_vm2, %v11834_v0 }
0x1401   :  { %v11996_v37 = vpop.f32.mrb[39].mxu1 }
0x14ce   :  { %v8538_v42 = vpop.f32.mrb[38].mxu0 }
0x14cf   :  { %v4117_v43 = vadd.f32 %v8538_v42, %v7618_v39  ;;  %v4111_v46 = vpop.f32.mrb[39].mxu0  ;;  %v7627_v42 = vld [vmem:[#allocation72] ss:$0 sm:$0xff] }
0x14d0   :  { %v4112_v35 = vadd.f32 %v7618_v39, %v4111_v46  ;;  %v4171_v46 = vmul.f32 %v11735_v47, %v11691_v45  ;;  %v4281_v45 = vmul.f32 %v7627_v42, %v11721_v21 }
0x14d1   :  { %v4131_v51 = vmax.f32 %v4117_v43, 0.0  ;;  %v4170_v43 = vmul.f32 %v11727_v34, %v11693_v48 }
0x14d2   :  { %v4130_v52 = vmax.f32 %v4112_v35, 0.0  ;;  %v8541_v53 = vpop.f32.mrb[40].mxu0 }
0x14d3   :  { %v4127_v54 = vadd.f32 %v8541_v53, %v7618_v39  ;;  %v4121_v18 = vpop.f32.mrb[41].mxu0  ;;  %v4142_v55 = vmul.f32 %v7623_v41, %v4131_v51  ;;  %v4280_v51 = vmul.f32 %v7627_v42, %v11723_v26  ;;  %v7628_v53 = vld [vmem:[#allocation69] ss:$0 sm:$0xff] }
0x14d4   :  { %v4122_v57 = vadd.f32 %v7618_v39, %v4121_v18  ;;  %v4141_v58 = vmul.f32 %v7623_v41, %v4130_v52  ;;  %v4292_v26 = vadd.f32 %v7628_v53, %v4281_v45 }
0x14d5   :  { %v4148_v59 = vsel %vm1049_vm0, %v4142_v55, 0.0  ;;  %v4133_v60 = vmax.f32 %v4127_v54, 0.0  ;;  %v4291_v55 = vadd.f32 %v7628_v53, %v4280_v51 }
0x14d6   :  { %v4132_v61 = vmax.f32 %v4122_v57, 0.0  ;;  %4149 = vadd.xlane.f32.xlu1 %v4148_v59  ;;  %v4145_v62 = vsel %vm1049_vm0, %v4141_v58, 0.0  ;;  %v4301_v57 = vld [vmem:[#allocation74 + $0x10] sm:$0xff]  ;;  %v4302_v58 = vld [vmem:[#allocation74 + $0x18] sm:$0xff] }
0x14d7   :  { %4146 = vadd.xlane.f32.xlu0 %v4145_v62  ;;  %v4144_v2 = vmul.f32 %v7623_v41, %v4133_v60  ;;  %v9139_v48 = vpack.c.bf16 %v4302_v58, %v4301_v57  ;;  %v4295_v59 = vmax.f32 %v4291_v55, 0.0  ;;  %v4282_v60 = vmul.f32 %v7627_v42, %v11744_v50 }
0x14d8   :  { %v4143_v63 = vmul.f32 %v7623_v41, %v4132_v61  ;;  %v4300_v41 = vld [vmem:[#allocation74 + $0x8] sm:$0xff]  ;;  %v4283_v61 = vmul.f32 %v7627_v42, %v11756_v56 }
0x14d9   :  { %v4154_v3 = vsel %vm1049_vm0, %v4144_v2, 0.0  ;;  %v9135_v18 = vpack.c.bf16 %v4300_v41, %v4299_v36  ;;  %v4293_v62 = vadd.f32 %v7628_v53, %v4282_v60  ;;  %v4757_v41 = vld [vmem:[#allocation44 + $0x18] sm:$0xff] }
0x14da   :  { %v4151_v1 = vsel %vm1049_vm0, %v4143_v63, 0.0  ;;  %v4497_v63 = vld [vmem:[%s11282_s19] sm:$0xff]  ;;  %v4294_v21 = vadd.f32 %v7628_v53, %v4283_v61  ;;  %s12444_s19 = sld [smem:[#allocation144_spill]] }
0x14db   :  { %4152 = vadd.xlane.f32.xlu0 %v4151_v1  ;;  %v4296_v1 = vmax.f32 %v4292_v26, 0.0  ;;  %v4297_v2 = vmax.f32 %v4293_v62, 0.0  ;;  %v5072_v53 = vld [vmem:[#allocation47] sm:$0xff]  ;;  %v4953_v61 = vld [vmem:[#allocation45 + $0x8] sm:$0xff] }
0x14dc   :  { %v4298_v50 = vmax.f32 %v4294_v21, 0.0  ;;  %v4952_v26 = vld [vmem:[#allocation45] sm:$0xff] }
0x14df   :  { %4155 = vadd.xlane.f32.xlu0 %v4154_v3  ;;  %v9545_v3 = vld [vmem:[%s12430_s15] sm:$0xff] }
0x14e0   :  { %v4750_v51 = vld [vmem:[%s12444_s19] sm:$0xff]  ;;  %v4752_v55 = vld [vmem:[%s12444_s19 + $0x10] sm:$0xff]  ;;  %v4753_v57 = vld [vmem:[%s12444_s19 + $0x18] sm:$0xff] }
0x14e1   :  { %v9163_v60 = vpack.c.bf16 %v4753_v57, %v4752_v55  ;;  %v5259_v55 = vld [vmem:[#allocation51] sm:$0xff]  ;;  %v5260_v57 = vld [vmem:[#allocation51 + $0x8] sm:$0xff] }
0x1563   :  { %v4150_v11 = vpop.xlane.xlu1 %4149 }
0x1564   :  { %v4165_v30 = vadd.f32 %v7624_v9, %v4150_v11  ;;  %v4147_v29 = vpop.xlane.xlu0 %4146 }
0x1565   :  { %v4164_v5 = vadd.f32 %v7624_v9, %v4147_v29 }
0x1566   :  { %4179 = vperm.xlu0 %9535, %v4165_v30   ;;  %v7629_v30 = vld [vmem:[#allocation71] ss:$0 sm:$0xff] }
0x1567   :  { %4174 = vperm.xlu1 %9536, %v4164_v5  }
0x1568   :  { %v4153_v4 = vpop.xlane.xlu0 %4152 }
0x1569   :  { %v4166_v8 = vadd.f32 %v7624_v9, %v4153_v4 }
0x156b   :  { %4184 = vperm.xlu1 %9536, %v4166_v8  }
0x156c   :  { %v4156_v14 = vpop.xlane.xlu0 %4155 }
0x156d   :  { %v4167_v44 = vadd.f32 %v7624_v9, %v4156_v14  ;;  %v9546_v9 = vld [vmem:[%s12430_s15 + $0x8] sm:$0xff] }
0x156f   :  { %4189 = vperm.xlu1 %9536, %v4167_v44  }
0x15e5   :  { %v4180_v12 = vpop.permute.xlu0 %4179 }
0x15e6   :  { %v4193_v13 = vmul.f32 %v4180_v12, %v4169_v10  ;;  %v4175_v16 = vpop.permute.xlu1 %4174 }
0x15e7   :  { %v4192_v15 = vmul.f32 %v4175_v16, %v4168_v49  ;;  %v7638_v16 = vld [vmem:[#allocation81] ss:$0 sm:$0xff] }
0x15e9   :  { %v9127_v25 = vpack.c.bf16 %v4193_v13, %v4192_v15 }
0x15ea   :  { %v4185_v39 = vpop.permute.xlu1 %4184 }
0x15eb   :  { %9128 = vmatprep.subr.bf16.mxu0 %v9127_v25  ;;  %v4194_v38 = vmul.f32 %v4185_v39, %v4170_v43 }
0x15ec   :  { %9130 = vmatpush3.bf16.msra.mxu0 %v9127_v25 }
0x15ee   :  { %v4190_v35 = vpop.permute.xlu1 %4189 }
0x15ef   :  { %v4195_v52 = vmul.f32 %v4190_v35, %v4171_v46  ;;  %v4755_v46 = vld [vmem:[#allocation44 + $0x8] sm:$0xff] }
0x15f1   :  { %v9131_v54 = vpack.c.bf16 %v4195_v52, %v4194_v38  ;;  %v4751_v38 = vld [vmem:[%s12444_s19 + $0x8] sm:$0xff] }
0x15f2   :  { %v9159_v52 = vpack.c.bf16 %v4751_v38, %v4750_v51 }
0x15f3   :  { %9132 = vmatprep.subr.bf16.mxu0 %v9131_v54 }
0x15f4   :  { %9134 = vmatpush3.bf16.msra.mxu0 %v9131_v54  ;;  %v5073_v54 = vld [vmem:[#allocation47 + $0x8] sm:$0xff] }
0x15f5   :  { %9136 = vmatprep.subr.bf16.mxu0 %v9135_v18 }
0x15f7   :  { %8551 = vmatmul.mubr.msk.f32.vlgmr.msra.gmra.mrb[42].mxu0 %vm1358_vm2, %v11844_v40 }
0x15f8   :  { %9138 = vmatpush3.bf16.msra.mxu0 %v9135_v18  ;;  %8561 = vmatprep.mubr.msk.f32.mxu0 %vm1358_vm2, %v4295_v59  ;;  %v9175_v18 = vpack.c.bf16 %v5073_v54, %v5072_v53 }
0x15f9   :  { %9140 = vmatprep.subr.bf16.mxu0 %v9139_v48 }
0x15fc   :  { %9142 = vmatpush3.bf16.msra.mxu0 %v9139_v48 }
0x15fd   :  { %8575 = vmatprep.subr.mxu0 %v4497_v63 }
0x15ff   :  { %8562 = vmatmul.mubr.msk.f32.vlgmr.msra.gmra.mrb[44].mxu0 %vm1358_vm2, %v4296_v1 }
0x1600   :  { %8564 = vmatprep.mubr.msk.f32.mxu0 %vm1358_vm2, %v4297_v2  ;;  %8576 = vmatpush3.msra.mxu0 %v4497_v63  ;;  %v9167_v2 = vpack.c.bf16 %v4953_v61, %v4952_v26  ;;  %v5255_v61 = vld [vmem:[#allocation53] sm:$0xff] }
0x1603   :  { %8565 = vmatmul.mubr.msk.f32.gmra.mrb[46].mxu0 %vm1358_vm2, %v4298_v50  ;;  %v4954_v50 = vld [vmem:[#allocation45 + $0x10] sm:$0xff] }
0x1604   :  { %8577 = vmatprep.mubr.msk.f32.mxu0 %vm1457_vm10, %v9545_v3  ;;  %v4955_v3 = vld [vmem:[#allocation45 + $0x18] sm:$0xff] }
0x1607   :  { %8578 = vmatmul.mubr.msk.f32.vlgmr.msra.gmra.mrb[48].mxu0 %vm1457_vm10, %v9546_v9  ;;  %v9171_v9 = vpack.c.bf16 %v4955_v3, %v4954_v50  ;;  %v5257_v50 = vld [vmem:[#allocation53 + $0x10] sm:$0xff]  ;;  %v5258_v3 = vld [vmem:[#allocation53 + $0x18] sm:$0xff] }
0x1608   :  { %8584 = vmatprep.mubr.msk.f32.mxu0 %vm1049_vm0, %v11639_v20 }
0x16ca   :  { %v12027_v56 = vpop.f32.mrb[42].mxu0 }
0x16cb   :  { %v12029_v11 = vpop.f32.mrb[43].mxu0 }
0x16d2   :  { %v8563_v29 = vpop.f32.mrb[44].mxu0 }
0x16d3   :  { %v4394_v5 = vadd.f32 %v8563_v29, %v7629_v30  ;;  %v4388_v4 = vpop.f32.mrb[45].mxu0  ;;  %v5075_v29 = vld [vmem:[#allocation47 + $0x18] sm:$0xff] }
0x16d4   :  { %v4389_v8 = vadd.f32 %v7629_v30, %v4388_v4  ;;  %v7661_v4 = vld [vmem:[#allocation41] ss:$0 sm:$0xff] }
0x16d5   :  { %v12032_v14 = vmul.f32 %v11986_v17, %v4394_v5  ;;  %v4754_v17 = vld [vmem:[#allocation44] sm:$0xff] }
0x16d6   :  { %v12035_v44 = vmul.f32 %v11988_v33, %v4389_v8  ;;  %v8566_v10 = vpop.f32.mrb[46].mxu0  ;;  %v9151_v36 = vpack.c.bf16 %v4755_v46, %v4754_v17 }
0x16d7   :  { %v4404_v12 = vadd.f32 %v8566_v10, %v7629_v30  ;;  %v4398_v49 = vpop.f32.mrb[47].mxu0 }
0x16d8   :  { %v4399_v13 = vadd.f32 %v7629_v30, %v4398_v49  ;;  %v5074_v30 = vld [vmem:[#allocation47 + $0x10] sm:$0xff] }
0x16d9   :  { %v12038_v15 = vmul.f32 %v11992_v22, %v4404_v12  ;;  %v4756_v22 = vld [vmem:[#allocation44 + $0x10] sm:$0xff]  ;;  %v9179_v5 = vpack.c.bf16 %v5075_v29, %v5074_v30  ;;  %v9203_v29 = vpack.c.bf16 %v5258_v3, %v5257_v50 }
0x16da   :  { %v12041_v25 = vmul.f32 %v11996_v37, %v4399_v13  ;;  %v8579_v39 = vpop.f32.mrb[48].mxu0  ;;  %v9155_v37 = vpack.c.bf16 %v4757_v41, %v4756_v22  ;;  %v7662_v22 = vld [vmem:[#allocation42] ss:$0 sm:$0xff] }
0x16db   :  { %v12043_v42 = vadd.f32 %v8579_v39, %v7638_v16  ;;  %v4571_v43 = vpop.f32.mrb[49].mxu0 }
0x16dc   :  { %v12045_v35 = vadd.f32 %v7638_v16, %v4571_v43 }
0x16de   :  { %v9143_v33 = vpack.c.bf16 %v12043_v42, %v12045_v35 }
0x16e0   :  { %9144 = vmatprep.subr.bf16.mxu0 %v9143_v33  ;;  %9148 = vmatprep.subr.bf16.mxu1 %v9143_v33 }
0x16e1   :  { %9146 = vmatpush3.bf16.msra.mxu0 %v9143_v33  ;;  %9150 = vmatpush3.bf16.msra.mxu1 %v9143_v33 }
0x16e2   :  { %9152 = vmatprep.subr.bf16.mxu0 %v9151_v36  ;;  %9176 = vmatprep.subr.bf16.mxu1 %v9175_v18 }
0x16e4   :  { %8585 = vmatmul.mubr.msk.f32.vlgmr.msra.gmra.mrb[50].mxu0 %vm1049_vm0, %v11636_v19  ;;  %8595 = vmatmul.mubr.msk.f32.vlgmr.msra.gmra.mrb[40].mxu1 %vm1049_vm0, %v11648_v23 }
0x16e5   :  { %8587 = vmatprep.mubr.msk.f32.mxu0 %vm1049_vm0, %v11663_v28  ;;  %8597 = vmatprep.mubr.msk.f32.mxu1 %vm1049_vm0, %v11660_v27 }
0x16e6   :  { %9154 = vmatpush3.bf16.msra.mxu0 %v9151_v36  ;;  %9178 = vmatpush3.bf16.msra.mxu1 %v9175_v18 }
0x16e7   :  { %9156 = vmatprep.subr.bf16.mxu0 %v9155_v37  ;;  %9180 = vmatprep.subr.bf16.mxu1 %v9179_v5 }
0x16e8   :  { %8588 = vmatmul.mubr.msk.f32.gmra.mrb[52].mxu0 %vm1049_vm0, %v11675_v32  ;;  %8598 = vmatmul.mubr.msk.f32.gmra.mrb[42].mxu1 %vm1049_vm0, %v11672_v31 }
0x16ea   :  { %9158 = vmatpush3.bf16.msra.mxu0 %v9155_v37  ;;  %9182 = vmatpush3.bf16.msra.mxu1 %v9179_v5  ;;  %v5438_v5 = vld [vmem:[#allocation54 + $0x10] sm:$0xff] }
0x16eb   :  { %9160 = vmatprep.subr.bf16.mxu0 %v9159_v52 }
0x17b7   :  { %v8586_v58 = vpop.f32.mrb[50].mxu0  ;;  %v8596_v48 = vpop.f32.mrb[40].mxu1 }
0x17b8   :  { %v4646_v45 = vpop.f32.mrb[51].mxu0  ;;  %v4731_v59 = vpop.f32.mrb[41].mxu1 }
0x17b9   :  { %8608 = vmatprep.mubr.msk.f32.mxu0 %vm1358_vm2, %v4731_v59  ;;  %v5261_v59 = vld [vmem:[#allocation51 + $0x10] sm:$0xff] }
0x17ba   :  { %8609 = vmatmul.mubr.msk.f32.vlgmr.msra.gmra.mrb[54].mxu0 %vm1358_vm2, %v8596_v48 }
0x17bb   :  { %v8589_v62 = vpop.f32.mrb[52].mxu0  ;;  %v8599_v63 = vpop.f32.mrb[42].mxu1  ;;  %9162 = vmatpush3.bf16.msra.mxu0 %v9159_v52 }
0x17bc   :  { %v4656_v1 = vpop.f32.mrb[53].mxu0  ;;  %v4741_v21 = vpop.f32.mrb[43].mxu1  ;;  %9164 = vmatprep.subr.bf16.mxu0 %v9163_v60 }
0x17bd   :  { %8611 = vmatprep.mubr.msk.f32.mxu0 %vm1358_vm2, %v4741_v21  ;;  %v5437_v21 = vld [vmem:[#allocation54 + $0x8] sm:$0xff] }
0x17be   :  { %8612 = vmatmul.mubr.msk.f32.gmra.mrb[56].mxu0 %vm1358_vm2, %v8599_v63 }
0x17bf   :  { %9166 = vmatpush3.bf16.msra.mxu0 %v9163_v60  ;;  %8622 = vmatprep.mubr.msk.f32.mxu0 %vm1358_vm2, %v4646_v45  ;;  %v9191_v45 = vpack.c.bf16 %v5260_v57, %v5259_v55  ;;  %v5262_v60 = vld [vmem:[#allocation51 + $0x18] sm:$0xff] }
0x17c0   :  { %9168 = vmatprep.subr.bf16.mxu0 %v9167_v2  ;;  %v9195_v26 = vpack.c.bf16 %v5262_v60, %v5261_v59  ;;  %v5702_v59 = vld [vmem:[#allocation60 + $0x10] sm:$0xff]  ;;  %v5703_v60 = vld [vmem:[#allocation60 + $0x18] sm:$0xff] }
0x17c2   :  { %8623 = vmatmul.mubr.msk.f32.vlgmr.msra.gmra.mrb[54].mxu0 %vm1358_vm2, %v8586_v58 }
0x17c3   :  { %8625 = vmatprep.mubr.msk.f32.mxu0 %vm1358_vm2, %v4656_v1  ;;  %9170 = vmatpush3.bf16.msra.mxu0 %v9167_v2  ;;  %v5436_v1 = vld [vmem:[#allocation54] sm:$0xff] }
0x17c4   :  { %9172 = vmatprep.subr.bf16.mxu0 %v9171_v9  ;;  %v9207_v2 = vpack.c.bf16 %v5437_v21, %v5436_v1  ;;  %v9235_v1 = vpack.c.bf16 %v5703_v60, %v5702_v59  ;;  %v5902_v21 = vld [vmem:[#allocation59] sm:$0xff]  ;;  %v6198_v60 = vld [vmem:[#allocation66 + $0x8] sm:$0xff] }
0x17c5   :  { %v6197_v59 = vld [vmem:[#allocation66] sm:$0xff] }
0x17c6   :  { %8626 = vmatmul.mubr.msk.f32.gmra.mrb[56].mxu0 %vm1358_vm2, %v8589_v62  ;;  %v5256_v62 = vld [vmem:[#allocation53 + $0x8] sm:$0xff] }
0x17c7   :  { %9174 = vmatpush3.bf16.msra.mxu0 %v9171_v9  ;;  %8636 = vmatprep.mubr.msk.f32.mxu0 %vm1358_vm2, %v12035_v44  ;;  %v9199_v63 = vpack.c.bf16 %v5256_v62, %v5255_v61 }
0x17c8   :  { %9208 = vmatprep.subr.bf16.mxu0 %v9207_v2 }
0x17ca   :  { %8637 = vmatmul.mubr.msk.f32.vlgmr.msra.gmra.mrb[54].mxu0 %vm1358_vm2, %v12032_v14 }
0x17cb   :  { %8639 = vmatprep.mubr.msk.f32.mxu0 %vm1358_vm2, %v12041_v25  ;;  %9210 = vmatpush3.bf16.msra.mxu0 %v9207_v2  ;;  %v5903_v2 = vld [vmem:[#allocation59 + $0x8] sm:$0xff] }
0x17ce   :  { %8640 = vmatmul.mubr.msk.f32.gmra.mrb[56].mxu0 %vm1358_vm2, %v12038_v15 }
0x189d   :  { %v8638_v8 = vpop.f32.mrb[54].mxu0 }
0x189e   :  { %v5065_v10 = vadd.f32 %v8638_v8, %v7661_v4  ;;  %v5034_v12 = vpop.f32.mrb[55].mxu0 }
0x189f   :  { %v5064_v49 = vadd.f32 %v7661_v4, %v5034_v12 }
0x18a0   :  { %v5069_v39 = vmax.f32 %v5065_v10, 0.0  ;;  %v7673_v10 = vld [vmem:[#allocation48] ss:$0 sm:$0xff] }
0x18a1   :  { %v5068_v13 = vmax.f32 %v5064_v49, 0.0  ;;  %v8641_v16 = vpop.f32.mrb[56].mxu0 }
0x18a2   :  { %v5067_v43 = vadd.f32 %v8641_v16, %v7661_v4  ;;  %v5044_v17 = vpop.f32.mrb[57].mxu0 }
0x18a3   :  { %v5066_v46 = vadd.f32 %v7661_v4, %v5044_v17  ;;  %8650 = vmatprep.mubr.msk.f32.mxu1 %vm1358_vm2, %v5068_v13  ;;  %v5439_v4 = vld [vmem:[#allocation54 + $0x18] sm:$0xff] }
0x18a4   :  { %8651 = vmatmul.mubr.msk.f32.vlgmr.msra.gmra.mrb[44].mxu1 %vm1358_vm2, %v5069_v39  ;;  %v5071_v36 = vmax.f32 %v5067_v43, 0.0  ;;  %v9211_v8 = vpack.c.bf16 %v5439_v4, %v5438_v5  ;;  %v7674_v17 = vld [vmem:[#allocation50] ss:$0 sm:$0xff]  ;;  %v5904_v5 = vld [vmem:[#allocation59 + $0x10] sm:$0xff] }
0x18a5   :  { %v5070_v33 = vmax.f32 %v5066_v46, 0.0  ;;  %v5905_v4 = vld [vmem:[#allocation59 + $0x18] sm:$0xff] }
0x18a6   :  { %9212 = vmatprep.subr.bf16.mxu0 %v9211_v8 }
0x18a7   :  { %8653 = vmatprep.mubr.msk.f32.mxu1 %vm1358_vm2, %v5070_v33  ;;  %9214 = vmatpush3.bf16.msra.mxu0 %v9211_v8  ;;  %v9243_v8 = vpack.c.bf16 %v5905_v4, %v5904_v5  ;;  %v6195_v5 = vld [vmem:[%s12446_s0 + $0x10] sm:$0xff]  ;;  %v6196_v4 = vld [vmem:[%s12446_s0 + $0x18] sm:$0xff] }
0x18a8   :  { %8654 = vmatmul.mubr.msk.f32.gmra.mrb[46].mxu1 %vm1358_vm2, %v5071_v36 }
0x18a9   :  { %8664 = vmatprep.mubr.msk.f32.mxu1 %vm1358_vm2, %v11834_v0 }
0x1977   :  { %v8652_v41 = vpop.f32.mrb[44].mxu1 }
0x1978   :  { %v5167_v37 = vadd.f32 %v8652_v41, %v7662_v22  ;;  %v5161_v51 = vpop.f32.mrb[45].mxu1 }
0x1979   :  { %v5162_v38 = vadd.f32 %v7662_v22, %v5161_v51  ;;  %v5705_v51 = vld [vmem:[%s12445_s26 + $0x8] sm:$0xff] }
0x197b   :  { %v9183_v52 = vpack.c.bf16 %v5167_v37, %v5162_v38  ;;  %v8655_v53 = vpop.f32.mrb[46].mxu1  ;;  %v5704_v37 = vld [vmem:[%s12445_s26] sm:$0xff] }
0x197c   :  { %v5177_v54 = vadd.f32 %v8655_v53, %v7662_v22  ;;  %v5171_v18 = vpop.f32.mrb[47].mxu1  ;;  %v9223_v53 = vpack.c.bf16 %v5705_v51, %v5704_v37 }
0x197d   :  { %v5172_v58 = vadd.f32 %v7662_v22, %v5171_v18  ;;  %9184 = vmatprep.subr.bf16.mxu1 %v9183_v52  ;;  %v5707_v18 = vld [vmem:[%s12445_s26 + $0x18] sm:$0xff] }
0x197e   :  { %9186 = vmatpush3.bf16.msra.mxu1 %v9183_v52 }
0x197f   :  { %v9187_v48 = vpack.c.bf16 %v5177_v54, %v5172_v58  ;;  %v5706_v54 = vld [vmem:[%s12445_s26 + $0x10] sm:$0xff]  ;;  %v6010_v58 = vld [vmem:[#allocation62] sm:$0xff] }
0x1980   :  { %v9227_v55 = vpack.c.bf16 %v5707_v18, %v5706_v54  ;;  %v7698_v54 = vld [vmem:[#allocation57] ss:$0 sm:$0xff] }
0x1981   :  { %9188 = vmatprep.subr.bf16.mxu1 %v9187_v48 }
0x1982   :  { %9190 = vmatpush3.bf16.msra.mxu1 %v9187_v48  ;;  %v6011_v48 = vld [vmem:[#allocation62 + $0x8] sm:$0xff] }
0x1983   :  { %9192 = vmatprep.subr.bf16.mxu1 %v9191_v45 }
0x1985   :  { %8665 = vmatmul.mubr.msk.f32.vlgmr.msra.gmra.mrb[48].mxu1 %vm1358_vm2, %v11844_v40 }
0x1986   :  { %9194 = vmatpush3.bf16.msra.mxu1 %v9191_v45  ;;  %v9247_v45 = vpack.c.bf16 %v6011_v48, %v6010_v58 }
0x1987   :  { %9196 = vmatprep.subr.bf16.mxu1 %v9195_v26 }
0x198a   :  { %9198 = vmatpush3.bf16.msra.mxu1 %v9195_v26 }
0x198b   :  { %9200 = vmatprep.subr.bf16.mxu1 %v9199_v63 }
0x1a58   :  { %v8666_v9 = vpop.f32.mrb[48].mxu1 }
0x1a59   :  { %v5246_v30 = vpop.f32.mrb[49].mxu1 }
0x1a5a   :  { %8675 = vmatprep.mubr.msk.f32.mxu1 %vm1358_vm2, %v5246_v30 }
0x1a5b   :  { %8676 = vmatmul.mubr.msk.f32.vlgmr.msra.gmra.mrb[50].mxu1 %vm1358_vm2, %v8666_v9 }
0x1a5c   :  { %9202 = vmatpush3.bf16.msra.mxu1 %v9199_v63  ;;  %8686 = vmatprep.mubr.msk.f32.mxu1 %vm1358_vm2, %v12045_v35 }
0x1a5d   :  { %9204 = vmatprep.subr.bf16.mxu1 %v9203_v29 }
0x1a60   :  { %9206 = vmatpush3.bf16.msra.mxu1 %v9203_v29  ;;  %v9239_v29 = vpack.c.bf16 %v5903_v2, %v5902_v21  ;;  %v6193_v2 = vld [vmem:[%s12446_s0] sm:$0xff] }
0x1a63   :  { %8687 = vmatmul.mubr.msk.f32.vlgmr.msra.gmra.mrb[50].mxu1 %vm1358_vm2, %v12043_v42 }
0x1a64   :  { %8714 = vmatprep.mubr.msk.f32.mxu1 %vm1049_vm0, %v11651_v24 }
0x1b36   :  { %v8688_v12 = vpop.f32.mrb[50].mxu1 }
0x1b37   :  { %v5433_v49 = vadd.f32 %v8688_v12, %v7673_v10  ;;  %v5416_v13 = vpop.f32.mrb[51].mxu1  ;;  %v6013_v12 = vld [vmem:[#allocation62 + $0x18] sm:$0xff] }
0x1b38   :  { %v5432_v16 = vadd.f32 %v7673_v10, %v5416_v13  ;;  %v6012_v10 = vld [vmem:[#allocation62 + $0x10] sm:$0xff]  ;;  %v7697_v13 = vld [vmem:[#allocation56] ss:$0 sm:$0xff] }
0x1b39   :  { %v5435_v43 = vmax.f32 %v5433_v49, 0.0  ;;  %v9251_v49 = vpack.c.bf16 %v6013_v12, %v6012_v10  ;;  %v9275_v12 = vpack.c.bf16 %v6196_v4, %v6195_v5 }
0x1b3a   :  { %v5434_v39 = vmax.f32 %v5432_v16, 0.0 }
0x1b3c   :  { %8697 = vmatprep.mubr.msk.f32.mxu0 %vm1358_vm2, %v5434_v39 }
0x1b3d   :  { %8698 = vmatmul.mubr.msk.f32.vlgmr.msra.gmra.mrb[58].mxu0 %vm1358_vm2, %v5435_v43 }
0x1b3e   :  { %8704 = vmatprep.mubr.msk.f32.mxu0 %vm1049_vm0, %v11639_v20 }
0x1c10   :  { %v8699_v46 = vpop.f32.mrb[58].mxu0 }
0x1c11   :  { %v5525_v33 = vadd.f32 %v8699_v46, %v7674_v17  ;;  %v5519_v36 = vpop.f32.mrb[59].mxu0 }
0x1c12   :  { %v5520_v22 = vadd.f32 %v7674_v17, %v5519_v36 }
0x1c13   :  { %v12102_v41 = vadd.f32 %v5525_v33, %v12043_v42  ;;  %v5700_v42 = vld [vmem:[#allocation60] sm:$0xff] }
0x1c14   :  { %v12107_v38 = vadd.f32 %v5520_v22, %v12045_v35  ;;  %v5701_v35 = vld [vmem:[#allocation60 + $0x8] sm:$0xff] }
0x1c15   :  { %v9231_v57 = vpack.c.bf16 %v5701_v35, %v5700_v42 }
0x1c16   :  { %v9215_v52 = vpack.c.bf16 %v12102_v41, %v12107_v38 }
0x1c18   :  { %9216 = vmatprep.subr.bf16.mxu0 %v9215_v52  ;;  %9220 = vmatprep.subr.bf16.mxu1 %v9215_v52 }
0x1c19   :  { %9218 = vmatpush3.bf16.msra.mxu0 %v9215_v52  ;;  %9222 = vmatpush3.bf16.msra.mxu1 %v9215_v52 }
0x1c1a   :  { %9224 = vmatprep.subr.bf16.mxu0 %v9223_v53  ;;  %9248 = vmatprep.subr.bf16.mxu1 %v9247_v45 }
0x1c1c   :  { %8705 = vmatmul.mubr.msk.f32.vlgmr.msra.gmra.mrb[60].mxu0 %vm1049_vm0, %v11636_v19  ;;  %8715 = vmatmul.mubr.msk.f32.vlgmr.msra.gmra.mrb[52].mxu1 %vm1049_vm0, %v11648_v23 }
0x1c1d   :  { %8707 = vmatprep.mubr.msk.f32.mxu0 %vm1049_vm0, %v11663_v28  ;;  %8717 = vmatprep.mubr.msk.f32.mxu1 %vm1049_vm0, %v11660_v27 }
0x1c1e   :  { %9226 = vmatpush3.bf16.msra.mxu0 %v9223_v53  ;;  %9250 = vmatpush3.bf16.msra.mxu1 %v9247_v45 }
0x1c1f   :  { %9228 = vmatprep.subr.bf16.mxu0 %v9227_v55  ;;  %9252 = vmatprep.subr.bf16.mxu1 %v9251_v49 }
0x1c20   :  { %8708 = vmatmul.mubr.msk.f32.gmra.mrb[62].mxu0 %vm1049_vm0, %v11675_v32  ;;  %8718 = vmatmul.mubr.msk.f32.gmra.mrb[54].mxu1 %vm1049_vm0, %v11672_v31 }
0x1c22   :  { %9230 = vmatpush3.bf16.msra.mxu0 %v9227_v55  ;;  %9254 = vmatpush3.bf16.msra.mxu1 %v9251_v49  ;;  %v6376_v49 = vld [vmem:[#allocation68 + $0x10] sm:$0xff] }
0x1c23   :  { %9232 = vmatprep.subr.bf16.mxu0 %v9231_v57 }
0x1cef   :  { %v8706_v26 = vpop.f32.mrb[60].mxu0  ;;  %v8716_v61 = vpop.f32.mrb[52].mxu1 }
0x1cf0   :  { %v5596_v62 = vpop.f32.mrb[61].mxu0  ;;  %v5681_v63 = vpop.f32.mrb[53].mxu1 }
0x1cf1   :  { %8728 = vmatprep.mubr.msk.f32.mxu0 %vm1358_vm2, %v5681_v63  ;;  %v6199_v63 = vld [vmem:[#allocation66 + $0x10] sm:$0xff] }
0x1cf2   :  { %8729 = vmatmul.mubr.msk.f32.vlgmr.msra.gmra.mrb[64].mxu0 %vm1358_vm2, %v8716_v61 }
0x1cf3   :  { %v8709_v50 = vpop.f32.mrb[62].mxu0  ;;  %v8719_v3 = vpop.f32.mrb[54].mxu1  ;;  %9234 = vmatpush3.bf16.msra.mxu0 %v9231_v57 }
0x1cf4   :  { %v5606_v9 = vpop.f32.mrb[63].mxu0  ;;  %v5691_v30 = vpop.f32.mrb[55].mxu1  ;;  %9236 = vmatprep.subr.bf16.mxu0 %v9235_v1 }
0x1cf5   :  { %8731 = vmatprep.mubr.msk.f32.mxu0 %vm1358_vm2, %v5691_v30  ;;  %v6375_v30 = vld [vmem:[#allocation68 + $0x8] sm:$0xff] }
0x1cf6   :  { %8732 = vmatmul.mubr.msk.f32.gmra.mrb[66].mxu0 %vm1358_vm2, %v8719_v3 }
0x1cf7   :  { %9238 = vmatpush3.bf16.msra.mxu0 %v9235_v1  ;;  %8742 = vmatprep.mubr.msk.f32.mxu0 %vm1358_vm2, %v5596_v62  ;;  %v9263_v62 = vpack.c.bf16 %v6198_v60, %v6197_v59  ;;  %v6200_v1 = vld [vmem:[#allocation66 + $0x18] sm:$0xff]  ;;  %v6950_v60 = vld [vmem:[%s12447_s12 + $0x10] sm:$0xff] }
0x1cf8   :  { %9240 = vmatprep.subr.bf16.mxu0 %v9239_v29  ;;  %v9267_v21 = vpack.c.bf16 %v6200_v1, %v6199_v63 }
0x1cfa   :  { %8743 = vmatmul.mubr.msk.f32.vlgmr.msra.gmra.mrb[64].mxu0 %vm1358_vm2, %v8706_v26 }
0x1cfb   :  { %8745 = vmatprep.mubr.msk.f32.mxu0 %vm1358_vm2, %v5606_v9  ;;  %9242 = vmatpush3.bf16.msra.mxu0 %v9239_v29  ;;  %v6374_v9 = vld [vmem:[#allocation68] sm:$0xff] }
0x1cfc   :  { %9244 = vmatprep.subr.bf16.mxu0 %v9243_v8  ;;  %v9279_v29 = vpack.c.bf16 %v6375_v30, %v6374_v9  ;;  %v6640_v9 = vld [vmem:[#allocation80 + $0x10] sm:$0xff]  ;;  %v6641_v30 = vld [vmem:[#allocation80 + $0x18] sm:$0xff] }
0x1cfe   :  { %8746 = vmatmul.mubr.msk.f32.gmra.mrb[66].mxu0 %vm1358_vm2, %v8709_v50  ;;  %v6194_v50 = vld [vmem:[%s12446_s0 + $0x8] sm:$0xff] }
0x1cff   :  { %9246 = vmatpush3.bf16.msra.mxu0 %v9243_v8  ;;  %8756 = vmatprep.mubr.msk.f32.mxu0 %vm1358_vm2, %v12035_v44  ;;  %v9271_v3 = vpack.c.bf16 %v6194_v50, %v6193_v2  ;;  %v6639_v50 = vld [vmem:[#allocation80 + $0x8] sm:$0xff] }
0x1d00   :  { %9280 = vmatprep.subr.bf16.mxu0 %v9279_v29 }
0x1d02   :  { %8757 = vmatmul.mubr.msk.f32.vlgmr.msra.gmra.mrb[64].mxu0 %vm1358_vm2, %v12032_v14 }
0x1d03   :  { %8759 = vmatprep.mubr.msk.f32.mxu0 %vm1358_vm2, %v12041_v25  ;;  %9282 = vmatpush3.bf16.msra.mxu0 %v9279_v29 }
0x1d06   :  { %8760 = vmatmul.mubr.msk.f32.gmra.mrb[66].mxu0 %vm1358_vm2, %v12038_v15 }
0x1dd5   :  { %v8758_v16 = vpop.f32.mrb[64].mxu0 }
0x1dd6   :  { %v6003_v39 = vadd.f32 %v8758_v16, %v7697_v13  ;;  %v5972_v43 = vpop.f32.mrb[65].mxu0 }
0x1dd7   :  { %v6002_v17 = vadd.f32 %v7697_v13, %v5972_v43 }
0x1dd8   :  { %v6007_v36 = vmax.f32 %v6003_v39, 0.0  ;;  %v7709_v39 = vld [vmem:[#allocation63] ss:$0 sm:$0xff] }
0x1dd9   :  { %v6006_v46 = vmax.f32 %v6002_v17, 0.0  ;;  %v8761_v33 = vpop.f32.mrb[66].mxu0 }
0x1dda   :  { %v6005_v22 = vadd.f32 %v8761_v33, %v7697_v13  ;;  %v5982_v37 = vpop.f32.mrb[67].mxu0 }
0x1ddb   :  { %v6004_v51 = vadd.f32 %v7697_v13, %v5982_v37  ;;  %8770 = vmatprep.mubr.msk.f32.mxu1 %vm1358_vm2, %v6006_v46  ;;  %v6377_v13 = vld [vmem:[#allocation68 + $0x18] sm:$0xff] }
0x1ddc   :  { %8771 = vmatmul.mubr.msk.f32.vlgmr.msra.gmra.mrb[56].mxu1 %vm1358_vm2, %v6007_v36  ;;  %v6009_v53 = vmax.f32 %v6005_v22, 0.0  ;;  %v9283_v16 = vpack.c.bf16 %v6377_v13, %v6376_v49  ;;  %v7710_v37 = vld [vmem:[#allocation65] ss:$0 sm:$0xff]  ;;  %v6841_v49 = vld [vmem:[#allocation78 + $0x8] sm:$0xff] }
0x1ddd   :  { %v6008_v52 = vmax.f32 %v6004_v51, 0.0 }
0x1dde   :  { %9284 = vmatprep.subr.bf16.mxu0 %v9283_v16 }
0x1ddf   :  { %8773 = vmatprep.mubr.msk.f32.mxu1 %vm1358_vm2, %v6008_v52  ;;  %9286 = vmatpush3.bf16.msra.mxu0 %v9283_v16 }
0x1de0   :  { %8774 = vmatmul.mubr.msk.f32.gmra.mrb[58].mxu1 %vm1358_vm2, %v6009_v53 }
0x1de1   :  { %8784 = vmatprep.mubr.msk.f32.mxu1 %vm1358_vm2, %v11834_v0 }
0x1eaf   :  { %v8772_v18 = vpop.f32.mrb[56].mxu1 }
0x1eb0   :  { %v6105_v55 = vadd.f32 %v8772_v18, %v7698_v54  ;;  %v6099_v42 = vpop.f32.mrb[57].mxu1  ;;  %v6948_v18 = vld [vmem:[%s12447_s12] sm:$0xff] }
0x1eb1   :  { %v6100_v35 = vadd.f32 %v7698_v54, %v6099_v42  ;;  %v6949_v42 = vld [vmem:[%s12447_s12 + $0x8] sm:$0xff] }
0x1eb3   :  { %v9255_v57 = vpack.c.bf16 %v6105_v55, %v6100_v35  ;;  %v8775_v58 = vpop.f32.mrb[58].mxu1  ;;  %v6642_v35 = vld [vmem:[%s12448_s1] sm:$0xff] }
0x1eb4   :  { %v6115_v48 = vadd.f32 %v8775_v58, %v7698_v54  ;;  %v6109_v45 = vpop.f32.mrb[59].mxu1 }
0x1eb5   :  { %v6110_v26 = vadd.f32 %v7698_v54, %v6109_v45  ;;  %9256 = vmatprep.subr.bf16.mxu1 %v9255_v57  ;;  %v9319_v45 = vpack.c.bf16 %v6949_v42, %v6948_v18 }
0x1eb6   :  { %9258 = vmatpush3.bf16.msra.mxu1 %v9255_v57  ;;  %v6643_v57 = vld [vmem:[%s12448_s1 + $0x8] sm:$0xff] }
0x1eb7   :  { %v9259_v61 = vpack.c.bf16 %v6115_v48, %v6110_v26  ;;  %v9295_v59 = vpack.c.bf16 %v6643_v57, %v6642_v35  ;;  %v6951_v26 = vld [vmem:[%s12447_s12 + $0x18] sm:$0xff]  ;;  %v7739_v57 = vld [vmem:[%s11272_s8] ss:$0 sm:$0xff] }
0x1eb9   :  { %9260 = vmatprep.subr.bf16.mxu1 %v9259_v61 }
0x1eba   :  { %9262 = vmatpush3.bf16.msra.mxu1 %v9259_v61  ;;  %v6644_v61 = vld [vmem:[%s12448_s1 + $0x10] sm:$0xff] }
0x1ebb   :  { %9264 = vmatprep.subr.bf16.mxu1 %v9263_v62 }
0x1ebd   :  { %8785 = vmatmul.mubr.msk.f32.vlgmr.msra.gmra.mrb[60].mxu1 %vm1358_vm2, %v11844_v40 }
0x1ebe   :  { %9266 = vmatpush3.bf16.msra.mxu1 %v9263_v62  ;;  %v6645_v62 = vld [vmem:[%s12448_s1 + $0x18] sm:$0xff] }
0x1ebf   :  { %9268 = vmatprep.subr.bf16.mxu1 %v9267_v21  ;;  %v9299_v63 = vpack.c.bf16 %v6645_v62, %v6644_v61 }
0x1ec2   :  { %9270 = vmatpush3.bf16.msra.mxu1 %v9267_v21  ;;  %v12187_v21 = vld [vmem:[%s12427_s2] sm:$0xff] }
0x1ec3   :  { %9272 = vmatprep.subr.bf16.mxu1 %v9271_v3  ;;  %v12191_v2 = vadd.f32 %v12187_v21, %v12029_v11  ;;  %v6638_v11 = vld [vmem:[#allocation80] sm:$0xff] }
0x1f90   :  { %v8786_v8 = vpop.f32.mrb[60].mxu1 }
0x1f91   :  { %v6184_v10 = vpop.f32.mrb[61].mxu1 }
0x1f92   :  { %8795 = vmatprep.mubr.msk.f32.mxu1 %vm1358_vm2, %v6184_v10  ;;  %v9307_v10 = vpack.c.bf16 %v6641_v30, %v6640_v9 }
0x1f93   :  { %8796 = vmatmul.mubr.msk.f32.vlgmr.msra.gmra.mrb[62].mxu1 %vm1358_vm2, %v8786_v8 }
0x1f94   :  { %9274 = vmatpush3.bf16.msra.mxu1 %v9271_v3  ;;  %8806 = vmatprep.mubr.msk.f32.mxu1 %vm1358_vm2, %v12107_v38  ;;  %v9303_v3 = vpack.c.bf16 %v6639_v50, %v6638_v11 }
0x1f95   :  { %9276 = vmatprep.subr.bf16.mxu1 %v9275_v12 }
0x1f98   :  { %9278 = vmatpush3.bf16.msra.mxu1 %v9275_v12  ;;  %v6840_v12 = vld [vmem:[#allocation78] sm:$0xff] }
0x1f9b   :  { %8807 = vmatmul.mubr.msk.f32.vlgmr.msra.gmra.mrb[62].mxu1 %vm1358_vm2, %v12102_v41 }
0x1f9c   :  { %8834 = vmatprep.mubr.msk.f32.mxu1 %vm1049_vm0, %v11651_v24 }
0x206e   :  { %v8808_v43 = vpop.f32.mrb[62].mxu1 }
0x206f   :  { %v6371_v17 = vadd.f32 %v8808_v43, %v7709_v39  ;;  %v6354_v46 = vpop.f32.mrb[63].mxu1 }
0x2070   :  { %v6370_v33 = vadd.f32 %v7709_v39, %v6354_v46  ;;  %v6842_v46 = vld [vmem:[#allocation78 + $0x10] sm:$0xff] }
0x2071   :  { %v6373_v22 = vmax.f32 %v6371_v17, 0.0  ;;  %v9311_v17 = vpack.c.bf16 %v6841_v49, %v6840_v12 }
0x2072   :  { %v6372_v36 = vmax.f32 %v6370_v33, 0.0  ;;  %v6843_v33 = vld [vmem:[#allocation78 + $0x18] sm:$0xff] }
0x2074   :  { %8817 = vmatprep.mubr.msk.f32.mxu0 %vm1358_vm2, %v6372_v36  ;;  %v9315_v36 = vpack.c.bf16 %v6843_v33, %v6842_v46 }
0x2075   :  { %8818 = vmatmul.mubr.msk.f32.vlgmr.msra.gmra.mrb[68].mxu0 %vm1358_vm2, %v6373_v22  ;;  %v7733_v22 = vld [vmem:[#allocation75] ss:$0 sm:$0xff] }
0x2076   :  { %8824 = vmatprep.mubr.msk.f32.mxu0 %vm1049_vm0, %v11639_v20 }
0x2148   :  { %v8819_v51 = vpop.f32.mrb[68].mxu0 }
0x2149   :  { %v6463_v52 = vadd.f32 %v8819_v51, %v7710_v37  ;;  %v6457_v53 = vpop.f32.mrb[69].mxu0 }
0x214a   :  { %v6458_v54 = vadd.f32 %v7710_v37, %v6457_v53 }
0x214b   :  { %v6467_v55 = vadd.f32 %v6463_v52, %v12102_v41  ;;  %v9323_v41 = vpack.c.bf16 %v6951_v26, %v6950_v60 }
0x214c   :  { %v6466_v58 = vadd.f32 %v6458_v54, %v12107_v38  ;;  %v12180_v38 = vld [vmem:[%s12427_s2 + $0x8] sm:$0xff] }
0x214d   :  { %v12184_v1 = vadd.f32 %v12180_v38, %v12027_v56 }
0x214e   :  { %v9287_v48 = vpack.c.bf16 %v6467_v55, %v6466_v58 }
0x214f   :  { %v12203_v56 = vpack.c.bf16 %v12184_v1, %v12191_v2 }
0x2150   :  { %9288 = vmatprep.subr.bf16.mxu0 %v9287_v48  ;;  %9292 = vmatprep.subr.bf16.mxu1 %v9287_v48 }
0x2151   :  { %9290 = vmatpush3.bf16.msra.mxu0 %v9287_v48  ;;  %9294 = vmatpush3.bf16.msra.mxu1 %v9287_v48 }
0x2152   :  { %9320 = vmatprep.subr.bf16.mxu1 %v9319_v45  ;;  %9296 = vmatprep.subr.bf16.mxu0 %v9295_v59 }
0x2154   :  { %8825 = vmatmul.mubr.msk.f32.vlgmr.msra.gmra.mrb[70].mxu0 %vm1049_vm0, %v11636_v19  ;;  %8835 = vmatmul.mubr.msk.f32.vlgmr.msra.gmra.mrb[64].mxu1 %vm1049_vm0, %v11648_v23 }
0x2155   :  { %8827 = vmatprep.mubr.msk.f32.mxu0 %vm1049_vm0, %v11663_v28  ;;  %8837 = vmatprep.mubr.msk.f32.mxu1 %vm1049_vm0, %v11660_v27 }
0x2156   :  { %9322 = vmatpush3.bf16.msra.mxu1 %v9319_v45  ;;  %9298 = vmatpush3.bf16.msra.mxu0 %v9295_v59 }
0x2157   :  { %9324 = vmatprep.subr.bf16.mxu1 %v9323_v41  ;;  %9300 = vmatprep.subr.bf16.mxu0 %v9299_v63 }
0x2158   :  { %8828 = vmatmul.mubr.msk.f32.gmra.mrb[72].mxu0 %vm1049_vm0, %v11675_v32  ;;  %8838 = vmatmul.mubr.msk.f32.gmra.mrb[66].mxu1 %vm1049_vm0, %v11672_v31 }
0x215a   :  { %9326 = vmatpush3.bf16.msra.mxu1 %v9323_v41  ;;  %9302 = vmatpush3.bf16.msra.mxu0 %v9299_v63 }
0x215b   :  { %9328 = vmatprep.subr.bf16.mxu1 %v12203_v56  ;;  %9304 = vmatprep.subr.bf16.mxu0 %v9303_v3 }
0x2227   :  { %v8826_v29 = vpop.f32.mrb[70].mxu0  ;;  %v8836_v5 = vpop.f32.mrb[64].mxu1 }
0x2228   :  { %v6534_v4 = vpop.f32.mrb[71].mxu0  ;;  %v6619_v8 = vpop.f32.mrb[65].mxu1 }
0x2229   :  { %8848 = vmatprep.mubr.msk.f32.mxu0 %vm1358_vm2, %v6619_v8 }
0x222a   :  { %8849 = vmatmul.mubr.msk.f32.vlgmr.msra.gmra.mrb[74].mxu0 %vm1358_vm2, %v8836_v5 }
0x222b   :  { %v8829_v13 = vpop.f32.mrb[72].mxu0  ;;  %v8839_v16 = vpop.f32.mrb[66].mxu1  ;;  %9306 = vmatpush3.bf16.msra.mxu0 %v9303_v3 }
0x222c   :  { %v6544_v39 = vpop.f32.mrb[73].mxu0  ;;  %v6629_v43 = vpop.f32.mrb[67].mxu1  ;;  %9308 = vmatprep.subr.bf16.mxu0 %v9307_v10 }
0x222d   :  { %8851 = vmatprep.mubr.msk.f32.mxu0 %vm1358_vm2, %v6629_v43 }
0x222e   :  { %8852 = vmatmul.mubr.msk.f32.gmra.mrb[76].mxu0 %vm1358_vm2, %v8839_v16 }
0x222f   :  { %9310 = vmatpush3.bf16.msra.mxu0 %v9307_v10  ;;  %8862 = vmatprep.mubr.msk.f32.mxu0 %vm1358_vm2, %v6534_v4 }
0x2230   :  { %9312 = vmatprep.subr.bf16.mxu0 %v9311_v17 }
0x2232   :  { %8863 = vmatmul.mubr.msk.f32.vlgmr.msra.gmra.mrb[74].mxu0 %vm1358_vm2, %v8826_v29 }
0x2233   :  { %8865 = vmatprep.mubr.msk.f32.mxu0 %vm1358_vm2, %v6544_v39  ;;  %9314 = vmatpush3.bf16.msra.mxu0 %v9311_v17 }
0x2234   :  { %9316 = vmatprep.subr.bf16.mxu0 %v9315_v36 }
0x2236   :  { %8866 = vmatmul.mubr.msk.f32.gmra.mrb[76].mxu0 %vm1358_vm2, %v8829_v13  ;;  %v7740_v13 = vld [vmem:[#allocation3] ss:$0 sm:$0xff] }
0x2237   :  { %9318 = vmatpush3.bf16.msra.mxu0 %v9315_v36  ;;  %8876 = vmatprep.mubr.msk.f32.mxu0 %vm1358_vm2, %v12035_v44 }
0x223a   :  { %8877 = vmatmul.mubr.msk.f32.vlgmr.msra.gmra.mrb[74].mxu0 %vm1358_vm2, %v12032_v14 }
0x223b   :  { %8879 = vmatprep.mubr.msk.f32.mxu0 %vm1358_vm2, %v12041_v25 }
0x223e   :  { %8880 = vmatmul.mubr.msk.f32.gmra.mrb[76].mxu0 %vm1358_vm2, %v12038_v15 }
0x223f   :  { %8924 = vmatprep.mubr.msk.f32.mxu0 %vm1358_vm2, %v11834_v0 }
0x230d   :  { %v8878_v37 = vpop.f32.mrb[74].mxu0 }
0x230e   :  { %v6941_v51 = vadd.f32 %v8878_v37, %v7733_v22  ;;  %v6910_v52 = vpop.f32.mrb[75].mxu0 }
0x230f   :  { %v6940_v53 = vadd.f32 %v7733_v22, %v6910_v52 }
0x2310   :  { %v6945_v44 = vmax.f32 %v6941_v51, 0.0 }
0x2311   :  { %v6944_v54 = vmax.f32 %v6940_v53, 0.0  ;;  %v8881_v18 = vpop.f32.mrb[76].mxu0 }
0x2312   :  { %v6943_v55 = vadd.f32 %v8881_v18, %v7733_v22  ;;  %v6920_v42 = vpop.f32.mrb[77].mxu0 }
0x2313   :  { %v6942_v14 = vadd.f32 %v7733_v22, %v6920_v42  ;;  %8890 = vmatprep.mubr.msk.f32.mxu1 %vm1358_vm2, %v6944_v54 }
0x2314   :  { %8891 = vmatmul.mubr.msk.f32.vlgmr.msra.gmra.mrb[68].mxu1 %vm1358_vm2, %v6945_v44  ;;  %v6947_v15 = vmax.f32 %v6943_v55, 0.0 }
0x2315   :  { %v6946_v25 = vmax.f32 %v6942_v14, 0.0  ;;  %9330 = vmatpush3.bf16.msra.mxu1 %v12203_v56 }
0x2316   :  { %9332 = vmatprep.subr.bf16.mxu1 %v12203_v56 }
0x2317   :  { %8893 = vmatprep.mubr.msk.f32.mxu1 %vm1358_vm2, %v6946_v25 }
0x2318   :  { %8894 = vmatmul.mubr.msk.f32.gmra.mrb[70].mxu1 %vm1358_vm2, %v6947_v15 }
0x2319   :  { %8900 = vmatprep.mubr.msk.f32.mxu1 %vm1049_vm0, %v11639_v20 }
0x231c   :  { %8901 = vmatmul.mubr.msk.f32.vlgmr.msra.gmra.mrb[72].mxu1 %vm1049_vm0, %v11636_v19  ;;  %v7734_v19 = vld [vmem:[#allocation77] ss:$0 sm:$0xff] }
0x231d   :  { %9334 = vmatpush3.bf16.msra.mxu1 %v12203_v56  ;;  %8903 = vmatprep.mubr.msk.f32.mxu1 %vm1049_vm0, %v11663_v28 }
0x2320   :  { %8904 = vmatmul.mubr.msk.f32.gmra.mrb[74].mxu1 %vm1049_vm0, %v11675_v32 }
0x2321   :  { %8910 = vmatprep.mubr.msk.f32.mxu1 %vm1049_vm0, %v11651_v24 }
0x2324   :  { %8911 = vmatmul.mubr.msk.f32.vlgmr.msra.gmra.mrb[76].mxu1 %vm1049_vm0, %v11648_v23 }
0x2325   :  { %8913 = vmatprep.mubr.msk.f32.mxu1 %vm1049_vm0, %v11660_v27 }
0x2328   :  { %8914 = vmatmul.mubr.msk.f32.gmra.mrb[78].mxu1 %vm1049_vm0, %v11672_v31 }
0x23e7   :  { %v8892_v20 = vpop.f32.mrb[68].mxu1 }
0x23e8   :  { %v7043_v0 = vadd.f32 %v8892_v20, %v7734_v19  ;;  %v7037_v35 = vpop.f32.mrb[69].mxu1 }
0x23e9   :  { %v7038_v28 = vadd.f32 %v7734_v19, %v7037_v35 }
0x23ea   :  { %v7057_v58 = vmax.f32 %v7043_v0, 0.0 }
0x23eb   :  { %v7056_v32 = vmax.f32 %v7038_v28, 0.0  ;;  %v8895_v48 = vpop.f32.mrb[70].mxu1 }
0x23ec   :  { %v7053_v45 = vadd.f32 %v8895_v48, %v7734_v19  ;;  %v7047_v24 = vpop.f32.mrb[71].mxu1  ;;  %v7068_v59 = vmul.f32 %v7739_v57, %v7057_v58 }
0x23ed   :  { %v7048_v60 = vadd.f32 %v7734_v19, %v7047_v24  ;;  %v7067_v23 = vmul.f32 %v7739_v57, %v7056_v32 }
0x23ee   :  { %v7074_v26 = vsel %vm1049_vm0, %v7068_v59, 0.0  ;;  %v7059_v27 = vmax.f32 %v7053_v45, 0.0 }
0x23ef   :  { %v7058_v61 = vmax.f32 %v7048_v60, 0.0  ;;  %7075 = vadd.xlane.f32.xlu1 %v7074_v26  ;;  %v8902_v31 = vpop.f32.mrb[72].mxu1  ;;  %v7071_v62 = vsel %vm1049_vm0, %v7067_v23, 0.0 }
0x23f0   :  { %7072 = vadd.xlane.f32.xlu0 %v7071_v62  ;;  %v7160_v41 = vpop.f32.mrb[73].mxu1  ;;  %v7070_v50 = vmul.f32 %v7739_v57, %v7059_v27 }
0x23f1   :  { %v7069_v63 = vmul.f32 %v7739_v57, %v7058_v61 }
0x23f2   :  { %v7080_v30 = vsel %vm1049_vm0, %v7070_v50, 0.0 }
0x23f3   :  { %v8905_v56 = vpop.f32.mrb[74].mxu1  ;;  %v7077_v11 = vsel %vm1049_vm0, %v7069_v63, 0.0 }
0x23f4   :  { %7078 = vadd.xlane.f32.xlu0 %v7077_v11  ;;  %v7170_v3 = vpop.f32.mrb[75].mxu1 }
0x23f7   :  { %v8912_v9 = vpop.f32.mrb[76].mxu1 }
0x23f8   :  { %v7265_v29 = vsub.f32 %v8902_v31, %v8912_v9  ;;  %7081 = vadd.xlane.f32.xlu0 %v7080_v30  ;;  %v7245_v5 = vpop.f32.mrb[77].mxu1 }
0x23f9   :  { %v7264_v4 = vsub.f32 %v7160_v41, %v7245_v5 }
0x23fa   :  { %v7269_v37 = vmul.f32 %v11715_v6, %v7265_v29 }
0x23fb   :  { %v8915_v8 = vpop.f32.mrb[78].mxu1  ;;  %v7268_v52 = vmul.f32 %v11717_v7, %v7264_v4 }
0x23fc   :  { %v7267_v10 = vsub.f32 %v8905_v56, %v8915_v8  ;;  %v7255_v12 = vpop.f32.mrb[79].mxu1 }
0x23fd   :  { %v7266_v49 = vsub.f32 %v7170_v3, %v7255_v12 }
0x23fe   :  { %v7271_v14 = vmul.f32 %v11735_v47, %v7267_v10 }
0x23ff   :  { %v7270_v42 = vmul.f32 %v11727_v34, %v7266_v49 }
0x247c   :  { %v7076_v16 = vpop.xlane.xlu1 %7075 }
0x247d   :  { %v7091_v39 = vadd.f32 %v7740_v13, %v7076_v16  ;;  %v7073_v43 = vpop.xlane.xlu0 %7072 }
0x247e   :  { %v7090_v17 = vadd.f32 %v7740_v13, %v7073_v43 }
0x247f   :  { %7279 = vperm.xlu0 %9535, %v7091_v39  }
0x2480   :  { %7274 = vperm.xlu1 %9536, %v7090_v17  }
0x2481   :  { %v7079_v46 = vpop.xlane.xlu0 %7078 }
0x2482   :  { %v7092_v33 = vadd.f32 %v7740_v13, %v7079_v46 }
0x2484   :  { %7284 = vperm.xlu1 %9536, %v7092_v33  }
0x2485   :  { %v7082_v36 = vpop.xlane.xlu0 %7081 }
0x2486   :  { %v7093_v22 = vadd.f32 %v7740_v13, %v7082_v36 }
0x2488   :  { %7289 = vperm.xlu1 %9536, %v7093_v22  }
0x24fe   :  { %v7280_v51 = vpop.permute.xlu0 %7279 }
0x24ff   :  { %v7293_v53 = vmul.f32 %v7280_v51, %v7269_v37  ;;  %v7275_v54 = vpop.permute.xlu1 %7274 }
0x2500   :  { %v7292_v18 = vmul.f32 %v7275_v54, %v7268_v52 }
0x2502   :  { %v9335_v44 = vpack.c.bf16 %v7293_v53, %v7292_v18 }
0x2503   :  { %v7285_v55 = vpop.permute.xlu1 %7284 }
0x2504   :  { %9336 = vmatprep.subr.bf16.mxu0 %v9335_v44  ;;  %v7294_v15 = vmul.f32 %v7285_v55, %v7270_v42 }
0x2505   :  { %9338 = vmatpush3.bf16.msra.mxu0 %v9335_v44 }
0x2507   :  { %v7290_v25 = vpop.permute.xlu1 %7289 }
0x2508   :  { %v7295_v19 = vmul.f32 %v7290_v25, %v7271_v14 }
0x250a   :  { %v9339_v6 = vpack.c.bf16 %v7295_v19, %v7294_v15 }
0x250c   :  { %9340 = vmatprep.subr.bf16.mxu0 %v9339_v6 }
0x250d   :  { %9342 = vmatpush3.bf16.msra.mxu0 %v9339_v6 }
0x2510   :  { %8925 = vmatmul.mubr.msk.f32.vlgmr.msra.gmra.mrb[78].mxu0 %vm1358_vm2, %v11844_v40 }
0x25e3   :  { %v8926_v7 = vpop.f32.mrb[78].mxu0 }
0x25e4   :  { %v7372_v20 = vadd.f32 %v8926_v7, %v12184_v1  ;;  %v7362_v0 = vpop.f32.mrb[79].mxu0 }
0x25e5   :  { %v7371_v35 = vadd.f32 %v7362_v0, %v12191_v2 }
0x25e6   :  { %v7374_v34 = vsub.f32 %v7372_v20, %v12180_v38 }
0x25e7   :  { %v7373_v28 = vsub.f32 %v7371_v35, %v12187_v21 }
0x25e8   :  { %7376 = vst.msk [vmem:[%s11287_s28 + $0x8] sm:$0xff] %vm1252_vm9, %v7374_v34 }
0x25e9   :  { %7375 = vst.msk [vmem:[%s11287_s28] sm:$0xff] %vm1252_vm9, %v7373_v28 }
0x25ea   :  { %7381 = vsyncpa [#allocation5], 1 }
0x25eb   :  { %7382 = vsyncpa [#allocation7], 1 }
0x25ec   :  { %7383 = vsyncpa [#allocation10], 1 }
0x25ed   :  { %7384 = vsyncpa [#allocation13], 1 }
0x25ee   :  { %7385 = vsyncpa [#allocation16], 1 }
0x25ef   :  { %7386 = vsyncpa [#allocation19], 1 }
0x25f0   :  { %7387 = vsyncpa [#allocation22], 1 }
0x25f1   :  { %7388 = vsyncpa [#allocation25], 1 }
0x25f2   :  { %7389 = vsyncpa [#allocation28], 1 }
0x25f3   :  { %7390 = vsyncpa [#allocation31], 1 }
0x25f4   :  { %7391 = vsyncpa [#allocation34], 1 }
0x25f5   :  { %7392 = vsyncpa [#allocation37], 1 }
0x25f6   :  { %7393 = vsyncpa [#allocation40], 1 }
0x25f7   :  { %7394 = vsyncpa [#allocation43], 1 }
0x25f8   :  { %7395 = vsyncpa [#allocation46], 1 }
0x25f9   :  { %7396 = vsyncpa [#allocation49], 1 }
0x25fa   :  { %7397 = vsyncpa [#allocation52], 1 }
0x25fb   :  { %7398 = vsyncpa [#allocation55], 1 }
0x25fc   :  { %7399 = vsyncpa [#allocation58], 1 }
0x25fd   :  { %7400 = vsyncpa [#allocation61], 1 }
0x25fe   :  { %7401 = vsyncpa [#allocation64], 1 }
0x25ff   :  { %7402 = vsyncpa [#allocation67], 1 }
0x2600   :  { %7403 = vsyncpa [#allocation70], 1 }
0x2601   :  { %7404 = vsyncpa [#allocation73], 1 }
0x2602   :  { %7405 = vsyncpa [#allocation76], 1 }
0x2603   :  { %7406 = vsyncpa [#allocation79], 1 }
0x2604   :  { %7407 = vsyncpa [#allocation82], 1 }

</bundles_post_ra>
